<compile_context>
chip_gen: v6e
topology: v6e:2x2x1
jax: 0.10.0
libtpu: 0.0.40
codegen_flags: <defaults>
</compile_context>

<pallas_src>
import functools

import jax
import jax.numpy as jnp
from jax import lax
from jax.experimental import pallas as pl
from jax.experimental.pallas import tpu as pltpu

D = 768          # feature width fixed by the module
BN_EPS = 1e-5
LANE = 128


# ---------------------------------------------------------------------------
# Kernel
# ---------------------------------------------------------------------------
def _mlp_kernel(x_ref, w1_ref, b1_ref, w2_ref, b2_ref, w3_ref, b3_ref, out_ref):
    # dropout0 / dropout1 / dropout2: identity (eval mode).
    x = x_ref[...].astype(jnp.bfloat16)       # no-op if the caller passes bf16

    # layer1 (BatchNorm folded in) + ReLU
    h1 = jnp.dot(x, w1_ref[...], preferred_element_type=jnp.float32) + b1_ref[...]
    h1 = jnp.maximum(h1, 0.0).astype(jnp.bfloat16)

    # layer2 + ReLU
    h2 = jnp.dot(h1, w2_ref[...], preferred_element_type=jnp.float32) + b2_ref[...]
    h2 = jnp.maximum(h2, 0.0).astype(jnp.bfloat16)

    # output projection (lane-dense padded width)
    out_ref[...] = (
        jnp.dot(h2, w3_ref[...], preferred_element_type=jnp.float32) + b3_ref[...]
    )


# ---------------------------------------------------------------------------
# Parameter preparation — call ONCE per parameter set and reuse the result.
# ---------------------------------------------------------------------------
def fold_and_pack_params(params):
    """Fold BN into layer1, pad the head to 128 lanes, cast weights to bf16."""
    (mean, var, gamma, beta, w1, b1, w2, b2, w3, b3) = params
    num_labels = w3.shape[1]
    l_pad = pl.cdiv(num_labels, LANE) * LANE   # keep at 128 for small heads

    s = gamma * lax.rsqrt(var + BN_EPS)        # (1, D)
    w1f = w1 * s.reshape(D, 1)                 # scale input rows of W1
    b1f = (beta - mean * s) @ w1 + b1          # (1, D)

    w3p = jnp.zeros((D, l_pad), jnp.float32).at[:, :num_labels].set(w3)
    b3p = jnp.zeros((1, l_pad), jnp.float32).at[:, :num_labels].set(b3)

    arrays = (
        w1f.astype(jnp.bfloat16), b1f,
        w2.astype(jnp.bfloat16), b2,
        w3p.astype(jnp.bfloat16), b3p,
    )
    return arrays, num_labels, l_pad


# ---------------------------------------------------------------------------
# Tiling / VMEM budget (re-derived per TPU generation, per review).
# ---------------------------------------------------------------------------
@functools.lru_cache(maxsize=1)
def _hw_budget():
    """Return (max batch tile, vmem_limit_bytes) for the current TPU."""
    try:
        vmem_cap = int(pltpu.get_tpu_info().vmem_capacity_bytes)
    except Exception:
        vmem_cap = 64 * 1024 * 1024            # conservative (v7x-class)
    if vmem_cap >= 128 * 1024 * 1024:
        # v5e / v6e (128 MiB physical VMEM). TB=1024 needs ~21 MiB live:
        # x 2x3 MiB + out 2x0.5 MiB + single-buffered bf16 weights ~2.6 MiB
        # + ~11 MiB of in-kernel f32/bf16 intermediates.
        return 1024, 48 * 1024 * 1024
    # v7x (64 MiB physical / 32 MiB default scoped): cap TB at 512 (~13 MiB).
    return 512, 32 * 1024 * 1024


def _select_tb(batch, tb_max):
    """Batch tile: single tile for small B, else >=2 tiles (megacore), <= tb_max."""
    if batch <= 256:
        return batch                 # block dim == full array dim is always legal
    half = pl.cdiv(batch, 2)         # aim for >=2 grid steps (v7x megacore)
    return min(tb_max, pl.cdiv(half, 128) * 128)


# ---------------------------------------------------------------------------
# pallas_call wrapper
# ---------------------------------------------------------------------------
def _run_pallas(x, arrays, l_pad, tb, vmem_limit, single_buffer_weights):
    w1, b1, w2, b2, w3, b3 = arrays
    batch = x.shape[0]
    const = lambda i: (0, 0)         # weights stay resident across batch tiles

    if single_buffer_weights:
        # Fetched once (constant block index) -> one VMEM buffer is enough.
        wspec = lambda shape: pl.BlockSpec(shape, const, pipeline_mode=pl.Buffered(1))
    else:
        wspec = lambda shape: pl.BlockSpec(shape, const)

    return pl.pallas_call(
        _mlp_kernel,
        out_shape=jax.ShapeDtypeStruct((batch, l_pad), jnp.float32),
        grid=(pl.cdiv(batch, tb),),              # ragged last block is masked
        in_specs=[
            pl.BlockSpec((tb, D), lambda i: (i, 0)),   # x tile (pipelined)
            wspec((D, D)),                             # w1 (BN-folded, bf16)
            wspec((1, D)),                             # b1'
            wspec((D, D)),                             # w2
            wspec((1, D)),                             # b2
            wspec((D, l_pad)),                         # w3 (lane-padded)
            wspec((1, l_pad)),                         # b3
        ],
        out_specs=pl.BlockSpec((tb, l_pad), lambda i: (i, 0)),
        compiler_params=pltpu.CompilerParams(
            dimension_semantics=("parallel",),         # shard batch tiles (v7x)
            vmem_limit_bytes=vmem_limit,
        ),
    )(x, w1, b1, w2, b2, w3, b3)


_SINGLE_BUFFER_WEIGHTS = True   # flipped off if this jax build rejects Buffered(1)


def three_layer_classifier_do_forward(x, packed):
    """x: [B, 768] (f32 or bf16) -> [B, num_labels] f32 (eval-mode forward).

    `packed` is fold_and_pack_params(params) — compute once and reuse.
    """
    global _SINGLE_BUFFER_WEIGHTS
    arrays, num_labels, l_pad = packed

    tb_max, vmem_limit = _hw_budget()
    tb = _select_tb(x.shape[0], tb_max)

    if _SINGLE_BUFFER_WEIGHTS:
        try:
            out = _run_pallas(x, arrays, l_pad, tb, vmem_limit, True)
        except Exception:
            # Fallback for jax builds without BlockSpec pipeline_mode support.
            _SINGLE_BUFFER_WEIGHTS = False
            out = _run_pallas(x, arrays, l_pad, tb, vmem_limit, False)
    else:
        out = _run_pallas(x, arrays, l_pad, tb, vmem_limit, False)

    return out if num_labels == l_pad else out[:, :num_labels]


# ---------------------------------------------------------------------------
# Deterministic params + references (test only)
# ---------------------------------------------------------------------------
def make_params(key, num_labels):
    """Deterministic parameter init mirroring the module's shapes.

    Linear weights follow PyTorch's U(-1/sqrt(fan_in), 1/sqrt(fan_in)) init,
    stored transposed as (in_features, out_features). BatchNorm running stats
    get slightly non-trivial values to exercise the fold.
    """
    ks = jax.random.split(key, 8)
    bound = 1.0 / jnp.sqrt(jnp.float32(D))

    w1 = jax.random.uniform(ks[0], (D, D), jnp.float32, -bound, bound)
    b1 = jax.random.uniform(ks[1], (1, D), jnp.float32, -bound, bound)
    w2 = jax.random.uniform(ks[2], (D, D), jnp.float32, -bound, bound)
    b2 = jax.random.uniform(ks[3], (1, D), jnp.float32, -bound, bound)
    w3 = jax.random.uniform(ks[4], (D, num_labels), jnp.float32, -bound, bound)
    b3 = jax.random.uniform(ks[5], (1, num_labels), jnp.float32, -bound, bound)

    mean = 0.1 * jax.random.normal(ks[6], (1, D), jnp.float32)
    var = 1.0 + 0.05 * jax.random.uniform(ks[7], (1, D), jnp.float32)
    gamma = jnp.ones((1, D), jnp.float32)
    beta = jnp.zeros((1, D), jnp.float32)

    return (mean, var, gamma, beta, w1, b1, w2, b2, w3, b3)


def reference_forward_f32(x, params):
    """Full-precision eval-mode reference (matches the PyTorch module)."""
    (mean, var, gamma, beta, w1, b1, w2, b2, w3, b3) = params
    xn = (x - mean) * lax.rsqrt(var + BN_EPS) * gamma + beta
    h1 = jnp.maximum(xn @ w1 + b1, 0.0)
    h2 = jnp.maximum(h1 @ w2 + b2, 0.0)
    return h2 @ w3 + b3


def reference_forward_bf16(x, params):
    """Reference that mirrors the kernel's bf16/BN-fold numerics exactly."""
    (w1, b1, w2, b2, w3, b3), num_labels, _ = fold_and_pack_params(params)
    xb = x.astype(jnp.bfloat16)
    h1 = jnp.maximum(
        jnp.dot(xb, w1, preferred_element_type=jnp.float32) + b1, 0.0
    ).astype(jnp.bfloat16)
    h2 = jnp.maximum(
        jnp.dot(h1, w2, preferred_element_type=jnp.float32) + b2, 0.0
    ).astype(jnp.bfloat16)
    out = jnp.dot(h2, w3, preferred_element_type=jnp.float32) + b3
    return out[:, :num_labels]


if __name__ == "__main__":
    NUM_LABELS = 16

    key = jax.random.PRNGKey(0)
    k_x1, k_x2, k_p = jax.random.split(key, 3)
    params = make_params(k_p, NUM_LABELS)

    # Fold/pack once (hoisted out of the per-call path) and reuse.
    packed = fold_and_pack_params(params)

    # --- small batch: single tile -------------------------------------------
    B1 = 8
    x1 = jax.random.normal(k_x1, (B1, D), jnp.float32)
    out1 = jax.block_until_ready(three_layer_classifier_do_forward(x1, packed))
    assert out1.shape == (B1, NUM_LABELS)
    ref1 = reference_forward_bf16(x1, params)
    assert jnp.allclose(out1, ref1, atol=2e-2, rtol=2e-2), \
        "small-batch mismatch vs bf16-emulated reference"

    # --- moderate batch: multi-tile grid with a ragged last block ------------
    # (no wrapper-side re-padding of x; Pallas masks the partial block)
    B2 = 300
    x2 = jax.random.normal(k_x2, (B2, D), jnp.float32)
    out2 = jax.block_until_ready(three_layer_classifier_do_forward(x2, packed))
    assert out2.shape == (B2, NUM_LABELS)
    ref2 = reference_forward_bf16(x2, params)
    assert jnp.allclose(out2, ref2, atol=2e-2, rtol=2e-2), \
        "multi-tile/ragged-batch mismatch vs bf16-emulated reference"

    # --- bf16 activations accepted directly (halved x DMA) -------------------
    out1_bf16 = jax.block_until_ready(
        three_layer_classifier_do_forward(x1.astype(jnp.bfloat16), packed))
    assert jnp.allclose(out1_bf16, ref1, atol=2e-2, rtol=2e-2), \
        "bf16-activation path mismatch"

    # Informational: drift vs the full-precision reference (bf16 weight cast).
    ref_f32 = reference_forward_f32(x1, params)
    max_abs = float(jnp.max(jnp.abs(out1 - ref_f32)))
    print(f"max |kernel - f32 reference| = {max_abs:.4e}")

    print("KERNEL_OK")
</pallas_src>

<mosaic_0001>
module attributes {stable_mosaic.version = 11 : i64} {
  func.func @_mlp_kernel(%arg0: i32, %arg1: memref<8x768xf32, #tpu.memory_space<vmem>>, %arg2: memref<768x768xbf16, #tpu.memory_space<vmem>>, %arg3: memref<1x768xf32, #tpu.memory_space<vmem>>, %arg4: memref<768x768xbf16, #tpu.memory_space<vmem>>, %arg5: memref<1x768xf32, #tpu.memory_space<vmem>>, %arg6: memref<768x128xbf16, #tpu.memory_space<vmem>>, %arg7: memref<1x128xf32, #tpu.memory_space<vmem>>, %arg8: memref<8x128xf32, #tpu.memory_space<vmem>>) attributes {dimension_semantics = [#tpu.dimension_semantics<parallel>], iteration_bounds = array<i64: 1>, scalar_prefetch = 0 : i64, scratch_operands = 0 : i64, tpu.core_type = #tpu.core_type<tc>, window_params = [{transform_indices = @transform_0, window_bounds = array<i64: 8, 768>}, {pipeline_mode = #tpu.pipeline_mode<synchronous>, transform_indices = @transform_1, window_bounds = array<i64: 768, 768>}, {pipeline_mode = #tpu.pipeline_mode<synchronous>, transform_indices = @transform_2, window_bounds = array<i64: 1, 768>}, {pipeline_mode = #tpu.pipeline_mode<synchronous>, transform_indices = @transform_3, window_bounds = array<i64: 768, 768>}, {pipeline_mode = #tpu.pipeline_mode<synchronous>, transform_indices = @transform_4, window_bounds = array<i64: 1, 768>}, {pipeline_mode = #tpu.pipeline_mode<synchronous>, transform_indices = @transform_5, window_bounds = array<i64: 768, 128>}, {pipeline_mode = #tpu.pipeline_mode<synchronous>, transform_indices = @transform_6, window_bounds = array<i64: 1, 128>}, {transform_indices = @transform_7, window_bounds = array<i64: 8, 128>}]} {
    %c0 = arith.constant 0 : index
    %c0_0 = arith.constant 0 : index
    %0 = vector.load %arg1[%c0, %c0_0] : memref<8x768xf32, #tpu.memory_space<vmem>>, vector<8x768xf32>
    %1 = arith.truncf %0 : vector<8x768xf32> to vector<8x768xbf16>
    %c0_1 = arith.constant 0 : index
    %c0_2 = arith.constant 0 : index
    %2 = vector.load %arg2[%c0_1, %c0_2] : memref<768x768xbf16, #tpu.memory_space<vmem>>, vector<768x768xbf16>
    %cst = arith.constant dense<0.000000e+00> : vector<8x768xf32>
    %3 = tpu.matmul %1, %2, %cst {dimension_numbers = #tpu.dot_dimension_numbers<[1], [0], [0], [1], [0, 0, 1, 1], [], []>} : vector<8x768xbf16>, vector<768x768xbf16>, vector<8x768xf32> -> vector<8x768xf32>
    %c0_3 = arith.constant 0 : index
    %c0_4 = arith.constant 0 : index
    %4 = vector.load %arg3[%c0_3, %c0_4] : memref<1x768xf32, #tpu.memory_space<vmem>>, vector<1x768xf32>
    %5 = vector.broadcast %4 : vector<1x768xf32> to vector<8x768xf32>
    %6 = arith.addf %3, %5 : vector<8x768xf32>
    %cst_5 = arith.constant 0.000000e+00 : f32
    %7 = vector.broadcast %cst_5 : f32 to vector<8x768xf32>
    %8 = arith.maximumf %6, %7 : vector<8x768xf32>
    %9 = arith.truncf %8 : vector<8x768xf32> to vector<8x768xbf16>
    %c0_6 = arith.constant 0 : index
    %c0_7 = arith.constant 0 : index
    %10 = vector.load %arg4[%c0_6, %c0_7] : memref<768x768xbf16, #tpu.memory_space<vmem>>, vector<768x768xbf16>
    %cst_8 = arith.constant dense<0.000000e+00> : vector<8x768xf32>
    %11 = tpu.matmul %9, %10, %cst_8 {dimension_numbers = #tpu.dot_dimension_numbers<[1], [0], [0], [1], [0, 0, 1, 1], [], []>} : vector<8x768xbf16>, vector<768x768xbf16>, vector<8x768xf32> -> vector<8x768xf32>
    %c0_9 = arith.constant 0 : index
    %c0_10 = arith.constant 0 : index
    %12 = vector.load %arg5[%c0_9, %c0_10] : memref<1x768xf32, #tpu.memory_space<vmem>>, vector<1x768xf32>
    %13 = vector.broadcast %12 : vector<1x768xf32> to vector<8x768xf32>
    %14 = arith.addf %11, %13 : vector<8x768xf32>
    %cst_11 = arith.constant 0.000000e+00 : f32
    %15 = vector.broadcast %cst_11 : f32 to vector<8x768xf32>
    %16 = arith.maximumf %14, %15 : vector<8x768xf32>
    %17 = arith.truncf %16 : vector<8x768xf32> to vector<8x768xbf16>
    %c0_12 = arith.constant 0 : index
    %c0_13 = arith.constant 0 : index
    %18 = vector.load %arg6[%c0_12, %c0_13] : memref<768x128xbf16, #tpu.memory_space<vmem>>, vector<768x128xbf16>
    %cst_14 = arith.constant dense<0.000000e+00> : vector<8x128xf32>
    %19 = tpu.matmul %17, %18, %cst_14 {dimension_numbers = #tpu.dot_dimension_numbers<[1], [0], [0], [1], [0, 0, 1, 1], [], []>} : vector<8x768xbf16>, vector<768x128xbf16>, vector<8x128xf32> -> vector<8x128xf32>
    %c0_15 = arith.constant 0 : index
    %c0_16 = arith.constant 0 : index
    %20 = vector.load %arg7[%c0_15, %c0_16] : memref<1x128xf32, #tpu.memory_space<vmem>>, vector<1x128xf32>
    %21 = vector.broadcast %20 : vector<1x128xf32> to vector<8x128xf32>
    %22 = arith.addf %19, %21 : vector<8x128xf32>
    %c0_17 = arith.constant 0 : index
    %c0_18 = arith.constant 0 : index
    %23 = vector.load %arg8[%c0_17, %c0_18] : memref<8x128xf32, #tpu.memory_space<vmem>>, vector<8x128xf32>
    tpu.vector_store %arg8[%c0_17, %c0_18], %22 {strides = array<i32>} : memref<8x128xf32, #tpu.memory_space<vmem>>, vector<8x128xf32>,
    return
  }
  func.func @transform_0(%arg0: i32) -> (i32, i32) {
    %c0_i32 = arith.constant 0 : i32
    %c0_i32_0 = arith.constant 0 : i32
    return %arg0, %c0_i32 : i32, i32
  }
  func.func @transform_1(%arg0: i32) -> (i32, i32) {
    %c0_i32 = arith.constant 0 : i32
    %c0_i32_0 = arith.constant 0 : i32
    %c0_i32_1 = arith.constant 0 : i32
    return %c0_i32, %c0_i32_0 : i32, i32
  }
  func.func @transform_2(%arg0: i32) -> (i32, i32) {
    %c0_i32 = arith.constant 0 : i32
    %c0_i32_0 = arith.constant 0 : i32
    %c0_i32_1 = arith.constant 0 : i32
    return %c0_i32, %c0_i32_0 : i32, i32
  }
  func.func @transform_3(%arg0: i32) -> (i32, i32) {
    %c0_i32 = arith.constant 0 : i32
    %c0_i32_0 = arith.constant 0 : i32
    %c0_i32_1 = arith.constant 0 : i32
    return %c0_i32, %c0_i32_0 : i32, i32
  }
  func.func @transform_4(%arg0: i32) -> (i32, i32) {
    %c0_i32 = arith.constant 0 : i32
    %c0_i32_0 = arith.constant 0 : i32
    %c0_i32_1 = arith.constant 0 : i32
    return %c0_i32, %c0_i32_0 : i32, i32
  }
  func.func @transform_5(%arg0: i32) -> (i32, i32) {
    %c0_i32 = arith.constant 0 : i32
    %c0_i32_0 = arith.constant 0 : i32
    %c0_i32_1 = arith.constant 0 : i32
    return %c0_i32, %c0_i32_0 : i32, i32
  }
  func.func @transform_6(%arg0: i32) -> (i32, i32) {
    %c0_i32 = arith.constant 0 : i32
    %c0_i32_0 = arith.constant 0 : i32
    %c0_i32_1 = arith.constant 0 : i32
    return %c0_i32, %c0_i32_0 : i32, i32
  }
  func.func @transform_7(%arg0: i32) -> (i32, i32) {
    %c0_i32 = arith.constant 0 : i32
    %c0_i32_0 = arith.constant 0 : i32
    return %arg0, %c0_i32 : i32, i32
  }
}

module attributes {stable_mosaic.version = 11 : i64} {
  func.func @_mlp_kernel(%arg0: i32, %arg1: memref<8x768xf32, #tpu.memory_space<vmem>>, %arg2: memref<768x768xbf16, #tpu.memory_space<vmem>>, %arg3: memref<1x768xf32, #tpu.memory_space<vmem>>, %arg4: memref<768x768xbf16, #tpu.memory_space<vmem>>, %arg5: memref<1x768xf32, #tpu.memory_space<vmem>>, %arg6: memref<768x128xbf16, #tpu.memory_space<vmem>>, %arg7: memref<1x128xf32, #tpu.memory_space<vmem>>, %arg8: memref<8x128xf32, #tpu.memory_space<vmem>>) attributes {dimension_semantics = [#tpu.dimension_semantics<parallel>], iteration_bounds = array<i64: 1>, scalar_prefetch = 0 : i64, scratch_operands = 0 : i64, tpu.core_type = #tpu.core_type<tc>, window_params = [{transform_indices = @transform_0, window_bounds = array<i64: 8, 768>}, {pipeline_mode = #tpu.pipeline_mode<synchronous>, transform_indices = @transform_1, window_bounds = array<i64: 768, 768>}, {pipeline_mode = #tpu.pipeline_mode<synchronous>, transform_indices = @transform_2, window_bounds = array<i64: 1, 768>}, {pipeline_mode = #tpu.pipeline_mode<synchronous>, transform_indices = @transform_3, window_bounds = array<i64: 768, 768>}, {pipeline_mode = #tpu.pipeline_mode<synchronous>, transform_indices = @transform_4, window_bounds = array<i64: 1, 768>}, {pipeline_mode = #tpu.pipeline_mode<synchronous>, transform_indices = @transform_5, window_bounds = array<i64: 768, 128>}, {pipeline_mode = #tpu.pipeline_mode<synchronous>, transform_indices = @transform_6, window_bounds = array<i64: 1, 128>}, {transform_indices = @transform_7, window_bounds = array<i64: 8, 128>}]} {
    %c0 = arith.constant 0 : index
    %c0_0 = arith.constant 0 : index
    %0 = vector.load %arg1[%c0, %c0_0] : memref<8x768xf32, #tpu.memory_space<vmem>>, vector<8x768xf32>
    %1 = arith.truncf %0 : vector<8x768xf32> to vector<8x768xbf16>
    %c0_1 = arith.constant 0 : index
    %c0_2 = arith.constant 0 : index
    %2 = vector.load %arg2[%c0_1, %c0_2] : memref<768x768xbf16, #tpu.memory_space<vmem>>, vector<768x768xbf16>
    %cst = arith.constant dense<0.000000e+00> : vector<8x768xf32>
    %3 = tpu.matmul %1, %2, %cst {dimension_numbers = #tpu.dot_dimension_numbers<[1], [0], [0], [1], [0, 0, 1, 1], [], []>} : vector<8x768xbf16>, vector<768x768xbf16>, vector<8x768xf32> -> vector<8x768xf32>
    %c0_3 = arith.constant 0 : index
    %c0_4 = arith.constant 0 : index
    %4 = vector.load %arg3[%c0_3, %c0_4] : memref<1x768xf32, #tpu.memory_space<vmem>>, vector<1x768xf32>
    %5 = vector.broadcast %4 : vector<1x768xf32> to vector<8x768xf32>
    %6 = arith.addf %3, %5 : vector<8x768xf32>
    %cst_5 = arith.constant 0.000000e+00 : f32
    %7 = vector.broadcast %cst_5 : f32 to vector<8x768xf32>
    %8 = arith.maximumf %6, %7 : vector<8x768xf32>
    %9 = arith.truncf %8 : vector<8x768xf32> to vector<8x768xbf16>
    %c0_6 = arith.constant 0 : index
    %c0_7 = arith.constant 0 : index
    %10 = vector.load %arg4[%c0_6, %c0_7] : memref<768x768xbf16, #tpu.memory_space<vmem>>, vector<768x768xbf16>
    %cst_8 = arith.constant dense<0.000000e+00> : vector<8x768xf32>
    %11 = tpu.matmul %9, %10, %cst_8 {dimension_numbers = #tpu.dot_dimension_numbers<[1], [0], [0], [1], [0, 0, 1, 1], [], []>} : vector<8x768xbf16>, vector<768x768xbf16>, vector<8x768xf32> -> vector<8x768xf32>
    %c0_9 = arith.constant 0 : index
    %c0_10 = arith.constant 0 : index
    %12 = vector.load %arg5[%c0_9, %c0_10] : memref<1x768xf32, #tpu.memory_space<vmem>>, vector<1x768xf32>
    %13 = vector.broadcast %12 : vector<1x768xf32> to vector<8x768xf32>
    %14 = arith.addf %11, %13 : vector<8x768xf32>
    %cst_11 = arith.constant 0.000000e+00 : f32
    %15 = vector.broadcast %cst_11 : f32 to vector<8x768xf32>
    %16 = arith.maximumf %14, %15 : vector<8x768xf32>
    %17 = arith.truncf %16 : vector<8x768xf32> to vector<8x768xbf16>
    %c0_12 = arith.constant 0 : index
    %c0_13 = arith.constant 0 : index
    %18 = vector.load %arg6[%c0_12, %c0_13] : memref<768x128xbf16, #tpu.memory_space<vmem>>, vector<768x128xbf16>
    %cst_14 = arith.constant dense<0.000000e+00> : vector<8x128xf32>
    %19 = tpu.matmul %17, %18, %cst_14 {dimension_numbers = #tpu.dot_dimension_numbers<[1], [0], [0], [1], [0, 0, 1, 1], [], []>} : vector<8x768xbf16>, vector<768x128xbf16>, vector<8x128xf32> -> vector<8x128xf32>
    %c0_15 = arith.constant 0 : index
    %c0_16 = arith.constant 0 : index
    %20 = vector.load %arg7[%c0_15, %c0_16] : memref<1x128xf32, #tpu.memory_space<vmem>>, vector<1x128xf32>
    %21 = vector.broadcast %20 : vector<1x128xf32> to vector<8x128xf32>
    %22 = arith.addf %19, %21 : vector<8x128xf32>
    %c0_17 = arith.constant 0 : index
    %c0_18 = arith.constant 0 : index
    %23 = vector.load %arg8[%c0_17, %c0_18] : memref<8x128xf32, #tpu.memory_space<vmem>>, vector<8x128xf32>
    tpu.vector_store %arg8[%c0_17, %c0_18], %22 {strides = array<i32>} : memref<8x128xf32, #tpu.memory_space<vmem>>, vector<8x128xf32>,
    return
  }
  func.func @transform_0(%arg0: i32) -> (i32, i32) {
    %c0_i32 = arith.constant 0 : i32
    %c0_i32_0 = arith.constant 0 : i32
    return %arg0, %c0_i32 : i32, i32
  }
  func.func @transform_1(%arg0: i32) -> (i32, i32) {
    %c0_i32 = arith.constant 0 : i32
    %c0_i32_0 = arith.constant 0 : i32
    %c0_i32_1 = arith.constant 0 : i32
    return %c0_i32, %c0_i32_0 : i32, i32
  }
  func.func @transform_2(%arg0: i32) -> (i32, i32) {
    %c0_i32 = arith.constant 0 : i32
    %c0_i32_0 = arith.constant 0 : i32
    %c0_i32_1 = arith.constant 0 : i32
    return %c0_i32, %c0_i32_0 : i32, i32
  }
  func.func @transform_3(%arg0: i32) -> (i32, i32) {
    %c0_i32 = arith.constant 0 : i32
    %c0_i32_0 = arith.constant 0 : i32
    %c0_i32_1 = arith.constant 0 : i32
    return %c0_i32, %c0_i32_0 : i32, i32
  }
  func.func @transform_4(%arg0: i32) -> (i32, i32) {
    %c0_i32 = arith.constant 0 : i32
    %c0_i32_0 = arith.constant 0 : i32
    %c0_i32_1 = arith.constant 0 : i32
    return %c0_i32, %c0_i32_0 : i32, i32
  }
  func.func @transform_5(%arg0: i32) -> (i32, i32) {
    %c0_i32 = arith.constant 0 : i32
    %c0_i32_0 = arith.constant 0 : i32
    %c0_i32_1 = arith.constant 0 : i32
    return %c0_i32, %c0_i32_0 : i32, i32
  }
  func.func @transform_6(%arg0: i32) -> (i32, i32) {
    %c0_i32 = arith.constant 0 : i32
    %c0_i32_0 = arith.constant 0 : i32
    %c0_i32_1 = arith.constant 0 : i32
    return %c0_i32, %c0_i32_0 : i32, i32
  }
  func.func @transform_7(%arg0: i32) -> (i32, i32) {
    %c0_i32 = arith.constant 0 : i32
    %c0_i32_0 = arith.constant 0 : i32
    return %arg0, %c0_i32 : i32, i32
  }
}

</mosaic_0001>

<bundles_post_ra>
// kernel: tpu_custom_call.1
= control target key start
LH: loop header
LB: loop body
LE: loop exit
PB: predicated region body
PF: predicated region fallthrough
CT: control target
= control target key end

     0   :  { %12 = vsyncpa [#allocation3], 0  ;;  %s6962_s0 = inlined_call_operand.hbm [shape: f32[8,768], index: 0, kind: input, shape index: {}]   ;;  %s6963_s1 = inlined_call_operand.hbm [shape: bf16[768,768], index: 1, kind: input, shape index: {}]   ;;  %s6964_s2 = inlined_call_operand.hbm [shape: f32[1,768], index: 2, kind: input, shape index: {}]   ;;  %s6965_s3 = inlined_call_operand.hbm [shape: bf16[768,768], index: 3, kind: input, shape index: {}]   ;;  %s6966_s4 = inlined_call_operand.hbm [shape: f32[1,768], index: 4, kind: input, shape index: {}]   ;;  %s6967_s5 = inlined_call_operand.hbm [shape: bf16[768,128], index: 5, kind: input, shape index: {}]   ;;  %s6968_s6 = inlined_call_operand.hbm [shape: f32[1,128], index: 6, kind: input, shape index: {}]   ;;  %s6969_s7 = inlined_call_operand.hbm [shape: f32[8,128], index: 7, kind: output, shape index: {}]  }
   0x1   :  { %13 = vsyncpa [#allocation6], 0 }
   0x2   :  { %14 = vsyncpa [#allocation9], 0 }
   0x3   :  { %15 = vsyncpa [#allocation12], 0 }
   0x4   :  { %16 = vsyncpa [#allocation4], 0  ;;  %s6724_s24 = smov [#allocation5]  }
   0x5   :  { %s32_s25 = sshll.u32 %s6724_s24, 4  ;;  %s33_s25 = int_to_ptr.vmem [resolvable:$true] %s32_s25 }
   0x6   :  { %s6562_s26 = scalar_lea.vmem %s33_s25, 36864  ;;  %p6567_p1 = scmp.lt.s32.totalorder %s33_s25, %s33_s25 }
   0x7   :  { %p6563_p0 = scmp.ne.s32.totalorder %s33_s25, %s6562_s26  ;;  %p6568_p2 = scmp.lt.s32.totalorder %s6562_s26, %s6562_s26 }
   0x9   :  { %p6569_p3 = por %p6568_p2, %p6567_p1 }
   0xb   :  { %p6570_p4 = pnand %p6569_p3, %p6563_p0 }
   0xd   :  { %6573 = shalt.err (!%p6570_p4)
}
   0xe   :  { %s6725_s27 = smov 384   ;;  %s6726_s28 = smov 24  }
   0xf   :  { %38 = dma.hbm_to_vmem [thread:$0]  %s6963_s1, 36864, %s33_s25, [#allocation6], %s6725_s27, %s6725_s27, %s6726_s28  }
  0x10   :  { %s6727_s8 = smov [#allocation8]   ;;  %s6728_s10 = smov [#allocation11]  }
  0x11   :  { %s54_s9 = sshll.u32 %s6727_s8, 4  ;;  %s76_s11 = sshll.u32 %s6728_s10, 4  ;;  %s55_s9 = int_to_ptr.vmem [resolvable:$true] %s54_s9  ;;  %s77_s11 = int_to_ptr.vmem [resolvable:$true] %s76_s11 }
  0x12   :  { %s6582_s12 = scalar_lea.vmem %s55_s9, 36864  ;;  %p6587_p6 = scmp.lt.s32.totalorder %s55_s9, %s55_s9 }
  0x13   :  { %p6583_p5 = scmp.ne.s32.totalorder %s55_s9, %s6582_s12  ;;  %p6588_p7 = scmp.lt.s32.totalorder %s6582_s12, %s6582_s12 }
  0x15   :  { %p6589_p8 = por %p6588_p7, %p6587_p6 }
  0x17   :  { %p6590_p9 = pnand %p6589_p8, %p6583_p5 }
  0x19   :  { %6593 = shalt.err (!%p6590_p9)
}
  0x1a   :  { %60 = dma.hbm_to_vmem [thread:$0]  %s6965_s3, 36864, %s55_s9, [#allocation9], %s6725_s27, %s6725_s27, %s6726_s28  }
  0x1b   :  { %s6602_s15 = scalar_lea.vmem %s77_s11, 6144  ;;  %p6607_p11 = scmp.lt.s32.totalorder %s77_s11, %s77_s11 }
  0x1c   :  { %p6603_p10 = scmp.ne.s32.totalorder %s77_s11, %s6602_s15  ;;  %p6608_p12 = scmp.lt.s32.totalorder %s6602_s15, %s6602_s15 }
  0x1e   :  { %p6609_p13 = por %p6608_p12, %p6607_p11 }
  0x20   :  { %p6610_p0 = pnand %p6609_p13, %p6603_p10 }
  0x22   :  { %6613 = shalt.err (!%p6610_p0)
}
  0x23   :  { %s6729_s1 = smov 64   ;;  %s6730_s16 = smov 4  }
  0x24   :  { %82 = dma.hbm_to_vmem [thread:$0]  %s6967_s5, 6144, %s77_s11, [#allocation12], %s6729_s1, %s6729_s1, %s6730_s16  }
  0x25   :  { %s6731_s19 = smov [#allocation2]   ;;  %s6732_s21 = smov [#allocation7]  }
  0x26   :  { %s23_s20 = sshll.u32 %s6731_s19, 4  ;;  %s45_s22 = sshll.u32 %s6732_s21, 4  ;;  %s24_s20 = int_to_ptr.vmem [resolvable:$true] %s23_s20  ;;  %s46_s22 = int_to_ptr.vmem [resolvable:$true] %s45_s22 }
  0x27   :  { %s6622_s3 = scalar_lea.vmem %s24_s20, 768  ;;  %p6627_p2 = scmp.lt.s32.totalorder %s24_s20, %s24_s20 }
  0x28   :  { %p6623_p1 = scmp.ne.s32.totalorder %s24_s20, %s6622_s3  ;;  %p6628_p3 = scmp.lt.s32.totalorder %s6622_s3, %s6622_s3 }
  0x2a   :  { %p6629_p4 = por %p6628_p3, %p6627_p2 }
  0x2c   :  { %p6630_p5 = pnand %p6629_p4, %p6623_p1 }
  0x2e   :  { %6633 = shalt.err (!%p6630_p5)
}
  0x2f   :  { %26 = dma.hbm_to_vmem [thread:$0]  %s6962_s0, 768, %s24_s20, [#allocation3]  }
  0x30   :  { %s6642_s25 = scalar_lea.vmem %s46_s22, 96  ;;  %p6647_p7 = scmp.lt.s32.totalorder %s46_s22, %s46_s22 }
  0x31   :  { %p6643_p6 = scmp.ne.s32.totalorder %s46_s22, %s6642_s25  ;;  %p6648_p8 = scmp.lt.s32.totalorder %s6642_s25, %s6642_s25 }
  0x33   :  { %p6649_p9 = por %p6648_p8, %p6647_p7 }
  0x35   :  { %p6650_p10 = pnand %p6649_p9, %p6643_p6 }
  0x37   :  { %6653 = shalt.err (!%p6650_p10)
}
  0x38   :  { %48 = dma.hbm_to_vmem [thread:$0]  %s6964_s2, 96, %s46_s22, [#allocation6]  }
  0x39   :  { %s6733_s27 = smov [#allocation10]   ;;  %s6734_s29 = smov [#allocation13]  }
  0x3a   :  { %s67_s28 = sshll.u32 %s6733_s27, 4  ;;  %s89_s30 = sshll.u32 %s6734_s29, 4  ;;  %s68_s28 = int_to_ptr.vmem [resolvable:$true] %s67_s28  ;;  %s90_s30 = int_to_ptr.vmem [resolvable:$true] %s89_s30 }
  0x3b   :  { %s6662_s8 = scalar_lea.vmem %s68_s28, 96  ;;  %p6667_p12 = scmp.lt.s32.totalorder %s68_s28, %s68_s28 }
  0x3c   :  { %p6663_p11 = scmp.ne.s32.totalorder %s68_s28, %s6662_s8  ;;  %p6668_p13 = scmp.lt.s32.totalorder %s6662_s8, %s6662_s8 }
  0x3e   :  { %p6669_p0 = por %p6668_p13, %p6667_p12 }
  0x40   :  { %p6670_p1 = pnand %p6669_p0, %p6663_p11 }
  0x42   :  { %6673 = shalt.err (!%p6670_p1)
}
  0x43   :  { %70 = dma.hbm_to_vmem [thread:$0]  %s6966_s4, 96, %s68_s28, [#allocation9]  }
  0x44   :  { %s6682_s10 = scalar_lea.vmem %s90_s30, 16  ;;  %s6686_s2 = scalar_lea.vmem %s90_s30, 32 }
  0x45   :  { %p6683_p2 = scmp.ne.s32.totalorder %s90_s30, %s6682_s10  ;;  %p6687_p3 = scmp.lt.s32.totalorder %s90_s30, %s90_s30 }
  0x46   :  { %p6688_p4 = scmp.lt.s32.totalorder %s6686_s2, %s6682_s10 }
  0x48   :  { %p6689_p5 = por %p6688_p4, %p6687_p3 }
  0x4a   :  { %p6690_p6 = pnand %p6689_p5, %p6683_p2 }
  0x4c   :  { %6693 = shalt.err (!%p6690_p6)
}
  0x4d   :  { %92 = dma.hbm_to_vmem [thread:$0]  %s6968_s6, 16, %s90_s30, [#allocation12]  }
  0x4e   :  { %6714 = dma.done.wait [#allocation3], 768  }
  0x4f   :  { %6715 = vsyncadd [#allocation3], 4294966528 }
  0x50   :  { %6716 = dma.done.wait [#allocation6], 36960  }
  0x51   :  { %6717 = vsyncadd [#allocation6], 4294930336 }
  0x52   :  { %6718 = dma.done.wait [#allocation9], 36960  }
  0x53   :  { %6719 = vsyncadd [#allocation9], 4294930336 }
  0x54   :  { %6720 = dma.done.wait [#allocation12], 6160  }
  0x55   :  { %6721 = vsyncadd [#allocation12], 4294961136  ;;  %v5642_v0 = vld [vmem:[#allocation5 + $0x154] ss:$24 sps:$4 sm:$0xff]   ;;  %v5644_v1 = vld [vmem:[#allocation5 + $0x150] ss:$24 sps:$4 sm:$0xff]  }
  0x56   :  { %1887 = vmatprep.subr.bf16.mxu0 %v5642_v0  ;;  %v5645_v2 = vld [vmem:[#allocation5 + $0x454] ss:$24 sps:$4 sm:$0xff]   ;;  %v5647_v3 = vld [vmem:[#allocation5 + $0x450] ss:$24 sps:$4 sm:$0xff]   ;;  %v5648_v4 = vld [vmem:[#allocation5 + $0x124] ss:$24 sps:$4 sm:$0xff]  }
  0x57   :  { %1888 = vmatpush1.bf16.msra.mxu0 %v5644_v1  ;;  %v5650_v5 = vld [vmem:[#allocation5 + $0x120] ss:$24 sps:$4 sm:$0xff]   ;;  %1928 = vmatprep.subr.bf16.mxu1 %v5645_v2  ;;  %v5651_v6 = vld [vmem:[#allocation5 + $0x424] ss:$24 sps:$4 sm:$0xff]   ;;  %v5654_v8 = vld [vmem:[#allocation5 + $0xf4] ss:$24 sps:$4 sm:$0xff]  }
  0x58   :  { %1929 = vmatpush1.bf16.msra.mxu1 %v5647_v3  ;;  %1889 = vmatprep.subr.bf16.mxu0 %v5648_v4  ;;  %v5653_v7 = vld [vmem:[#allocation5 + $0x420] ss:$24 sps:$4 sm:$0xff]   ;;  %v5656_v9 = vld [vmem:[#allocation5 + $0xf0] ss:$24 sps:$4 sm:$0xff]   ;;  %v5657_v10 = vld [vmem:[#allocation5 + $0x3f4] ss:$24 sps:$4 sm:$0xff]  }
  0x59   :  { %1930 = vmatprep.subr.bf16.mxu1 %v5651_v6  ;;  %v5660_v11 = vld [vmem:[#allocation5 + $0xc4] ss:$24 sps:$4 sm:$0xff]   ;;  %v5659_v12 = vld [vmem:[#allocation5 + $0x3f0] ss:$24 sps:$4 sm:$0xff]   ;;  %v5662_v14 = vld [vmem:[#allocation5 + $0xc0] ss:$24 sps:$4 sm:$0xff]  }
  0x5a   :  { %v5663_v13 = vld [vmem:[#allocation5 + $0x3c4] ss:$24 sps:$4 sm:$0xff]   ;;  %v5666_v15 = vld [vmem:[#allocation5 + $0x94] ss:$24 sps:$4 sm:$0xff]   ;;  %v5665_v16 = vld [vmem:[#allocation5 + $0x3c0] ss:$24 sps:$4 sm:$0xff]  }
  0x5b   :  { %1890 = vmatpush1.bf16.msra.mxu0 %v5650_v5  ;;  %v5669_v17 = vld [vmem:[#allocation5 + $0x394] ss:$24 sps:$4 sm:$0xff]   ;;  %v5668_v18 = vld [vmem:[#allocation5 + $0x90] ss:$24 sps:$4 sm:$0xff]   ;;  %v5672_v19 = vld [vmem:[#allocation5 + $0x64] ss:$24 sps:$4 sm:$0xff]  }
  0x5c   :  { %1891 = vmatprep.subr.bf16.mxu0 %v5654_v8  ;;  %1931 = vmatpush1.bf16.msra.mxu1 %v5653_v7  ;;  %v5671_v20 = vld [vmem:[#allocation5 + $0x390] ss:$24 sps:$4 sm:$0xff]   ;;  %v5675_v21 = vld [vmem:[#allocation5 + $0x364] ss:$24 sps:$4 sm:$0xff]   ;;  %v5674_v22 = vld [vmem:[#allocation5 + $0x60] ss:$24 sps:$4 sm:$0xff]  }
  0x5d   :  { %1932 = vmatprep.subr.bf16.mxu1 %v5657_v10  ;;  %v5678_v23 = vld [vmem:[#allocation5 + $0x34] ss:$24 sps:$4 sm:$0xff]   ;;  %v5677_v24 = vld [vmem:[#allocation5 + $0x360] ss:$24 sps:$4 sm:$0xff]   ;;  %v5680_v26 = vld [vmem:[#allocation5 + $0x30] ss:$24 sps:$4 sm:$0xff]  }
  0x5e   :  { %v5681_v25 = vld [vmem:[#allocation5 + $0x334] ss:$24 sps:$4 sm:$0xff]   ;;  %v5684_v27 = vld [vmem:[#allocation5 + $0x4] ss:$24 sps:$4 sm:$0xff]   ;;  %v5683_v28 = vld [vmem:[#allocation5 + $0x330] ss:$24 sps:$4 sm:$0xff]  }
  0x5f   :  { %1892 = vmatpush1.bf16.msra.mxu0 %v5656_v9  ;;  %v5687_v29 = vld [vmem:[#allocation5 + $0x304] ss:$24 sps:$4 sm:$0xff]   ;;  %v5686_v30 = vld [vmem:[#allocation5] ss:$24 sps:$4 sm:$0xff]   ;;  %v5690_v31 = vld [vmem:[#allocation5 + $0x2d4] ss:$24 sps:$4 sm:$0xff]  }
  0x60   :  { %1893 = vmatprep.subr.bf16.mxu0 %v5660_v11  ;;  %1933 = vmatpush1.bf16.msra.mxu1 %v5659_v12  ;;  %v5689_v32 = vld [vmem:[#allocation5 + $0x300] ss:$24 sps:$4 sm:$0xff]   ;;  %v5693_v33 = vld [vmem:[#allocation5 + $0x5d4] ss:$24 sps:$4 sm:$0xff]   ;;  %v5692_v34 = vld [vmem:[#allocation5 + $0x2d0] ss:$24 sps:$4 sm:$0xff]  }
  0x61   :  { %1934 = vmatprep.subr.bf16.mxu1 %v5663_v13  ;;  %v5696_v35 = vld [vmem:[#allocation5 + $0x2a4] ss:$24 sps:$4 sm:$0xff]   ;;  %v5695_v36 = vld [vmem:[#allocation5 + $0x5d0] ss:$24 sps:$4 sm:$0xff]   ;;  %v5698_v38 = vld [vmem:[#allocation5 + $0x2a0] ss:$24 sps:$4 sm:$0xff]  }
  0x62   :  { %v5699_v37 = vld [vmem:[#allocation5 + $0x5a4] ss:$24 sps:$4 sm:$0xff]   ;;  %v5702_v39 = vld [vmem:[#allocation5 + $0x274] ss:$24 sps:$4 sm:$0xff]   ;;  %v5701_v40 = vld [vmem:[#allocation5 + $0x5a0] ss:$24 sps:$4 sm:$0xff]  }
  0x63   :  { %1894 = vmatpush1.bf16.msra.mxu0 %v5662_v14  ;;  %v5705_v41 = vld [vmem:[#allocation5 + $0x574] ss:$24 sps:$4 sm:$0xff]   ;;  %v5704_v42 = vld [vmem:[#allocation5 + $0x270] ss:$24 sps:$4 sm:$0xff]   ;;  %v5708_v43 = vld [vmem:[#allocation5 + $0x244] ss:$24 sps:$4 sm:$0xff]  }
  0x64   :  { %1895 = vmatprep.subr.bf16.mxu0 %v5666_v15  ;;  %1935 = vmatpush1.bf16.msra.mxu1 %v5665_v16  ;;  %v5707_v44 = vld [vmem:[#allocation5 + $0x570] ss:$24 sps:$4 sm:$0xff]   ;;  %v5711_v45 = vld [vmem:[#allocation5 + $0x544] ss:$24 sps:$4 sm:$0xff]   ;;  %v5710_v47 = vld [vmem:[#allocation5 + $0x240] ss:$24 sps:$4 sm:$0xff]  }
  0x65   :  { %1936 = vmatprep.subr.bf16.mxu1 %v5669_v17  ;;  %v116_v46 = vld [vmem:[#allocation2 + $0x8] sm:$0xff]  ;;  %v5714_v49 = vld [vmem:[#allocation5 + $0x214] ss:$24 sps:$4 sm:$0xff]   ;;  %v5716_v54 = vld [vmem:[#allocation5 + $0x210] ss:$24 sps:$4 sm:$0xff]   ;;  %s6735_s4 = smov [#allocation14]  }
  0x66   :  { %v6797_v48 = vpack.c.bf16 %v116_v46, %v116_v46  ;;  %v118_v50 = vld [vmem:[#allocation2 + $0x18] sm:$0xff]  ;;  %v5713_v51 = vld [vmem:[#allocation5 + $0x540] ss:$24 sps:$4 sm:$0xff]   ;;  %v5720_v55 = vld [vmem:[#allocation5 + $0x1e4] ss:$24 sps:$4 sm:$0xff]   ;;  %s4927_s6 = sshll.u32 %s6735_s4, 4  ;;  %s4928_s6 = int_to_ptr.vmem [resolvable:$true] %s4927_s6 }
  0x67   :  { %1896 = vmatpush1.bf16.msra.mxu0 %v5668_v18  ;;  %v6800_v52 = vpack.c.bf16 %v118_v50, %v118_v50  ;;  %v5717_v53 = vld [vmem:[#allocation5 + $0x514] ss:$24 sps:$4 sm:$0xff]   ;;  %v5719_v56 = vld [vmem:[#allocation5 + $0x510] ss:$24 sps:$4 sm:$0xff]   ;;  %v5723_v57 = vld [vmem:[#allocation5 + $0x4e4] ss:$24 sps:$4 sm:$0xff]   ;;  %p6699_p8 = scmp.lt.s32.totalorder %s4928_s6, %s4928_s6 }
  0x68   :  { %1897 = vmatprep.subr.bf16.mxu0 %v5672_v19  ;;  %1937 = vmatpush1.bf16.msra.mxu1 %v5671_v20  ;;  %v5722_v58 = vld [vmem:[#allocation5 + $0x1e0] ss:$24 sps:$4 sm:$0xff]   ;;  %v5726_v59 = vld [vmem:[#allocation5 + $0x1b4] ss:$24 sps:$4 sm:$0xff]   ;;  %v5728_v62 = vld [vmem:[#allocation5 + $0x1b0] ss:$24 sps:$4 sm:$0xff]  }
  0x69   :  { %1938 = vmatprep.subr.bf16.mxu1 %v5675_v21  ;;  %1919 = vmatprep.mubr.bf16.mxu0 %v6797_v48  ;;  %v5725_v60 = vld [vmem:[#allocation5 + $0x4e0] ss:$24 sps:$4 sm:$0xff]   ;;  %v5729_v61 = vld [vmem:[#allocation5 + $0x4b4] ss:$24 sps:$4 sm:$0xff]   ;;  %v5732_v63 = vld [vmem:[#allocation5 + $0x184] ss:$24 sps:$4 sm:$0xff]  }
  0x6a   :  { %1960 = vmatprep.mubr.bf16.mxu1 %v6800_v52  ;;  %v5731_v0 = vld [vmem:[#allocation5 + $0x4b0] ss:$24 sps:$4 sm:$0xff]   ;;  %v5734_v1 = vld [vmem:[#allocation5 + $0x180] ss:$24 sps:$4 sm:$0xff]   ;;  %v5735_v2 = vld [vmem:[#allocation5 + $0x484] ss:$24 sps:$4 sm:$0xff]  }
  0x6b   :  { %1898 = vmatpush1.bf16.msra.mxu0 %v5674_v22  ;;  %v5737_v3 = vld [vmem:[#allocation5 + $0x480] ss:$24 sps:$4 sm:$0xff]   ;;  %v115_v4 = vld [vmem:[#allocation2] sm:$0xff]  ;;  %v5746_v11 = vld [vmem:[#allocation5 + $0x724] ss:$24 sps:$4 sm:$0xff]   ;;  %s6694_s13 = scalar_lea.vmem %s4928_s6, 128 }
  0x6c   :  { %1899 = vmatprep.subr.bf16.mxu0 %v5678_v23  ;;  %1939 = vmatpush1.bf16.msra.mxu1 %v5677_v24  ;;  %v5740_v5 = vld [vmem:[#allocation5 + $0x754] ss:$24 sps:$4 sm:$0xff]   ;;  %v117_v6 = vld [vmem:[#allocation2 + $0x10] sm:$0xff]  ;;  %v6803_v7 = vpack.c.bf16 %v115_v4, %v115_v4  ;;  %v5738_v9 = vld [vmem:[#allocation5 + $0x750] ss:$24 sps:$4 sm:$0xff]   ;;  %p6695_p7 = scmp.ne.s32.totalorder %s4928_s6, %s6694_s13  ;;  %p6700_p9 = scmp.lt.s32.totalorder %s6694_s13, %s6694_s13 }
  0x6d   :  { %1940 = vmatprep.subr.bf16.mxu1 %v5681_v25  ;;  %v5743_v8 = vld [vmem:[#allocation5 + $0x15c] ss:$24 sps:$4 sm:$0xff]   ;;  %v6805_v10 = vpack.c.bf16 %v117_v6, %v117_v6  ;;  %v5741_v12 = vld [vmem:[#allocation5 + $0x158] ss:$24 sps:$4 sm:$0xff]   ;;  %v5749_v13 = vld [vmem:[#allocation5 + $0x12c] ss:$24 sps:$4 sm:$0xff]  }
  0x6e   :  { %v5744_v14 = vld [vmem:[#allocation5 + $0x720] ss:$24 sps:$4 sm:$0xff]   ;;  %v5752_v15 = vld [vmem:[#allocation5 + $0x6f4] ss:$24 sps:$4 sm:$0xff]   ;;  %v5750_v18 = vld [vmem:[#allocation5 + $0x6f0] ss:$24 sps:$4 sm:$0xff]   ;;  %p6701_p10 = por %p6700_p9, %p6699_p8 }
  0x6f   :  { %1900 = vmatpush1.bf16.msra.mxu0 %v5680_v26  ;;  %v5747_v16 = vld [vmem:[#allocation5 + $0x128] ss:$24 sps:$4 sm:$0xff]   ;;  %v5755_v17 = vld [vmem:[#allocation5 + $0xfc] ss:$24 sps:$4 sm:$0xff]   ;;  %v5753_v20 = vld [vmem:[#allocation5 + $0xf8] ss:$24 sps:$4 sm:$0xff]  }
  0x70   :  { %1901 = vmatprep.subr.bf16.mxu0 %v5684_v27  ;;  %1941 = vmatpush1.bf16.msra.mxu1 %v5683_v28  ;;  %v5758_v19 = vld [vmem:[#allocation5 + $0x6c4] ss:$24 sps:$4 sm:$0xff]   ;;  %v5756_v22 = vld [vmem:[#allocation5 + $0x6c0] ss:$24 sps:$4 sm:$0xff]   ;;  %v5764_v23 = vld [vmem:[#allocation5 + $0x694] ss:$24 sps:$4 sm:$0xff]   ;;  %p6702_p11 = pnand %p6701_p10, %p6695_p7 }
  0x71   :  { %1942 = vmatprep.subr.bf16.mxu1 %v5687_v29  ;;  %v5761_v21 = vld [vmem:[#allocation5 + $0xcc] ss:$24 sps:$4 sm:$0xff]   ;;  %v5759_v24 = vld [vmem:[#allocation5 + $0xc8] ss:$24 sps:$4 sm:$0xff]   ;;  %v5767_v25 = vld [vmem:[#allocation5 + $0x9c] ss:$24 sps:$4 sm:$0xff]  }
  0x72   :  { %v5762_v26 = vld [vmem:[#allocation5 + $0x690] ss:$24 sps:$4 sm:$0xff]   ;;  %v5770_v27 = vld [vmem:[#allocation5 + $0x664] ss:$24 sps:$4 sm:$0xff]   ;;  %v5800_v50 = vld [vmem:[#allocation5 + $0x874] ss:$24 sps:$4 sm:$0xff]  }
  0x73   :  { %1902 = vmatpush1.bf16.msra.mxu0 %v5686_v30  ;;  %v5765_v28 = vld [vmem:[#allocation5 + $0x98] ss:$24 sps:$4 sm:$0xff]   ;;  %v5773_v29 = vld [vmem:[#allocation5 + $0x6c] ss:$24 sps:$4 sm:$0xff]   ;;  %v5819_v4 = vld [vmem:[#allocation5 + $0x1e8] ss:$24 sps:$4 sm:$0xff]  }
  0x74   :  { %1903 = vmatprep.subr.bf16.mxu0 %v5690_v31  ;;  %1943 = vmatpush1.bf16.msra.mxu1 %v5689_v32  ;;  %v5768_v30 = vld [vmem:[#allocation5 + $0x660] ss:$24 sps:$4 sm:$0xff]   ;;  %v5776_v31 = vld [vmem:[#allocation5 + $0x634] ss:$24 sps:$4 sm:$0xff]   ;;  %v5822_v6 = vld [vmem:[#allocation5 + $0x7b0] ss:$24 sps:$4 sm:$0xff]  }
  0x75   :  { %1944 = vmatprep.subr.bf16.mxu1 %v5693_v33  ;;  %v5771_v32 = vld [vmem:[#allocation5 + $0x68] ss:$24 sps:$4 sm:$0xff]   ;;  %v5779_v33 = vld [vmem:[#allocation5 + $0x3c] ss:$24 sps:$4 sm:$0xff]   ;;  %v5789_v46 = vld [vmem:[#allocation5 + $0x2d8] ss:$24 sps:$4 sm:$0xff]  }
  0x77   :  { %1904 = vmatpush2.bf16.msra.mxu0 %v5692_v34  ;;  %v120_v34 = vld [vmem:[#allocation2 + $0x28] sm:$0xff] }
  0x78   :  { %1905 = vmatprep.subr.bf16.mxu0 %v5696_v35  ;;  %1945 = vmatpush2.bf16.msra.mxu1 %v5695_v36  ;;  %v5774_v35 = vld [vmem:[#allocation5 + $0x630] ss:$24 sps:$4 sm:$0xff]   ;;  %v6810_v36 = vpack.c.bf16 %v120_v34, %v120_v34 }
  0x79   :  { %1946 = vmatprep.subr.bf16.mxu1 %v5699_v37  ;;  %v5782_v37 = vld [vmem:[#allocation5 + $0x604] ss:$24 sps:$4 sm:$0xff]   ;;  %v5858_v34 = vld [vmem:[#allocation5 + $0x398] ss:$24 sps:$4 sm:$0xff]  }
  0x7b   :  { %1906 = vmatpush2.bf16.msra.mxu0 %v5698_v38  ;;  %v5777_v38 = vld [vmem:[#allocation5 + $0x38] ss:$24 sps:$4 sm:$0xff]  }
  0x7c   :  { %1907 = vmatprep.subr.bf16.mxu0 %v5702_v39  ;;  %1947 = vmatpush2.bf16.msra.mxu1 %v5701_v40  ;;  %v5785_v39 = vld [vmem:[#allocation5 + $0xc] ss:$24 sps:$4 sm:$0xff]   ;;  %v5780_v40 = vld [vmem:[#allocation5 + $0x600] ss:$24 sps:$4 sm:$0xff]  }
  0x7d   :  { %1948 = vmatprep.subr.bf16.mxu1 %v5705_v41  ;;  %v5788_v41 = vld [vmem:[#allocation5 + $0x8d4] ss:$24 sps:$4 sm:$0xff]  }
  0x7f   :  { %1908 = vmatpush2.bf16.msra.mxu0 %v5704_v42  ;;  %v5783_v42 = vld [vmem:[#allocation5 + $0x8] ss:$24 sps:$4 sm:$0xff]  }
  0x80   :  { %1909 = vmatprep.subr.bf16.mxu0 %v5708_v43  ;;  %1949 = vmatpush2.bf16.msra.mxu1 %v5707_v44  ;;  %v5791_v43 = vld [vmem:[#allocation5 + $0x2dc] ss:$24 sps:$4 sm:$0xff]   ;;  %v5786_v44 = vld [vmem:[#allocation5 + $0x8d0] ss:$24 sps:$4 sm:$0xff]  }
  0x81   :  { %1950 = vmatprep.subr.bf16.mxu1 %v5711_v45  ;;  %v5794_v45 = vld [vmem:[#allocation5 + $0x8a4] ss:$24 sps:$4 sm:$0xff]  }
  0x83   :  { %1910 = vmatpush2.bf16.msra.mxu0 %v5710_v47  ;;  %v5797_v47 = vld [vmem:[#allocation5 + $0x2ac] ss:$24 sps:$4 sm:$0xff]  }
  0x84   :  { %1911 = vmatprep.subr.bf16.mxu0 %v5714_v49  ;;  %1951 = vmatpush2.bf16.msra.mxu1 %v5713_v51  ;;  %v5792_v49 = vld [vmem:[#allocation5 + $0x8a0] ss:$24 sps:$4 sm:$0xff]  }
  0x85   :  { %1952 = vmatprep.subr.bf16.mxu1 %v5717_v53  ;;  %v5795_v51 = vld [vmem:[#allocation5 + $0x2a8] ss:$24 sps:$4 sm:$0xff]   ;;  %v5803_v53 = vld [vmem:[#allocation5 + $0x27c] ss:$24 sps:$4 sm:$0xff]  }
  0x87   :  { %1912 = vmatpush2.bf16.msra.mxu0 %v5716_v54  ;;  %v5798_v54 = vld [vmem:[#allocation5 + $0x870] ss:$24 sps:$4 sm:$0xff]  }
  0x88   :  { %1913 = vmatprep.subr.bf16.mxu0 %v5720_v55  ;;  %1953 = vmatpush2.bf16.msra.mxu1 %v5719_v56  ;;  %v5806_v55 = vld [vmem:[#allocation5 + $0x844] ss:$24 sps:$4 sm:$0xff]   ;;  %v5801_v56 = vld [vmem:[#allocation5 + $0x278] ss:$24 sps:$4 sm:$0xff]  }
  0x89   :  { %1954 = vmatprep.subr.bf16.mxu1 %v5723_v57  ;;  %v5809_v57 = vld [vmem:[#allocation5 + $0x24c] ss:$24 sps:$4 sm:$0xff]  }
  0x8b   :  { %1914 = vmatpush2.bf16.msra.mxu0 %v5722_v58  ;;  %v5804_v58 = vld [vmem:[#allocation5 + $0x840] ss:$24 sps:$4 sm:$0xff]  }
  0x8c   :  { %1915 = vmatprep.subr.bf16.mxu0 %v5726_v59  ;;  %1955 = vmatpush2.bf16.msra.mxu1 %v5725_v60  ;;  %v5812_v59 = vld [vmem:[#allocation5 + $0x814] ss:$24 sps:$4 sm:$0xff]   ;;  %v5807_v60 = vld [vmem:[#allocation5 + $0x248] ss:$24 sps:$4 sm:$0xff]  }
  0x8d   :  { %1956 = vmatprep.subr.bf16.mxu1 %v5729_v61  ;;  %v5815_v61 = vld [vmem:[#allocation5 + $0x21c] ss:$24 sps:$4 sm:$0xff]  }
  0x8f   :  { %1916 = vmatpush2.bf16.msra.mxu0 %v5728_v62  ;;  %v5810_v62 = vld [vmem:[#allocation5 + $0x810] ss:$24 sps:$4 sm:$0xff]  }
  0x90   :  { %1917 = vmatprep.subr.bf16.mxu0 %v5732_v63  ;;  %1957 = vmatpush2.bf16.msra.mxu1 %v5731_v0  ;;  %v5818_v63 = vld [vmem:[#allocation5 + $0x7e4] ss:$24 sps:$4 sm:$0xff]   ;;  %v5813_v0 = vld [vmem:[#allocation5 + $0x218] ss:$24 sps:$4 sm:$0xff]  }
  0x91   :  { %1958 = vmatprep.subr.bf16.mxu1 %v5735_v2  ;;  %v5816_v2 = vld [vmem:[#allocation5 + $0x7e0] ss:$24 sps:$4 sm:$0xff]  }
  0x93   :  { %1918 = vmatpush2.bf16.msra.mxu0 %v5734_v1  ;;  %v5821_v1 = vld [vmem:[#allocation5 + $0x1ec] ss:$24 sps:$4 sm:$0xff]  }
  0x94   :  { %1969 = vmatprep.subr.bf16.mxu0 %v5740_v5  ;;  %1959 = vmatpush2.bf16.msra.mxu1 %v5737_v3  ;;  %v5824_v3 = vld [vmem:[#allocation5 + $0x7b4] ss:$24 sps:$4 sm:$0xff]  }
  0x95   :  { %2010 = vmatprep.subr.bf16.mxu1 %v5743_v8  ;;  %v5827_v5 = vld [vmem:[#allocation5 + $0x1bc] ss:$24 sps:$4 sm:$0xff]  }
  0x96   :  { %1920 = vmatmul.mubr.bf16.vlgmr.msra.gmra.mxu0 %v6803_v7  ;;  %v5830_v8 = vld [vmem:[#allocation5 + $0x784] ss:$24 sps:$4 sm:$0xff]  }
  0x97   :  { %1970 = vmatpush1.bf16.msra.mxu0 %v5738_v9  ;;  %1961 = vmatmul.mubr.bf16.vlgmr.msra.gmra.mxu1 %v6805_v10  ;;  %v5825_v9 = vld [vmem:[#allocation5 + $0x1b8] ss:$24 sps:$4 sm:$0xff]  }
  0x98   :  { %1971 = vmatprep.subr.bf16.mxu0 %v5746_v11  ;;  %2011 = vmatpush1.bf16.msra.mxu1 %v5741_v12  ;;  %v5828_v11 = vld [vmem:[#allocation5 + $0x780] ss:$24 sps:$4 sm:$0xff]   ;;  %v5833_v12 = vld [vmem:[#allocation5 + $0x18c] ss:$24 sps:$4 sm:$0xff]  }
  0x99   :  { %2042 = vmatprep.mubr.bf16.mxu1 %v6797_v48  ;;  %2012 = vmatprep.subr.bf16.mxu1 %v5749_v13  ;;  %v119_v13 = vld [vmem:[#allocation2 + $0x20] sm:$0xff] }
  0x9a   :  { %2001 = vmatprep.mubr.bf16.mxu0 %v6810_v36 }
  0x9b   :  { %1972 = vmatpush1.bf16.msra.mxu0 %v5744_v14  ;;  %v5836_v14 = vld [vmem:[#allocation5 + $0x45c] ss:$24 sps:$4 sm:$0xff]  }
  0x9c   :  { %1973 = vmatprep.subr.bf16.mxu0 %v5752_v15  ;;  %2013 = vmatpush1.bf16.msra.mxu1 %v5747_v16  ;;  %v5831_v15 = vld [vmem:[#allocation5 + $0x188] ss:$24 sps:$4 sm:$0xff]   ;;  %v6813_v16 = vpack.c.bf16 %v119_v13, %v119_v13 }
  0x9d   :  { %2014 = vmatprep.subr.bf16.mxu1 %v5755_v17  ;;  %v5839_v17 = vld [vmem:[#allocation5 + $0x75c] ss:$24 sps:$4 sm:$0xff]   ;;  %v5915_v13 = vld [vmem:[#allocation5 + $0x7e8] ss:$24 sps:$4 sm:$0xff]  }
  0x9f   :  { %1974 = vmatpush1.bf16.msra.mxu0 %v5750_v18  ;;  %v5834_v18 = vld [vmem:[#allocation5 + $0x458] ss:$24 sps:$4 sm:$0xff]  }
  0xa0   :  { %1975 = vmatprep.subr.bf16.mxu0 %v5758_v19  ;;  %2015 = vmatpush1.bf16.msra.mxu1 %v5753_v20  ;;  %v5842_v19 = vld [vmem:[#allocation5 + $0x42c] ss:$24 sps:$4 sm:$0xff]   ;;  %v5837_v20 = vld [vmem:[#allocation5 + $0x758] ss:$24 sps:$4 sm:$0xff]  }
  0xa1   :  { %2016 = vmatprep.subr.bf16.mxu1 %v5761_v21  ;;  %v5845_v21 = vld [vmem:[#allocation5 + $0x72c] ss:$24 sps:$4 sm:$0xff]  }
  0xa3   :  { %1976 = vmatpush1.bf16.msra.mxu0 %v5756_v22  ;;  %v5840_v22 = vld [vmem:[#allocation5 + $0x428] ss:$24 sps:$4 sm:$0xff]  }
  0xa4   :  { %1977 = vmatprep.subr.bf16.mxu0 %v5764_v23  ;;  %2017 = vmatpush1.bf16.msra.mxu1 %v5759_v24  ;;  %v5848_v23 = vld [vmem:[#allocation5 + $0x3fc] ss:$24 sps:$4 sm:$0xff]   ;;  %v5843_v24 = vld [vmem:[#allocation5 + $0x728] ss:$24 sps:$4 sm:$0xff]  }
  0xa5   :  { %2018 = vmatprep.subr.bf16.mxu1 %v5767_v25  ;;  %v5851_v25 = vld [vmem:[#allocation5 + $0x6fc] ss:$24 sps:$4 sm:$0xff]  }
  0xa7   :  { %1978 = vmatpush1.bf16.msra.mxu0 %v5762_v26  ;;  %v5846_v26 = vld [vmem:[#allocation5 + $0x3f8] ss:$24 sps:$4 sm:$0xff]  }
  0xa8   :  { %1979 = vmatprep.subr.bf16.mxu0 %v5770_v27  ;;  %2019 = vmatpush1.bf16.msra.mxu1 %v5765_v28  ;;  %v5854_v27 = vld [vmem:[#allocation5 + $0x3cc] ss:$24 sps:$4 sm:$0xff]   ;;  %v5849_v28 = vld [vmem:[#allocation5 + $0x6f8] ss:$24 sps:$4 sm:$0xff]  }
  0xa9   :  { %2020 = vmatprep.subr.bf16.mxu1 %v5773_v29  ;;  %v5857_v29 = vld [vmem:[#allocation5 + $0x6cc] ss:$24 sps:$4 sm:$0xff]  }
  0xab   :  { %1980 = vmatpush1.bf16.msra.mxu0 %v5768_v30  ;;  %v5852_v30 = vld [vmem:[#allocation5 + $0x3c8] ss:$24 sps:$4 sm:$0xff]  }
  0xac   :  { %1981 = vmatprep.subr.bf16.mxu0 %v5776_v31  ;;  %2021 = vmatpush1.bf16.msra.mxu1 %v5771_v32  ;;  %v5860_v31 = vld [vmem:[#allocation5 + $0x39c] ss:$24 sps:$4 sm:$0xff]   ;;  %v5855_v32 = vld [vmem:[#allocation5 + $0x6c8] ss:$24 sps:$4 sm:$0xff]  }
  0xad   :  { %2022 = vmatprep.subr.bf16.mxu1 %v5779_v33  ;;  %v5863_v33 = vld [vmem:[#allocation5 + $0x69c] ss:$24 sps:$4 sm:$0xff]  }
  0xaf   :  { %1982 = vmatpush1.bf16.msra.mxu0 %v5774_v35  ;;  %v5866_v35 = vld [vmem:[#allocation5 + $0x36c] ss:$24 sps:$4 sm:$0xff]  }
  0xb0   :  { %1983 = vmatprep.subr.bf16.mxu0 %v5782_v37  ;;  %2023 = vmatpush1.bf16.msra.mxu1 %v5777_v38  ;;  %v5861_v37 = vld [vmem:[#allocation5 + $0x698] ss:$24 sps:$4 sm:$0xff]   ;;  %v5869_v38 = vld [vmem:[#allocation5 + $0x66c] ss:$24 sps:$4 sm:$0xff]  }
  0xb1   :  { %2024 = vmatprep.subr.bf16.mxu1 %v5785_v39  ;;  %v5864_v39 = vld [vmem:[#allocation5 + $0x368] ss:$24 sps:$4 sm:$0xff]  }
  0xb3   :  { %1984 = vmatpush1.bf16.msra.mxu0 %v5780_v40  ;;  %v5872_v40 = vld [vmem:[#allocation5 + $0x33c] ss:$24 sps:$4 sm:$0xff]  }
  0xb4   :  { %1985 = vmatprep.subr.bf16.mxu0 %v5788_v41  ;;  %2025 = vmatpush1.bf16.msra.mxu1 %v5783_v42  ;;  %v5867_v41 = vld [vmem:[#allocation5 + $0x668] ss:$24 sps:$4 sm:$0xff]   ;;  %v5875_v42 = vld [vmem:[#allocation5 + $0x63c] ss:$24 sps:$4 sm:$0xff]  }
  0xb5   :  { %2026 = vmatprep.subr.bf16.mxu1 %v5791_v43  ;;  %v5870_v43 = vld [vmem:[#allocation5 + $0x338] ss:$24 sps:$4 sm:$0xff]  }
  0xb7   :  { %1986 = vmatpush2.bf16.msra.mxu0 %v5786_v44  ;;  %v5878_v44 = vld [vmem:[#allocation5 + $0x30c] ss:$24 sps:$4 sm:$0xff]  }
  0xb8   :  { %1987 = vmatprep.subr.bf16.mxu0 %v5794_v45  ;;  %2027 = vmatpush2.bf16.msra.mxu1 %v5789_v46  ;;  %v5873_v45 = vld [vmem:[#allocation5 + $0x638] ss:$24 sps:$4 sm:$0xff]   ;;  %v5881_v46 = vld [vmem:[#allocation5 + $0x60c] ss:$24 sps:$4 sm:$0xff]  }
  0xb9   :  { %2028 = vmatprep.subr.bf16.mxu1 %v5797_v47  ;;  %v5876_v47 = vld [vmem:[#allocation5 + $0x308] ss:$24 sps:$4 sm:$0xff]  }
  0xbb   :  { %1988 = vmatpush2.bf16.msra.mxu0 %v5792_v49  ;;  %v5884_v49 = vld [vmem:[#allocation5 + $0x5dc] ss:$24 sps:$4 sm:$0xff]  }
  0xbc   :  { %1989 = vmatprep.subr.bf16.mxu0 %v5800_v50  ;;  %2029 = vmatpush2.bf16.msra.mxu1 %v5795_v51  ;;  %v5879_v50 = vld [vmem:[#allocation5 + $0x608] ss:$24 sps:$4 sm:$0xff]   ;;  %v5887_v51 = vld [vmem:[#allocation5 + $0x8dc] ss:$24 sps:$4 sm:$0xff]  }
  0xbd   :  { %2030 = vmatprep.subr.bf16.mxu1 %v5803_v53  ;;  %v5882_v53 = vld [vmem:[#allocation5 + $0x5d8] ss:$24 sps:$4 sm:$0xff]  }
  0xbf   :  { %1990 = vmatpush2.bf16.msra.mxu0 %v5798_v54  ;;  %v5890_v54 = vld [vmem:[#allocation5 + $0x5ac] ss:$24 sps:$4 sm:$0xff]  }
  0xc0   :  { %1991 = vmatprep.subr.bf16.mxu0 %v5806_v55  ;;  %2031 = vmatpush2.bf16.msra.mxu1 %v5801_v56  ;;  %v5885_v55 = vld [vmem:[#allocation5 + $0x8d8] ss:$24 sps:$4 sm:$0xff]   ;;  %v5893_v56 = vld [vmem:[#allocation5 + $0x8ac] ss:$24 sps:$4 sm:$0xff]  }
  0xc1   :  { %2032 = vmatprep.subr.bf16.mxu1 %v5809_v57  ;;  %v5888_v57 = vld [vmem:[#allocation5 + $0x5a8] ss:$24 sps:$4 sm:$0xff]  }
  0xc3   :  { %1992 = vmatpush2.bf16.msra.mxu0 %v5804_v58  ;;  %v5896_v58 = vld [vmem:[#allocation5 + $0x57c] ss:$24 sps:$4 sm:$0xff]  }
  0xc4   :  { %1993 = vmatprep.subr.bf16.mxu0 %v5812_v59  ;;  %2033 = vmatpush2.bf16.msra.mxu1 %v5807_v60  ;;  %v5891_v59 = vld [vmem:[#allocation5 + $0x8a8] ss:$24 sps:$4 sm:$0xff]   ;;  %v5899_v60 = vld [vmem:[#allocation5 + $0x87c] ss:$24 sps:$4 sm:$0xff]  }
  0xc5   :  { %2034 = vmatprep.subr.bf16.mxu1 %v5815_v61  ;;  %v5894_v61 = vld [vmem:[#allocation5 + $0x578] ss:$24 sps:$4 sm:$0xff]  }
  0xc7   :  { %1994 = vmatpush2.bf16.msra.mxu0 %v5810_v62  ;;  %v5902_v62 = vld [vmem:[#allocation5 + $0x54c] ss:$24 sps:$4 sm:$0xff]  }
  0xc8   :  { %1995 = vmatprep.subr.bf16.mxu0 %v5818_v63  ;;  %2035 = vmatpush2.bf16.msra.mxu1 %v5813_v0  ;;  %v5897_v63 = vld [vmem:[#allocation5 + $0x878] ss:$24 sps:$4 sm:$0xff]   ;;  %v5905_v0 = vld [vmem:[#allocation5 + $0x84c] ss:$24 sps:$4 sm:$0xff]  }
  0xc9   :  { %2036 = vmatprep.subr.bf16.mxu1 %v5821_v1  ;;  %v5900_v1 = vld [vmem:[#allocation5 + $0x548] ss:$24 sps:$4 sm:$0xff]  }
  0xcb   :  { %1996 = vmatpush2.bf16.msra.mxu0 %v5816_v2  ;;  %v5908_v2 = vld [vmem:[#allocation5 + $0x51c] ss:$24 sps:$4 sm:$0xff]  }
  0xcc   :  { %1997 = vmatprep.subr.bf16.mxu0 %v5824_v3  ;;  %2037 = vmatpush2.bf16.msra.mxu1 %v5819_v4  ;;  %v5903_v3 = vld [vmem:[#allocation5 + $0x848] ss:$24 sps:$4 sm:$0xff]   ;;  %v5911_v4 = vld [vmem:[#allocation5 + $0x81c] ss:$24 sps:$4 sm:$0xff]  }
  0xcd   :  { %2038 = vmatprep.subr.bf16.mxu1 %v5827_v5  ;;  %v5906_v5 = vld [vmem:[#allocation5 + $0x518] ss:$24 sps:$4 sm:$0xff]  }
  0xcf   :  { %1998 = vmatpush2.bf16.msra.mxu0 %v5822_v6  ;;  %v5914_v6 = vld [vmem:[#allocation5 + $0x4ec] ss:$24 sps:$4 sm:$0xff]  }
  0xd0   :  { %1999 = vmatprep.subr.bf16.mxu0 %v5830_v8  ;;  %2039 = vmatpush2.bf16.msra.mxu1 %v5825_v9  ;;  %v5909_v8 = vld [vmem:[#allocation5 + $0x818] ss:$24 sps:$4 sm:$0xff]   ;;  %v5917_v9 = vld [vmem:[#allocation5 + $0x7ec] ss:$24 sps:$4 sm:$0xff]  }
  0xd1   :  { %2040 = vmatprep.subr.bf16.mxu1 %v5833_v12  ;;  %v5920_v12 = vld [vmem:[#allocation5 + $0x4bc] ss:$24 sps:$4 sm:$0xff]  }
  0xd3   :  { %2000 = vmatpush2.bf16.msra.mxu0 %v5828_v11  ;;  %v5912_v11 = vld [vmem:[#allocation5 + $0x4e8] ss:$24 sps:$4 sm:$0xff]  }
  0xd4   :  { %2051 = vmatprep.subr.bf16.mxu0 %v5836_v14  ;;  %2041 = vmatpush2.bf16.msra.mxu1 %v5831_v15  ;;  %v5923_v14 = vld [vmem:[#allocation5 + $0x7bc] ss:$24 sps:$4 sm:$0xff]   ;;  %v5918_v15 = vld [vmem:[#allocation5 + $0x4b8] ss:$24 sps:$4 sm:$0xff]  }
  0xd5   :  { %2092 = vmatprep.subr.bf16.mxu1 %v5839_v17  ;;  %v5926_v17 = vld [vmem:[#allocation5 + $0x48c] ss:$24 sps:$4 sm:$0xff]  }
  0xd6   :  { %2002 = vmatmul.mubr.bf16.vlgmr.msra.gmra.mxu0 %v6813_v16 }
  0xd7   :  { %2052 = vmatpush1.bf16.msra.mxu0 %v5834_v18  ;;  %2083 = vmatprep.mubr.bf16.mxu0 %v6800_v52  ;;  %v5921_v18 = vld [vmem:[#allocation5 + $0x7b8] ss:$24 sps:$4 sm:$0xff]  }
  0xd8   :  { %2043 = vmatmul.mubr.bf16.vlgmr.msra.gmra.mxu1 %v6803_v7  ;;  %2053 = vmatprep.subr.bf16.mxu0 %v5842_v19  ;;  %v5929_v19 = vld [vmem:[#allocation5 + $0x78c] ss:$24 sps:$4 sm:$0xff]  }
  0xd9   :  { %2093 = vmatpush1.bf16.msra.mxu1 %v5837_v20  ;;  %2124 = vmatprep.mubr.bf16.mxu1 %v6810_v36  ;;  %v5924_v20 = vld [vmem:[#allocation5 + $0x488] ss:$24 sps:$4 sm:$0xff]  }
  0xda   :  { %2094 = vmatprep.subr.bf16.mxu1 %v5845_v21  ;;  %v5932_v21 = vld [vmem:[#allocation5 + $0x164] ss:$24 sps:$4 sm:$0xff]  }
  0xdb   :  { %2054 = vmatpush1.bf16.msra.mxu0 %v5840_v22  ;;  %v5927_v22 = vld [vmem:[#allocation5 + $0x788] ss:$24 sps:$4 sm:$0xff]  }
  0xdc   :  { %2055 = vmatprep.subr.bf16.mxu0 %v5848_v23  ;;  %v5935_v23 = vld [vmem:[#allocation5 + $0x464] ss:$24 sps:$4 sm:$0xff]  }
  0xdd   :  { %2095 = vmatpush1.bf16.msra.mxu1 %v5843_v24  ;;  %v5930_v24 = vld [vmem:[#allocation5 + $0x160] ss:$24 sps:$4 sm:$0xff]  }
  0xde   :  { %2096 = vmatprep.subr.bf16.mxu1 %v5851_v25  ;;  %v5938_v25 = vld [vmem:[#allocation5 + $0x134] ss:$24 sps:$4 sm:$0xff]  }
  0xdf   :  { %2056 = vmatpush1.bf16.msra.mxu0 %v5846_v26  ;;  %v5933_v26 = vld [vmem:[#allocation5 + $0x460] ss:$24 sps:$4 sm:$0xff]  }
  0xe0   :  { %2057 = vmatprep.subr.bf16.mxu0 %v5854_v27  ;;  %v5941_v27 = vld [vmem:[#allocation5 + $0x434] ss:$24 sps:$4 sm:$0xff]  }
  0xe1   :  { %2097 = vmatpush1.bf16.msra.mxu1 %v5849_v28  ;;  %v5936_v28 = vld [vmem:[#allocation5 + $0x130] ss:$24 sps:$4 sm:$0xff]  }
  0xe2   :  { %2098 = vmatprep.subr.bf16.mxu1 %v5857_v29  ;;  %v5944_v29 = vld [vmem:[#allocation5 + $0x104] ss:$24 sps:$4 sm:$0xff]  }
  0xe3   :  { %2058 = vmatpush1.bf16.msra.mxu0 %v5852_v30  ;;  %v5939_v30 = vld [vmem:[#allocation5 + $0x430] ss:$24 sps:$4 sm:$0xff]  }
  0xe4   :  { %2059 = vmatprep.subr.bf16.mxu0 %v5860_v31  ;;  %v5947_v31 = vld [vmem:[#allocation5 + $0x404] ss:$24 sps:$4 sm:$0xff]  }
  0xe5   :  { %2099 = vmatpush1.bf16.msra.mxu1 %v5855_v32  ;;  %v5942_v32 = vld [vmem:[#allocation5 + $0x100] ss:$24 sps:$4 sm:$0xff]  }
  0xe6   :  { %2100 = vmatprep.subr.bf16.mxu1 %v5863_v33  ;;  %v5950_v33 = vld [vmem:[#allocation5 + $0xd4] ss:$24 sps:$4 sm:$0xff]  }
  0xe7   :  { %2060 = vmatpush1.bf16.msra.mxu0 %v5858_v34  ;;  %v5945_v34 = vld [vmem:[#allocation5 + $0x400] ss:$24 sps:$4 sm:$0xff]  }
  0xe8   :  { %2061 = vmatprep.subr.bf16.mxu0 %v5866_v35  ;;  %v5953_v35 = vld [vmem:[#allocation5 + $0x3d4] ss:$24 sps:$4 sm:$0xff]  }
  0xe9   :  { %2101 = vmatpush1.bf16.msra.mxu1 %v5861_v37  ;;  %v5956_v37 = vld [vmem:[#allocation5 + $0xa4] ss:$24 sps:$4 sm:$0xff]  }
  0xea   :  { %2102 = vmatprep.subr.bf16.mxu1 %v5869_v38  ;;  %v5951_v38 = vld [vmem:[#allocation5 + $0x3d0] ss:$24 sps:$4 sm:$0xff]  }
  0xeb   :  { %2062 = vmatpush1.bf16.msra.mxu0 %v5864_v39  ;;  %v5959_v39 = vld [vmem:[#allocation5 + $0x3a4] ss:$24 sps:$4 sm:$0xff]  }
  0xec   :  { %2063 = vmatprep.subr.bf16.mxu0 %v5872_v40  ;;  %v5962_v40 = vld [vmem:[#allocation5 + $0x74] ss:$24 sps:$4 sm:$0xff]  }
  0xed   :  { %2103 = vmatpush1.bf16.msra.mxu1 %v5867_v41  ;;  %v5957_v41 = vld [vmem:[#allocation5 + $0x3a0] ss:$24 sps:$4 sm:$0xff]  }
  0xee   :  { %2104 = vmatprep.subr.bf16.mxu1 %v5875_v42  ;;  %v5965_v42 = vld [vmem:[#allocation5 + $0x374] ss:$24 sps:$4 sm:$0xff]  }
  0xef   :  { %2064 = vmatpush1.bf16.msra.mxu0 %v5870_v43  ;;  %v5960_v43 = vld [vmem:[#allocation5 + $0x70] ss:$24 sps:$4 sm:$0xff]  }
  0xf0   :  { %2065 = vmatprep.subr.bf16.mxu0 %v5878_v44  ;;  %v5968_v44 = vld [vmem:[#allocation5 + $0x44] ss:$24 sps:$4 sm:$0xff]  }
  0xf1   :  { %2105 = vmatpush1.bf16.msra.mxu1 %v5873_v45  ;;  %v5963_v45 = vld [vmem:[#allocation5 + $0x370] ss:$24 sps:$4 sm:$0xff]  }
  0xf2   :  { %2106 = vmatprep.subr.bf16.mxu1 %v5881_v46  ;;  %v5971_v46 = vld [vmem:[#allocation5 + $0x344] ss:$24 sps:$4 sm:$0xff]  }
  0xf3   :  { %2066 = vmatpush1.bf16.msra.mxu0 %v5876_v47  ;;  %v5966_v47 = vld [vmem:[#allocation5 + $0x40] ss:$24 sps:$4 sm:$0xff]  }
  0xf4   :  { %2067 = vmatprep.subr.bf16.mxu0 %v5884_v49  ;;  %v5974_v49 = vld [vmem:[#allocation5 + $0x14] ss:$24 sps:$4 sm:$0xff]  }
  0xf5   :  { %2107 = vmatpush1.bf16.msra.mxu1 %v5879_v50  ;;  %v5969_v50 = vld [vmem:[#allocation5 + $0x340] ss:$24 sps:$4 sm:$0xff]  }
  0xf6   :  { %2108 = vmatprep.subr.bf16.mxu1 %v5887_v51  ;;  %v5977_v51 = vld [vmem:[#allocation5 + $0x314] ss:$24 sps:$4 sm:$0xff]  }
  0xf7   :  { %2068 = vmatpush2.bf16.msra.mxu0 %v5882_v53  ;;  %v5972_v53 = vld [vmem:[#allocation5 + $0x10] ss:$24 sps:$4 sm:$0xff]  }
  0xf8   :  { %2069 = vmatprep.subr.bf16.mxu0 %v5890_v54  ;;  %v5980_v54 = vld [vmem:[#allocation5 + $0x2e4] ss:$24 sps:$4 sm:$0xff]  }
  0xf9   :  { %2109 = vmatpush2.bf16.msra.mxu1 %v5885_v55  ;;  %v5975_v55 = vld [vmem:[#allocation5 + $0x310] ss:$24 sps:$4 sm:$0xff]  }
  0xfa   :  { %2110 = vmatprep.subr.bf16.mxu1 %v5893_v56  ;;  %v5983_v56 = vld [vmem:[#allocation5 + $0x5e4] ss:$24 sps:$4 sm:$0xff]  }
  0xfb   :  { %2070 = vmatpush2.bf16.msra.mxu0 %v5888_v57  ;;  %v5978_v57 = vld [vmem:[#allocation5 + $0x2e0] ss:$24 sps:$4 sm:$0xff]  }
  0xfc   :  { %2071 = vmatprep.subr.bf16.mxu0 %v5896_v58  ;;  %v5986_v58 = vld [vmem:[#allocation5 + $0x2b4] ss:$24 sps:$4 sm:$0xff]  }
  0xfd   :  { %2111 = vmatpush2.bf16.msra.mxu1 %v5891_v59  ;;  %v5981_v59 = vld [vmem:[#allocation5 + $0x5e0] ss:$24 sps:$4 sm:$0xff]  }
  0xfe   :  { %2112 = vmatprep.subr.bf16.mxu1 %v5899_v60  ;;  %v5989_v60 = vld [vmem:[#allocation5 + $0x5b4] ss:$24 sps:$4 sm:$0xff]  }
  0xff   :  { %2072 = vmatpush2.bf16.msra.mxu0 %v5894_v61  ;;  %v5984_v61 = vld [vmem:[#allocation5 + $0x2b0] ss:$24 sps:$4 sm:$0xff]  }
 0x100   :  { %2073 = vmatprep.subr.bf16.mxu0 %v5902_v62  ;;  %v5987_v62 = vld [vmem:[#allocation5 + $0x5b0] ss:$24 sps:$4 sm:$0xff]  }
 0x101   :  { %2113 = vmatpush2.bf16.msra.mxu1 %v5897_v63  ;;  %v5992_v63 = vld [vmem:[#allocation5 + $0x284] ss:$24 sps:$4 sm:$0xff]  }
 0x102   :  { %2114 = vmatprep.subr.bf16.mxu1 %v5905_v0  ;;  %v5995_v0 = vld [vmem:[#allocation5 + $0x584] ss:$24 sps:$4 sm:$0xff]  }
 0x103   :  { %2074 = vmatpush2.bf16.msra.mxu0 %v5900_v1  ;;  %v5990_v1 = vld [vmem:[#allocation5 + $0x280] ss:$24 sps:$4 sm:$0xff]  }
 0x104   :  { %2075 = vmatprep.subr.bf16.mxu0 %v5908_v2  ;;  %v5993_v2 = vld [vmem:[#allocation5 + $0x580] ss:$24 sps:$4 sm:$0xff]  }
 0x105   :  { %2115 = vmatpush2.bf16.msra.mxu1 %v5903_v3  ;;  %v5998_v3 = vld [vmem:[#allocation5 + $0x254] ss:$24 sps:$4 sm:$0xff]  }
 0x106   :  { %2116 = vmatprep.subr.bf16.mxu1 %v5911_v4  ;;  %v6001_v4 = vld [vmem:[#allocation5 + $0x554] ss:$24 sps:$4 sm:$0xff]  }
 0x107   :  { %2076 = vmatpush2.bf16.msra.mxu0 %v5906_v5  ;;  %v5996_v5 = vld [vmem:[#allocation5 + $0x250] ss:$24 sps:$4 sm:$0xff]  }
 0x108   :  { %2077 = vmatprep.subr.bf16.mxu0 %v5914_v6  ;;  %v5999_v6 = vld [vmem:[#allocation5 + $0x550] ss:$24 sps:$4 sm:$0xff]  }
 0x109   :  { %2117 = vmatpush2.bf16.msra.mxu1 %v5909_v8  ;;  %v6004_v8 = vld [vmem:[#allocation5 + $0x224] ss:$24 sps:$4 sm:$0xff]  }
 0x10a   :  { %2118 = vmatprep.subr.bf16.mxu1 %v5917_v9  ;;  %v6007_v9 = vld [vmem:[#allocation5 + $0x524] ss:$24 sps:$4 sm:$0xff]  }
 0x10b   :  { %2078 = vmatpush2.bf16.msra.mxu0 %v5912_v11  ;;  %v6002_v11 = vld [vmem:[#allocation5 + $0x220] ss:$24 sps:$4 sm:$0xff]  }
 0x10c   :  { %2079 = vmatprep.subr.bf16.mxu0 %v5920_v12  ;;  %v6005_v12 = vld [vmem:[#allocation5 + $0x520] ss:$24 sps:$4 sm:$0xff]  }
 0x10d   :  { %2119 = vmatpush2.bf16.msra.mxu1 %v5915_v13  ;;  %v6010_v13 = vld [vmem:[#allocation5 + $0x1f4] ss:$24 sps:$4 sm:$0xff]  }
 0x10e   :  { %2120 = vmatprep.subr.bf16.mxu1 %v5923_v14  ;;  %v6013_v14 = vld [vmem:[#allocation5 + $0x4f4] ss:$24 sps:$4 sm:$0xff]  }
 0x10f   :  { %2080 = vmatpush2.bf16.msra.mxu0 %v5918_v15  ;;  %v6008_v15 = vld [vmem:[#allocation5 + $0x1f0] ss:$24 sps:$4 sm:$0xff]  }
 0x110   :  { %2081 = vmatprep.subr.bf16.mxu0 %v5926_v17  ;;  %v6011_v17 = vld [vmem:[#allocation5 + $0x4f0] ss:$24 sps:$4 sm:$0xff]  }
 0x111   :  { %2121 = vmatpush2.bf16.msra.mxu1 %v5921_v18  ;;  %v6016_v18 = vld [vmem:[#allocation5 + $0x1c4] ss:$24 sps:$4 sm:$0xff]  }
 0x112   :  { %2122 = vmatprep.subr.bf16.mxu1 %v5929_v19  ;;  %v6019_v19 = vld [vmem:[#allocation5 + $0x4c4] ss:$24 sps:$4 sm:$0xff]  }
 0x113   :  { %2082 = vmatpush2.bf16.msra.mxu0 %v5924_v20  ;;  %v6014_v20 = vld [vmem:[#allocation5 + $0x1c0] ss:$24 sps:$4 sm:$0xff]  }
 0x114   :  { %2133 = vmatprep.subr.bf16.mxu0 %v5932_v21  ;;  %v6022_v21 = vld [vmem:[#allocation5 + $0x194] ss:$24 sps:$4 sm:$0xff]  }
 0x115   :  { %2123 = vmatpush2.bf16.msra.mxu1 %v5927_v22  ;;  %v6017_v22 = vld [vmem:[#allocation5 + $0x4c0] ss:$24 sps:$4 sm:$0xff]  }
 0x116   :  { %2084 = vmatmul.mubr.bf16.vlgmr.msra.gmra.mxu0 %v6805_v10  ;;  %2174 = vmatprep.subr.bf16.mxu1 %v5935_v23  ;;  %v6025_v23 = vld [vmem:[#allocation5 + $0x494] ss:$24 sps:$4 sm:$0xff]  }
 0x117   :  { %2134 = vmatpush1.bf16.msra.mxu0 %v5930_v24  ;;  %2165 = vmatprep.mubr.bf16.mxu0 %v6797_v48  ;;  %v5948_v48 = vld [vmem:[#allocation5 + $0xd0] ss:$24 sps:$4 sm:$0xff]  }
 0x118   :  { %2125 = vmatmul.mubr.bf16.vlgmr.msra.gmra.mxu1 %v6813_v16  ;;  %2135 = vmatprep.subr.bf16.mxu0 %v5938_v25  ;;  %v6020_v24 = vld [vmem:[#allocation5 + $0x190] ss:$24 sps:$4 sm:$0xff]   ;;  %v6028_v25 = vld [vmem:[#allocation5 + $0x764] ss:$24 sps:$4 sm:$0xff]  }
 0x119   :  { %2175 = vmatpush1.bf16.msra.mxu1 %v5933_v26  ;;  %2206 = vmatprep.mubr.bf16.mxu1 %v6800_v52  ;;  %v5954_v52 = vld [vmem:[#allocation5 + $0xa0] ss:$24 sps:$4 sm:$0xff]   ;;  %v6023_v26 = vld [vmem:[#allocation5 + $0x490] ss:$24 sps:$4 sm:$0xff]  }
 0x11a   :  { %2176 = vmatprep.subr.bf16.mxu1 %v5941_v27  ;;  %v6037_v27 = vld [vmem:[#allocation8 + $0x154] ss:$24 sps:$4 sm:$0xff]  }
 0x11b   :  { %2136 = vmatpush1.bf16.msra.mxu0 %v5936_v28  ;;  %v6026_v28 = vld [vmem:[#allocation5 + $0x760] ss:$24 sps:$4 sm:$0xff]  }
 0x11c   :  { %2137 = vmatprep.subr.bf16.mxu0 %v5944_v29  ;;  %v6031_v29 = vld [vmem:[#allocation5 + $0x734] ss:$24 sps:$4 sm:$0xff]  }
 0x11d   :  { %2177 = vmatpush1.bf16.msra.mxu1 %v5939_v30  ;;  %v6035_v30 = vld [vmem:[#allocation8 + $0x150] ss:$24 sps:$4 sm:$0xff]  }
 0x11e   :  { %2178 = vmatprep.subr.bf16.mxu1 %v5947_v31  ;;  %v6043_v31 = vld [vmem:[#allocation8 + $0x124] ss:$24 sps:$4 sm:$0xff]  }
 0x11f   :  { %2138 = vmatpush1.bf16.msra.mxu0 %v5942_v32  ;;  %v6029_v32 = vld [vmem:[#allocation5 + $0x730] ss:$24 sps:$4 sm:$0xff]  }
 0x120   :  { %2139 = vmatprep.subr.bf16.mxu0 %v5950_v33 }
 0x121   :  { %2179 = vmatpush1.bf16.msra.mxu1 %v5945_v34  ;;  %v6034_v34 = vld [vmem:[#allocation5 + $0x704] ss:$24 sps:$4 sm:$0xff]  }
 0x122   :  { %2180 = vmatprep.subr.bf16.mxu1 %v5953_v35  ;;  %v6041_v35 = vld [vmem:[#allocation8 + $0x120] ss:$24 sps:$4 sm:$0xff]  }
 0x123   :  { %2140 = vmatpush1.bf16.msra.mxu0 %v5948_v48 }
 0x124   :  { %2141 = vmatprep.subr.bf16.mxu0 %v5956_v37 }
 0x125   :  { %2181 = vmatpush1.bf16.msra.mxu1 %v5951_v38  ;;  %v6049_v38 = vld [vmem:[#allocation8 + $0xf4] ss:$24 sps:$4 sm:$0xff]  }
 0x126   :  { %2182 = vmatprep.subr.bf16.mxu1 %v5959_v39  ;;  %v6032_v39 = vld [vmem:[#allocation5 + $0x700] ss:$24 sps:$4 sm:$0xff]  }
 0x127   :  { %2142 = vmatpush1.bf16.msra.mxu0 %v5954_v52 }
 0x128   :  { %2143 = vmatprep.subr.bf16.mxu0 %v5962_v40 }
 0x129   :  { %2183 = vmatpush1.bf16.msra.mxu1 %v5957_v41  ;;  %v6047_v41 = vld [vmem:[#allocation8 + $0xf0] ss:$24 sps:$4 sm:$0xff]  }
 0x12a   :  { %2184 = vmatprep.subr.bf16.mxu1 %v5965_v42 }
 0x12b   :  { %2144 = vmatpush1.bf16.msra.mxu0 %v5960_v43 }
 0x12c   :  { %2145 = vmatprep.subr.bf16.mxu0 %v5968_v44  ;;  %v6038_v44 = vld [vmem:[#allocation5 + $0x6d0] ss:$24 sps:$4 sm:$0xff]  }
 0x12d   :  { %2185 = vmatpush1.bf16.msra.mxu1 %v5963_v45  ;;  %v6046_v45 = vld [vmem:[#allocation5 + $0x6a4] ss:$24 sps:$4 sm:$0xff]  }
 0x12e   :  { %2186 = vmatprep.subr.bf16.mxu1 %v5971_v46  ;;  %v6053_v46 = vld [vmem:[#allocation8 + $0xc0] ss:$24 sps:$4 sm:$0xff]  }
 0x12f   :  { %2146 = vmatpush1.bf16.msra.mxu0 %v5966_v47  ;;  %v6061_v47 = vld [vmem:[#allocation8 + $0x94] ss:$24 sps:$4 sm:$0xff]  }
 0x130   :  { %2147 = vmatprep.subr.bf16.mxu0 %v5974_v49  ;;  %v6044_v49 = vld [vmem:[#allocation5 + $0x6a0] ss:$24 sps:$4 sm:$0xff]  }
 0x131   :  { %2187 = vmatpush1.bf16.msra.mxu1 %v5969_v50  ;;  %v6052_v50 = vld [vmem:[#allocation5 + $0x674] ss:$24 sps:$4 sm:$0xff]  }
 0x132   :  { %2188 = vmatprep.subr.bf16.mxu1 %v5977_v51  ;;  %v6059_v51 = vld [vmem:[#allocation8 + $0x90] ss:$24 sps:$4 sm:$0xff]  }
 0x133   :  { %2148 = vmatpush1.bf16.msra.mxu0 %v5972_v53  ;;  %v6067_v53 = vld [vmem:[#allocation8 + $0x64] ss:$24 sps:$4 sm:$0xff]  }
 0x134   :  { %2149 = vmatprep.subr.bf16.mxu0 %v5980_v54  ;;  %v6050_v54 = vld [vmem:[#allocation5 + $0x670] ss:$24 sps:$4 sm:$0xff]  }
 0x135   :  { %2189 = vmatpush1.bf16.msra.mxu1 %v5975_v55  ;;  %v6058_v55 = vld [vmem:[#allocation5 + $0x644] ss:$24 sps:$4 sm:$0xff]  }
 0x136   :  { %2190 = vmatprep.subr.bf16.mxu1 %v5983_v56  ;;  %v6065_v56 = vld [vmem:[#allocation8 + $0x60] ss:$24 sps:$4 sm:$0xff]  }
 0x137   :  { %2150 = vmatpush2.bf16.msra.mxu0 %v5978_v57  ;;  %v6073_v57 = vld [vmem:[#allocation8 + $0x34] ss:$24 sps:$4 sm:$0xff]  }
 0x138   :  { %2151 = vmatprep.subr.bf16.mxu0 %v5986_v58  ;;  %v6056_v58 = vld [vmem:[#allocation5 + $0x640] ss:$24 sps:$4 sm:$0xff]  }
 0x139   :  { %2191 = vmatpush2.bf16.msra.mxu1 %v5981_v59  ;;  %v6064_v59 = vld [vmem:[#allocation5 + $0x614] ss:$24 sps:$4 sm:$0xff]  }
 0x13a   :  { %2192 = vmatprep.subr.bf16.mxu1 %v5989_v60  ;;  %v6071_v60 = vld [vmem:[#allocation8 + $0x30] ss:$24 sps:$4 sm:$0xff]  }
 0x13b   :  { %2152 = vmatpush2.bf16.msra.mxu0 %v5984_v61  ;;  %v6079_v61 = vld [vmem:[#allocation8 + $0x4] ss:$24 sps:$4 sm:$0xff]  }
 0x13c   :  { %2153 = vmatprep.subr.bf16.mxu0 %v5992_v63  ;;  %v6070_v63 = vld [vmem:[#allocation5 + $0x8e4] ss:$24 sps:$4 sm:$0xff]  }
 0x13d   :  { %2193 = vmatpush2.bf16.msra.mxu1 %v5987_v62  ;;  %v6062_v62 = vld [vmem:[#allocation5 + $0x610] ss:$24 sps:$4 sm:$0xff]  }
 0x13e   :  { %2194 = vmatprep.subr.bf16.mxu1 %v5995_v0  ;;  %v6077_v0 = vld [vmem:[#allocation8] ss:$24 sps:$4 sm:$0xff]  }
 0x13f   :  { %2154 = vmatpush2.bf16.msra.mxu0 %v5990_v1  ;;  %v6085_v1 = vld [vmem:[#allocation8 + $0x2d4] ss:$24 sps:$4 sm:$0xff]  }
 0x140   :  { %2155 = vmatprep.subr.bf16.mxu0 %v5998_v3  ;;  %v6076_v3 = vld [vmem:[#allocation5 + $0x8b4] ss:$24 sps:$4 sm:$0xff]  }
 0x141   :  { %2195 = vmatpush2.bf16.msra.mxu1 %v5993_v2  ;;  %v6068_v2 = vld [vmem:[#allocation5 + $0x8e0] ss:$24 sps:$4 sm:$0xff]  }
 0x142   :  { %2196 = vmatprep.subr.bf16.mxu1 %v6001_v4  ;;  %v6083_v4 = vld [vmem:[#allocation8 + $0x2d0] ss:$24 sps:$4 sm:$0xff]  }
 0x143   :  { %2156 = vmatpush2.bf16.msra.mxu0 %v5996_v5  ;;  %v6091_v5 = vld [vmem:[#allocation8 + $0x2a4] ss:$24 sps:$4 sm:$0xff]  }
 0x144   :  { %2157 = vmatprep.subr.bf16.mxu0 %v6004_v8  ;;  %v6082_v8 = vld [vmem:[#allocation5 + $0x884] ss:$24 sps:$4 sm:$0xff]  }
 0x145   :  { %2197 = vmatpush2.bf16.msra.mxu1 %v5999_v6  ;;  %v6074_v6 = vld [vmem:[#allocation5 + $0x8b0] ss:$24 sps:$4 sm:$0xff]  }
 0x146   :  { %2198 = vmatprep.subr.bf16.mxu1 %v6007_v9  ;;  %v6089_v9 = vld [vmem:[#allocation8 + $0x2a0] ss:$24 sps:$4 sm:$0xff]  }
 0x147   :  { %2158 = vmatpush2.bf16.msra.mxu0 %v6002_v11  ;;  %v6097_v11 = vld [vmem:[#allocation8 + $0x274] ss:$24 sps:$4 sm:$0xff]  }
 0x148   :  { %2159 = vmatprep.subr.bf16.mxu0 %v6010_v13  ;;  %v6088_v13 = vld [vmem:[#allocation5 + $0x854] ss:$24 sps:$4 sm:$0xff]  }
 0x149   :  { %2199 = vmatpush2.bf16.msra.mxu1 %v6005_v12  ;;  %v6080_v12 = vld [vmem:[#allocation5 + $0x880] ss:$24 sps:$4 sm:$0xff]  }
 0x14a   :  { %2200 = vmatprep.subr.bf16.mxu1 %v6013_v14  ;;  %v6095_v14 = vld [vmem:[#allocation8 + $0x270] ss:$24 sps:$4 sm:$0xff]  }
 0x14b   :  { %2160 = vmatpush2.bf16.msra.mxu0 %v6008_v15  ;;  %v6103_v15 = vld [vmem:[#allocation8 + $0x244] ss:$24 sps:$4 sm:$0xff]  }
 0x14c   :  { %2161 = vmatprep.subr.bf16.mxu0 %v6016_v18  ;;  %v6094_v18 = vld [vmem:[#allocation5 + $0x824] ss:$24 sps:$4 sm:$0xff]  }
 0x14d   :  { %2201 = vmatpush2.bf16.msra.mxu1 %v6011_v17  ;;  %v6086_v17 = vld [vmem:[#allocation5 + $0x850] ss:$24 sps:$4 sm:$0xff]  }
 0x14e   :  { %2202 = vmatprep.subr.bf16.mxu1 %v6019_v19  ;;  %v6101_v19 = vld [vmem:[#allocation8 + $0x240] ss:$24 sps:$4 sm:$0xff]  }
 0x14f   :  { %2162 = vmatpush2.bf16.msra.mxu0 %v6014_v20  ;;  %v6109_v20 = vld [vmem:[#allocation8 + $0x214] ss:$24 sps:$4 sm:$0xff]  }
 0x150   :  { %2163 = vmatprep.subr.bf16.mxu0 %v6022_v21  ;;  %v417_v21 = vlaneseq }
 0x151   :  { %2203 = vmatpush2.bf16.msra.mxu1 %v6017_v22  ;;  %v6092_v22 = vld [vmem:[#allocation5 + $0x820] ss:$24 sps:$4 sm:$0xff]  }
 0x152   :  { %2204 = vmatprep.subr.bf16.mxu1 %v6025_v23  ;;  %v6100_v23 = vld [vmem:[#allocation5 + $0x7f4] ss:$24 sps:$4 sm:$0xff]  }
 0x153   :  { %2164 = vmatpush2.bf16.msra.mxu0 %v6020_v24  ;;  %v6107_v24 = vld [vmem:[#allocation8 + $0x210] ss:$24 sps:$4 sm:$0xff]  }
 0x154   :  { %2215 = vmatprep.subr.bf16.mxu0 %v6028_v25  ;;  %v6115_v25 = vld [vmem:[#allocation8 + $0x1e4] ss:$24 sps:$4 sm:$0xff]  }
 0x155   :  { %2205 = vmatpush2.bf16.msra.mxu1 %v6023_v26  ;;  %v6834_v26 = vshrl.u32 %v417_v21, 7  ;;  %v6148_v21 = vld [vmem:[#allocation8 + $0x5d4] ss:$24 sps:$4 sm:$0xff]  }
 0x156   :  { %v6823_v33 = vpop.f32.mrf.mxu0  ;;  %2166 = vmatmul.mubr.bf16.vlgmr.msra.gmra.mxu0 %v6803_v7  ;;  %4028 = vmatprep.subr.bf16.mxu1 %v6037_v27  ;;  %v6040_v7 = vld [vmem:[#allocation5 + $0x6d4] ss:$24 sps:$4 sm:$0xff]   ;;  %v6098_v27 = vld [vmem:[#allocation5 + $0x7f0] ss:$24 sps:$4 sm:$0xff]  }
 0x157   :  { %2216 = vmatpush1.bf16.msra.mxu0 %v6026_v28  ;;  %2247 = vmatprep.mubr.bf16.mxu0 %v6810_v36  ;;  %v6829_v37 = vpop.f32.mrf.mxu1  ;;  %v6055_v36 = vld [vmem:[#allocation8 + $0xc4] ss:$24 sps:$4 sm:$0xff]  }
 0x158   :  { %v6827_v48 = vpop.f32.mrf.mxu0  ;;  %2207 = vmatmul.mubr.bf16.vlgmr.msra.gmra.mxu1 %v6805_v10  ;;  %2217 = vmatprep.subr.bf16.mxu0 %v6031_v29  ;;  %v6106_v28 = vld [vmem:[#allocation5 + $0x7c4] ss:$24 sps:$4 sm:$0xff]  }
 0x159   :  { %4029 = vmatpush1.bf16.msra.mxu1 %v6035_v30  ;;  %v6832_v40 = vpop.f32.mrf.mxu1  ;;  %v6113_v29 = vld [vmem:[#allocation8 + $0x1e0] ss:$24 sps:$4 sm:$0xff]  }
 0x15a   :  { %v1925_v52 = vpop.f32.mrf.mxu0  ;;  %4030 = vmatprep.subr.bf16.mxu1 %v6043_v31  ;;  %v6836_v30 = vld [vmem:[#allocation7] sm:$0x3f]  ;;  %v6118_v31 = vld [vmem:[#allocation8 + $0x1b4] ss:$24 sps:$4 sm:$0xff]  }
 0x15b   :  { %2218 = vmatpush1.bf16.msra.mxu0 %v6029_v32  ;;  %v1966_v43 = vpop.f32.mrf.mxu1  ;;  %v419_v32 = vsub.s32 0, %v6834_v26  ;;  %v6121_v52 = vld [vmem:[#allocation8 + $0x184] ss:$24 sps:$4 sm:$0xff]  }
 0x15c   :  { %v1926_v42 = vpop.f32.mrf.mxu0  ;;  %2219 = vmatprep.subr.bf16.mxu0 %v6034_v34  ;;  %v6104_v34 = vld [vmem:[#allocation5 + $0x7c0] ss:$24 sps:$4 sm:$0xff]  }
 0x15d   :  { %4031 = vmatpush1.bf16.msra.mxu1 %v6041_v35  ;;  %v1967_v10 = vpop.f32.mrf.mxu1  ;;  %v423_v35 = vsub.s32 1, %v6834_v26  ;;  %v6124_v43 = vld [vmem:[#allocation8 + $0x454] ss:$24 sps:$4 sm:$0xff]  }
 0x15e   :  { %4032 = vmatprep.subr.bf16.mxu1 %v6049_v38  ;;  %v6112_v38 = vld [vmem:[#allocation5 + $0x794] ss:$24 sps:$4 sm:$0xff]  }
 0x15f   :  { %2220 = vmatpush1.bf16.msra.mxu0 %v6032_v39  ;;  %v6116_v39 = vld [vmem:[#allocation8 + $0x1b0] ss:$24 sps:$4 sm:$0xff]   ;;  %v424_v42 = vrot.slane %v6836_v30, %v423_v35 }
 0x160   :  { %2221 = vmatprep.subr.bf16.mxu0 %v6040_v7  ;;  %v420_v7 = vrot.slane %v6836_v30, %v419_v32  ;;  %v6122_v10 = vld [vmem:[#allocation8 + $0x450] ss:$24 sps:$4 sm:$0xff]  }
 0x161   :  { %4033 = vmatpush1.bf16.msra.mxu1 %v6047_v41  ;;  %v6110_v41 = vld [vmem:[#allocation5 + $0x790] ss:$24 sps:$4 sm:$0xff]  }
 0x162   :  { %4034 = vmatprep.subr.bf16.mxu1 %v6055_v36  ;;  %v6119_v36 = vld [vmem:[#allocation8 + $0x180] ss:$24 sps:$4 sm:$0xff]  }
 0x163   :  { %2222 = vmatpush1.bf16.msra.mxu0 %v6038_v44  ;;  %v1922_v44 = vadd.f32 %v6823_v33, %v420_v7  ;;  %v6260_v7 = vld [vmem:[#allocation8 + $0x600] ss:$24 sps:$4 sm:$0xff]  }
 0x164   :  { %2223 = vmatprep.subr.bf16.mxu0 %v6046_v45  ;;  %v1924_v45 = vadd.f32 %v6827_v48, %v424_v42  ;;  %v6155_v42 = vld [vmem:[#allocation8 + $0x540] ss:$24 sps:$4 sm:$0xff]  }
 0x165   :  { %4035 = vmatpush1.bf16.msra.mxu1 %v6053_v46  ;;  %v6127_v46 = vld [vmem:[#allocation8 + $0x424] ss:$24 sps:$4 sm:$0xff]  }
 0x166   :  { %4036 = vmatprep.subr.bf16.mxu1 %v6061_v47  ;;  %v1963_v47 = vadd.f32 %v6829_v37, %v1922_v44  ;;  %v6274_v44 = vld [vmem:[#allocation8 + $0x8a4] ss:$24 sps:$4 sm:$0xff]  }
 0x167   :  { %2224 = vmatpush1.bf16.msra.mxu0 %v6044_v49  ;;  %v6125_v49 = vld [vmem:[#allocation8 + $0x420] ss:$24 sps:$4 sm:$0xff]  }
 0x168   :  { %2225 = vmatprep.subr.bf16.mxu0 %v6052_v50 }
 0x169   :  { %4037 = vmatpush1.bf16.msra.mxu1 %v6059_v51  ;;  %v1965_v51 = vadd.f32 %v6832_v40, %v1924_v45  ;;  %v6158_v45 = vld [vmem:[#allocation8 + $0x510] ss:$24 sps:$4 sm:$0xff]  }
 0x16a   :  { %4038 = vmatprep.subr.bf16.mxu1 %v6067_v53 }
 0x16b   :  { %2226 = vmatpush1.bf16.msra.mxu0 %v6050_v54  ;;  %v6130_v54 = vld [vmem:[#allocation8 + $0x3f4] ss:$24 sps:$4 sm:$0xff]  }
 0x16c   :  { %2227 = vmatprep.subr.bf16.mxu0 %v6058_v55 }
 0x16d   :  { %4039 = vmatpush1.bf16.msra.mxu1 %v6065_v56 }
 0x16e   :  { %4040 = vmatprep.subr.bf16.mxu1 %v6073_v57  ;;  %v6128_v57 = vld [vmem:[#allocation8 + $0x3f0] ss:$24 sps:$4 sm:$0xff]  }
 0x16f   :  { %2228 = vmatpush1.bf16.msra.mxu0 %v6056_v58 }
 0x170   :  { %2229 = vmatprep.subr.bf16.mxu0 %v6064_v59 }
 0x171   :  { %4041 = vmatpush1.bf16.msra.mxu1 %v6071_v60 }
 0x172   :  { %4042 = vmatprep.subr.bf16.mxu1 %v6079_v61 }
 0x173   :  { %2230 = vmatpush1.bf16.msra.mxu0 %v6062_v62  ;;  %v6131_v62 = vld [vmem:[#allocation8 + $0x3c0] ss:$24 sps:$4 sm:$0xff]  }
 0x174   :  { %2231 = vmatprep.subr.bf16.mxu0 %v6070_v63 }
 0x175   :  { %4043 = vmatpush1.bf16.msra.mxu1 %v6077_v0 }
 0x176   :  { %4044 = vmatprep.subr.bf16.mxu1 %v6085_v1  ;;  %v6220_v1 = vld [vmem:[#allocation8 + $0x754] ss:$24 sps:$4 sm:$0xff]  }
 0x177   :  { %2232 = vmatpush2.bf16.msra.mxu0 %v6068_v2  ;;  %v6218_v2 = vld [vmem:[#allocation8 + $0x750] ss:$24 sps:$4 sm:$0xff]  }
 0x178   :  { %2233 = vmatprep.subr.bf16.mxu0 %v6076_v3  ;;  %v6136_v3 = vld [vmem:[#allocation8 + $0x394] ss:$24 sps:$4 sm:$0xff]  }
 0x179   :  { %4045 = vmatpush2.bf16.msra.mxu1 %v6083_v4  ;;  %v6226_v4 = vld [vmem:[#allocation8 + $0x724] ss:$24 sps:$4 sm:$0xff]  }
 0x17a   :  { %4046 = vmatprep.subr.bf16.mxu1 %v6091_v5  ;;  %v6134_v5 = vld [vmem:[#allocation8 + $0x390] ss:$24 sps:$4 sm:$0xff]  }
 0x17b   :  { %2234 = vmatpush2.bf16.msra.mxu0 %v6074_v6  ;;  %v6139_v6 = vld [vmem:[#allocation8 + $0x364] ss:$24 sps:$4 sm:$0xff]  }
 0x17c   :  { %2235 = vmatprep.subr.bf16.mxu0 %v6082_v8  ;;  %v6224_v8 = vld [vmem:[#allocation8 + $0x720] ss:$24 sps:$4 sm:$0xff]  }
 0x17d   :  { %4047 = vmatpush2.bf16.msra.mxu1 %v6089_v9  ;;  %v6232_v9 = vld [vmem:[#allocation8 + $0x6f4] ss:$24 sps:$4 sm:$0xff]  }
 0x17e   :  { %4048 = vmatprep.subr.bf16.mxu1 %v6097_v11  ;;  %v6137_v11 = vld [vmem:[#allocation8 + $0x360] ss:$24 sps:$4 sm:$0xff]  }
 0x17f   :  { %2236 = vmatpush2.bf16.msra.mxu0 %v6080_v12  ;;  %v6142_v12 = vld [vmem:[#allocation8 + $0x334] ss:$24 sps:$4 sm:$0xff]  }
 0x180   :  { %2237 = vmatprep.subr.bf16.mxu0 %v6088_v13  ;;  %v6230_v13 = vld [vmem:[#allocation8 + $0x6f0] ss:$24 sps:$4 sm:$0xff]  }
 0x181   :  { %4049 = vmatpush2.bf16.msra.mxu1 %v6095_v14  ;;  %v6238_v14 = vld [vmem:[#allocation8 + $0x6c4] ss:$24 sps:$4 sm:$0xff]  }
 0x182   :  { %4050 = vmatprep.subr.bf16.mxu1 %v6103_v15  ;;  %v6140_v15 = vld [vmem:[#allocation8 + $0x330] ss:$24 sps:$4 sm:$0xff]  }
 0x183   :  { %2238 = vmatpush2.bf16.msra.mxu0 %v6086_v17  ;;  %v6145_v17 = vld [vmem:[#allocation8 + $0x304] ss:$24 sps:$4 sm:$0xff]  }
 0x184   :  { %2239 = vmatprep.subr.bf16.mxu0 %v6094_v18  ;;  %v6236_v18 = vld [vmem:[#allocation8 + $0x6c0] ss:$24 sps:$4 sm:$0xff]  }
 0x185   :  { %4051 = vmatpush2.bf16.msra.mxu1 %v6101_v19  ;;  %v6244_v19 = vld [vmem:[#allocation8 + $0x694] ss:$24 sps:$4 sm:$0xff]  }
 0x186   :  { %4052 = vmatprep.subr.bf16.mxu1 %v6109_v20  ;;  %v6143_v20 = vld [vmem:[#allocation8 + $0x300] ss:$24 sps:$4 sm:$0xff]  }
 0x187   :  { %2240 = vmatpush2.bf16.msra.mxu0 %v6092_v22  ;;  %v6242_v22 = vld [vmem:[#allocation8 + $0x690] ss:$24 sps:$4 sm:$0xff]  }
 0x188   :  { %2241 = vmatprep.subr.bf16.mxu0 %v6100_v23  ;;  %v6250_v23 = vld [vmem:[#allocation8 + $0x664] ss:$24 sps:$4 sm:$0xff]  }
 0x189   :  { %4053 = vmatpush2.bf16.msra.mxu1 %v6107_v24  ;;  %v6146_v24 = vld [vmem:[#allocation8 + $0x5d0] ss:$24 sps:$4 sm:$0xff]  }
 0x18a   :  { %4054 = vmatprep.subr.bf16.mxu1 %v6115_v25  ;;  %v6151_v25 = vld [vmem:[#allocation8 + $0x5a4] ss:$24 sps:$4 sm:$0xff]  }
 0x18b   :  { %2242 = vmatpush2.bf16.msra.mxu0 %v6098_v27  ;;  %v6248_v27 = vld [vmem:[#allocation8 + $0x660] ss:$24 sps:$4 sm:$0xff]  }
 0x18c   :  { %2243 = vmatprep.subr.bf16.mxu0 %v6106_v28  ;;  %v6256_v28 = vld [vmem:[#allocation8 + $0x634] ss:$24 sps:$4 sm:$0xff]  }
 0x18d   :  { %4055 = vmatpush2.bf16.msra.mxu1 %v6113_v29  ;;  %v6149_v29 = vld [vmem:[#allocation8 + $0x5a0] ss:$24 sps:$4 sm:$0xff]  }
 0x18e   :  { %4056 = vmatprep.subr.bf16.mxu1 %v6118_v31  ;;  %v6154_v31 = vld [vmem:[#allocation8 + $0x574] ss:$24 sps:$4 sm:$0xff]  }
 0x18f   :  { %2244 = vmatpush2.bf16.msra.mxu0 %v6104_v34  ;;  %v6254_v34 = vld [vmem:[#allocation8 + $0x630] ss:$24 sps:$4 sm:$0xff]  }
 0x190   :  { %2245 = vmatprep.subr.bf16.mxu0 %v6112_v38  ;;  %v6262_v38 = vld [vmem:[#allocation8 + $0x604] ss:$24 sps:$4 sm:$0xff]  }
 0x191   :  { %4057 = vmatpush2.bf16.msra.mxu1 %v6116_v39  ;;  %v6152_v39 = vld [vmem:[#allocation8 + $0x570] ss:$24 sps:$4 sm:$0xff]  }
 0x192   :  { %4058 = vmatprep.subr.bf16.mxu1 %v6121_v52  ;;  %v6157_v52 = vld [vmem:[#allocation8 + $0x544] ss:$24 sps:$4 sm:$0xff]  }
 0x193   :  { %2246 = vmatpush2.bf16.msra.mxu0 %v6110_v41  ;;  %v6268_v41 = vld [vmem:[#allocation8 + $0x8d4] ss:$24 sps:$4 sm:$0xff]  }
 0x194   :  { %4069 = vmatprep.subr.bf16.mxu0 %v6124_v43  ;;  %v6266_v43 = vld [vmem:[#allocation8 + $0x8d0] ss:$24 sps:$4 sm:$0xff]  }
 0x195   :  { %4059 = vmatpush2.bf16.msra.mxu1 %v6119_v36  ;;  %v6160_v36 = vld [vmem:[#allocation8 + $0x514] ss:$24 sps:$4 sm:$0xff]  }
 0x196   :  { %v2003_v50 = vpop.f32.mrf.mxu0  ;;  %2248 = vmatmul.mubr.bf16.vlgmr.msra.gmra.mxu0 %v6813_v16  ;;  %v6133_v16 = vld [vmem:[#allocation8 + $0x3c4] ss:$24 sps:$4 sm:$0xff]   ;;  %4110 = vmatprep.subr.bf16.mxu1 %v6220_v1 }
 0x197   :  { %v2004_v53 = vadd.f32 %v2003_v50, %v1963_v47  ;;  %4070 = vmatpush1.bf16.msra.mxu0 %v6122_v10  ;;  %v6272_v10 = vld [vmem:[#allocation8 + $0x8a0] ss:$24 sps:$4 sm:$0xff]   ;;  %v6280_v47 = vld [vmem:[#allocation8 + $0x874] ss:$24 sps:$4 sm:$0xff]   ;;  %v6278_v50 = vld [vmem:[#allocation8 + $0x870] ss:$24 sps:$4 sm:$0xff]  }
 0x198   :  { %v2005_v33 = vpop.f32.mrf.mxu0  ;;  %4071 = vmatprep.subr.bf16.mxu0 %v6127_v46  ;;  %v6851_v55 = vpop.f32.mrf.mxu1  ;;  %v6163_v46 = vld [vmem:[#allocation8 + $0x4e4] ss:$24 sps:$4 sm:$0xff]  }
 0x199   :  { %v2256_v48 = vmax.f32 %v2004_v53, 0.0  ;;  %v2006_v56 = vadd.f32 %v2005_v33, %v1965_v51  ;;  %v6166_v51 = vld [vmem:[#allocation8 + $0x4b4] ss:$24 sps:$4 sm:$0xff]   ;;  %v6286_v53 = vld [vmem:[#allocation8 + $0x844] ss:$24 sps:$4 sm:$0xff]   ;;  %v427_v33 = vsub.s32 2, %v6834_v26 }
 0x19a   :  { %v2007_v58 = vpop.f32.mrf.mxu0  ;;  %v6853_v59 = vpop.f32.mrf.mxu1 }
 0x19b   :  { %v2257_v37 = vmax.f32 %v2006_v56, 0.0  ;;  %4072 = vmatpush1.bf16.msra.mxu0 %v6125_v49  ;;  %v6857_v63 = vpack.c.bf16 %v2256_v48, %v2256_v48  ;;  %v6161_v49 = vld [vmem:[#allocation8 + $0x4e0] ss:$24 sps:$4 sm:$0xff]   ;;  %v6169_v56 = vld [vmem:[#allocation8 + $0x484] ss:$24 sps:$4 sm:$0xff]  }
 0x19c   :  { %v2008_v60 = vpop.f32.mrf.mxu0  ;;  %4073 = vmatprep.subr.bf16.mxu0 %v6130_v54  ;;  %v2048_v61 = vpop.f32.mrf.mxu1  ;;  %v6164_v54 = vld [vmem:[#allocation8 + $0x4b0] ss:$24 sps:$4 sm:$0xff]   ;;  %v6284_v48 = vld [vmem:[#allocation8 + $0x840] ss:$24 sps:$4 sm:$0xff]   ;;  %v6292_v58 = vld [vmem:[#allocation8 + $0x814] ss:$24 sps:$4 sm:$0xff]  }
 0x19d   :  { %v6855_v40 = vpack.c.bf16 %v2257_v37, %v2257_v37  ;;  %v428_v37 = vrot.slane %v6836_v30, %v427_v33  ;;  %v6167_v60 = vld [vmem:[#allocation8 + $0x480] ss:$24 sps:$4 sm:$0xff]   ;;  %v6172_v61 = vld [vmem:[#allocation8 + $0x15c] ss:$24 sps:$4 sm:$0xff]  }
 0x19e   :  { %v2049_v0 = vpop.f32.mrf.mxu1 }
 0x19f   :  { %4060 = vmatprep.mubr.bf16.mxu1 %v6855_v40  ;;  %4074 = vmatpush1.bf16.msra.mxu0 %v6128_v57  ;;  %v431_v57 = vsub.s32 3, %v6834_v26  ;;  %v6298_v0 = vld [vmem:[#allocation8 + $0x7e4] ss:$24 sps:$4 sm:$0xff]   ;;  %v2045_v1 = vadd.f32 %v6851_v55, %v428_v37  ;;  %v6209_v37 = vld [vmem:[#allocation8 + $0x1e8] ss:$24 sps:$4 sm:$0xff]  }
 0x1a0   :  { %4061 = vmatmul.mubr.bf16.vlgmr.msra.gmra.mxu1 %v6857_v63  ;;  %4075 = vmatprep.subr.bf16.mxu0 %v6133_v16  ;;  %v6290_v16 = vld [vmem:[#allocation8 + $0x810] ss:$24 sps:$4 sm:$0xff]   ;;  %v6310_v55 = vld [vmem:[#allocation8 + $0x784] ss:$24 sps:$4 sm:$0xff]  }
 0x1a1   :  { %4111 = vmatpush1.bf16.msra.mxu1 %v6218_v2  ;;  %v6296_v2 = vld [vmem:[#allocation8 + $0x7e0] ss:$24 sps:$4 sm:$0xff]  }
 0x1a2   :  { %4112 = vmatprep.subr.bf16.mxu1 %v6226_v4 }
 0x1a3   :  { %4076 = vmatpush1.bf16.msra.mxu0 %v6131_v62  ;;  %v432_v62 = vrot.slane %v6836_v30, %v431_v57 }
 0x1a4   :  { %4077 = vmatprep.subr.bf16.mxu0 %v6136_v3 }
 0x1a5   :  { %4113 = vmatpush1.bf16.msra.mxu1 %v6224_v8  ;;  %v2047_v3 = vadd.f32 %v6853_v59, %v432_v62  ;;  %v6302_v8 = vld [vmem:[#allocation8 + $0x7b0] ss:$24 sps:$4 sm:$0xff]  }
 0x1a6   :  { %4114 = vmatprep.subr.bf16.mxu1 %v6232_v9 }
 0x1a7   :  { %4078 = vmatpush1.bf16.msra.mxu0 %v6134_v5  ;;  %v6304_v5 = vld [vmem:[#allocation8 + $0x7b4] ss:$24 sps:$4 sm:$0xff]  }
 0x1a8   :  { %4079 = vmatprep.subr.bf16.mxu0 %v6139_v6 }
 0x1a9   :  { %4115 = vmatpush1.bf16.msra.mxu1 %v6230_v13 }
 0x1aa   :  { %4116 = vmatprep.subr.bf16.mxu1 %v6238_v14 }
 0x1ab   :  { %4080 = vmatpush1.bf16.msra.mxu0 %v6137_v11 }
 0x1ac   :  { %4081 = vmatprep.subr.bf16.mxu0 %v6142_v12 }
 0x1ad   :  { %4117 = vmatpush1.bf16.msra.mxu1 %v6236_v18  ;;  %v6308_v18 = vld [vmem:[#allocation8 + $0x780] ss:$24 sps:$4 sm:$0xff]  }
 0x1ae   :  { %4118 = vmatprep.subr.bf16.mxu1 %v6244_v19 }
 0x1af   :  { %4082 = vmatpush1.bf16.msra.mxu0 %v6140_v15 }
 0x1b0   :  { %4083 = vmatprep.subr.bf16.mxu0 %v6145_v17 }
 0x1b1   :  { %4119 = vmatpush1.bf16.msra.mxu1 %v6242_v22 }
 0x1b2   :  { %4120 = vmatprep.subr.bf16.mxu1 %v6250_v23  ;;  %v6316_v23 = vld [vmem:[#allocation8 + $0x45c] ss:$24 sps:$4 sm:$0xff]  }
 0x1b3   :  { %4084 = vmatpush1.bf16.msra.mxu0 %v6143_v20 }
 0x1b4   :  { %4085 = vmatprep.subr.bf16.mxu0 %v6148_v21 }
 0x1b5   :  { %4121 = vmatpush1.bf16.msra.mxu1 %v6248_v27 }
 0x1b6   :  { %4122 = vmatprep.subr.bf16.mxu1 %v6256_v28  ;;  %v6175_v28 = vld [vmem:[#allocation8 + $0x12c] ss:$24 sps:$4 sm:$0xff]  }
 0x1b7   :  { %4086 = vmatpush2.bf16.msra.mxu0 %v6146_v24 }
 0x1b8   :  { %4087 = vmatprep.subr.bf16.mxu0 %v6151_v25  ;;  %v6170_v25 = vld [vmem:[#allocation8 + $0x158] ss:$24 sps:$4 sm:$0xff]  }
 0x1b9   :  { %4123 = vmatpush1.bf16.msra.mxu1 %v6254_v34  ;;  %v6176_v34 = vld [vmem:[#allocation8 + $0xf8] ss:$24 sps:$4 sm:$0xff]  }
 0x1ba   :  { %4124 = vmatprep.subr.bf16.mxu1 %v6262_v38  ;;  %v6181_v38 = vld [vmem:[#allocation8 + $0xcc] ss:$24 sps:$4 sm:$0xff]  }
 0x1bb   :  { %4088 = vmatpush2.bf16.msra.mxu0 %v6149_v29  ;;  %v6173_v29 = vld [vmem:[#allocation8 + $0x128] ss:$24 sps:$4 sm:$0xff]  }
 0x1bc   :  { %4089 = vmatprep.subr.bf16.mxu0 %v6154_v31  ;;  %v6178_v31 = vld [vmem:[#allocation8 + $0xfc] ss:$24 sps:$4 sm:$0xff]  }
 0x1bd   :  { %4125 = vmatpush1.bf16.msra.mxu1 %v6260_v7  ;;  %v6182_v7 = vld [vmem:[#allocation8 + $0x98] ss:$24 sps:$4 sm:$0xff]  }
 0x1be   :  { %4126 = vmatprep.subr.bf16.mxu1 %v6268_v41  ;;  %v6187_v41 = vld [vmem:[#allocation8 + $0x6c] ss:$24 sps:$4 sm:$0xff]  }
 0x1bf   :  { %4090 = vmatpush2.bf16.msra.mxu0 %v6152_v39  ;;  %v6179_v39 = vld [vmem:[#allocation8 + $0xc8] ss:$24 sps:$4 sm:$0xff]  }
 0x1c0   :  { %4091 = vmatprep.subr.bf16.mxu0 %v6157_v52  ;;  %v6184_v52 = vld [vmem:[#allocation8 + $0x9c] ss:$24 sps:$4 sm:$0xff]  }
 0x1c1   :  { %4127 = vmatpush2.bf16.msra.mxu1 %v6266_v43  ;;  %v6188_v43 = vld [vmem:[#allocation8 + $0x38] ss:$24 sps:$4 sm:$0xff]  }
 0x1c2   :  { %4128 = vmatprep.subr.bf16.mxu1 %v6274_v44  ;;  %v6193_v44 = vld [vmem:[#allocation8 + $0xc] ss:$24 sps:$4 sm:$0xff]  }
 0x1c3   :  { %4092 = vmatpush2.bf16.msra.mxu0 %v6155_v42  ;;  %v6185_v42 = vld [vmem:[#allocation8 + $0x68] ss:$24 sps:$4 sm:$0xff]  }
 0x1c4   :  { %4093 = vmatprep.subr.bf16.mxu0 %v6160_v36  ;;  %v6190_v36 = vld [vmem:[#allocation8 + $0x3c] ss:$24 sps:$4 sm:$0xff]  }
 0x1c5   :  { %4129 = vmatpush2.bf16.msra.mxu1 %v6272_v10  ;;  %v6196_v10 = vld [vmem:[#allocation8 + $0x2dc] ss:$24 sps:$4 sm:$0xff]  }
 0x1c6   :  { %4130 = vmatprep.subr.bf16.mxu1 %v6280_v47  ;;  %v6199_v47 = vld [vmem:[#allocation8 + $0x2ac] ss:$24 sps:$4 sm:$0xff]  }
 0x1c7   :  { %4094 = vmatpush2.bf16.msra.mxu0 %v6158_v45  ;;  %v6191_v45 = vld [vmem:[#allocation8 + $0x8] ss:$24 sps:$4 sm:$0xff]  }
 0x1c8   :  { %4095 = vmatprep.subr.bf16.mxu0 %v6163_v46  ;;  %v6194_v46 = vld [vmem:[#allocation8 + $0x2d8] ss:$24 sps:$4 sm:$0xff]  }
 0x1c9   :  { %4131 = vmatpush2.bf16.msra.mxu1 %v6278_v50  ;;  %v6202_v50 = vld [vmem:[#allocation8 + $0x27c] ss:$24 sps:$4 sm:$0xff]  }
 0x1ca   :  { %4132 = vmatprep.subr.bf16.mxu1 %v6286_v53  ;;  %v6205_v53 = vld [vmem:[#allocation8 + $0x24c] ss:$24 sps:$4 sm:$0xff]  }
 0x1cb   :  { %4096 = vmatpush2.bf16.msra.mxu0 %v6161_v49  ;;  %v6197_v49 = vld [vmem:[#allocation8 + $0x2a8] ss:$24 sps:$4 sm:$0xff]  }
 0x1cc   :  { %4097 = vmatprep.subr.bf16.mxu0 %v6166_v51  ;;  %v6200_v51 = vld [vmem:[#allocation8 + $0x278] ss:$24 sps:$4 sm:$0xff]  }
 0x1cd   :  { %4133 = vmatpush2.bf16.msra.mxu1 %v6284_v48  ;;  %v6208_v48 = vld [vmem:[#allocation8 + $0x21c] ss:$24 sps:$4 sm:$0xff]  }
 0x1ce   :  { %4134 = vmatprep.subr.bf16.mxu1 %v6292_v58  ;;  %v6211_v58 = vld [vmem:[#allocation8 + $0x1ec] ss:$24 sps:$4 sm:$0xff]  }
 0x1cf   :  { %4098 = vmatpush2.bf16.msra.mxu0 %v6164_v54  ;;  %v6203_v54 = vld [vmem:[#allocation8 + $0x248] ss:$24 sps:$4 sm:$0xff]  }
 0x1d0   :  { %4099 = vmatprep.subr.bf16.mxu0 %v6169_v56  ;;  %v6206_v56 = vld [vmem:[#allocation8 + $0x218] ss:$24 sps:$4 sm:$0xff]  }
 0x1d1   :  { %4135 = vmatpush2.bf16.msra.mxu1 %v6290_v16 }
 0x1d2   :  { %4136 = vmatprep.subr.bf16.mxu1 %v6298_v0 }
 0x1d3   :  { %4100 = vmatpush2.bf16.msra.mxu0 %v6167_v60  ;;  %v6214_v60 = vld [vmem:[#allocation8 + $0x1bc] ss:$24 sps:$4 sm:$0xff]  }
 0x1d4   :  { %4151 = vmatprep.subr.bf16.mxu0 %v6172_v61  ;;  %v6212_v61 = vld [vmem:[#allocation8 + $0x1b8] ss:$24 sps:$4 sm:$0xff]  }
 0x1d5   :  { %4137 = vmatpush2.bf16.msra.mxu1 %v6296_v2 }
 0x1d6   :  { %v2085_v4 = vpop.f32.mrf.mxu0  ;;  %4138 = vmatprep.subr.bf16.mxu1 %v6304_v5 }
 0x1d7   :  { %v2086_v6 = vadd.f32 %v2085_v4, %v2045_v1  ;;  %v6217_v1 = vld [vmem:[#allocation8 + $0x18c] ss:$24 sps:$4 sm:$0xff]   ;;  %v6215_v4 = vld [vmem:[#allocation8 + $0x188] ss:$24 sps:$4 sm:$0xff]  }
 0x1d8   :  { %v2087_v9 = vpop.f32.mrf.mxu0  ;;  %v2126_v11 = vpop.f32.mrf.mxu1 }
 0x1d9   :  { %v2088_v12 = vadd.f32 %v2087_v9, %v2047_v3  ;;  %v2127_v13 = vadd.f32 %v2126_v11, %v2086_v6  ;;  %4139 = vmatpush2.bf16.msra.mxu1 %v6302_v8  ;;  %v6223_v6 = vld [vmem:[#allocation8 + $0x75c] ss:$24 sps:$4 sm:$0xff]   ;;  %v6221_v11 = vld [vmem:[#allocation8 + $0x758] ss:$24 sps:$4 sm:$0xff]  }
 0x1da   :  { %v2089_v14 = vpop.f32.mrf.mxu0  ;;  %v2128_v15 = vpop.f32.mrf.mxu1  ;;  %4140 = vmatprep.subr.bf16.mxu1 %v6310_v55  ;;  %v6241_v55 = vld [vmem:[#allocation8 + $0x6cc] ss:$24 sps:$4 sm:$0xff]  }
 0x1db   :  { %v2129_v17 = vadd.f32 %v2128_v15, %v2088_v12  ;;  %v2258_v19 = vmax.f32 %v2127_v13, 0.0  ;;  %v6229_v12 = vld [vmem:[#allocation8 + $0x72c] ss:$24 sps:$4 sm:$0xff]   ;;  %v6227_v13 = vld [vmem:[#allocation8 + $0x728] ss:$24 sps:$4 sm:$0xff]  }
 0x1dc   :  { %v2090_v20 = vpop.f32.mrf.mxu0  ;;  %v2130_v21 = vpop.f32.mrf.mxu1  ;;  %v6235_v14 = vld [vmem:[#allocation8 + $0x6fc] ss:$24 sps:$4 sm:$0xff]   ;;  %v6233_v15 = vld [vmem:[#allocation8 + $0x6f8] ss:$24 sps:$4 sm:$0xff]  }
 0x1dd   :  { %v2259_v59 = vmax.f32 %v2129_v17, 0.0  ;;  %4141 = vmatpush2.bf16.msra.mxu1 %v6308_v18  ;;  %v6873_v27 = vpack.c.bf16 %v2258_v19, %v2258_v19  ;;  %v6239_v17 = vld [vmem:[#allocation8 + $0x6c8] ss:$24 sps:$4 sm:$0xff]   ;;  %v6247_v18 = vld [vmem:[#allocation8 + $0x69c] ss:$24 sps:$4 sm:$0xff]  }
 0x1de   :  { %v2131_v22 = vpop.f32.mrf.mxu1  ;;  %4192 = vmatprep.subr.bf16.mxu1 %v6316_v23  ;;  %v6245_v19 = vld [vmem:[#allocation8 + $0x698] ss:$24 sps:$4 sm:$0xff]   ;;  %v6253_v20 = vld [vmem:[#allocation8 + $0x66c] ss:$24 sps:$4 sm:$0xff]   ;;  %v6251_v21 = vld [vmem:[#allocation8 + $0x668] ss:$24 sps:$4 sm:$0xff]  }
 0x1df   :  { %v6871_v24 = vpack.c.bf16 %v2259_v59, %v2259_v59  ;;  %v6259_v59 = vld [vmem:[#allocation8 + $0x63c] ss:$24 sps:$4 sm:$0xff]   ;;  %v6257_v22 = vld [vmem:[#allocation8 + $0x638] ss:$24 sps:$4 sm:$0xff]   ;;  %v6265_v23 = vld [vmem:[#allocation8 + $0x60c] ss:$24 sps:$4 sm:$0xff]  }
 0x1e1   :  { %4101 = vmatprep.mubr.bf16.mxu0 %v6871_v24 }
 0x1e2   :  { %4102 = vmatmul.mubr.bf16.vlgmr.msra.gmra.mxu0 %v6873_v27 }
 0x1e3   :  { %4152 = vmatpush1.bf16.msra.mxu0 %v6170_v25  ;;  %4183 = vmatprep.mubr.bf16.mxu0 %v6855_v40  ;;  %v6263_v25 = vld [vmem:[#allocation8 + $0x608] ss:$24 sps:$4 sm:$0xff]  }
 0x1e4   :  { %4153 = vmatprep.subr.bf16.mxu0 %v6175_v28  ;;  %v6271_v28 = vld [vmem:[#allocation8 + $0x8dc] ss:$24 sps:$4 sm:$0xff]  }
 0x1e7   :  { %4154 = vmatpush1.bf16.msra.mxu0 %v6173_v29  ;;  %v6269_v29 = vld [vmem:[#allocation8 + $0x8d8] ss:$24 sps:$4 sm:$0xff]  }
 0x1e8   :  { %4155 = vmatprep.subr.bf16.mxu0 %v6178_v31  ;;  %v6277_v31 = vld [vmem:[#allocation8 + $0x8ac] ss:$24 sps:$4 sm:$0xff]  }
 0x1eb   :  { %4156 = vmatpush1.bf16.msra.mxu0 %v6176_v34  ;;  %v6275_v34 = vld [vmem:[#allocation8 + $0x8a8] ss:$24 sps:$4 sm:$0xff]  }
 0x1ec   :  { %4157 = vmatprep.subr.bf16.mxu0 %v6181_v38  ;;  %v6283_v38 = vld [vmem:[#allocation8 + $0x87c] ss:$24 sps:$4 sm:$0xff]  }
 0x1ef   :  { %4158 = vmatpush1.bf16.msra.mxu0 %v6179_v39  ;;  %v6281_v39 = vld [vmem:[#allocation8 + $0x878] ss:$24 sps:$4 sm:$0xff]  }
 0x1f0   :  { %4159 = vmatprep.subr.bf16.mxu0 %v6184_v52  ;;  %v6289_v52 = vld [vmem:[#allocation8 + $0x84c] ss:$24 sps:$4 sm:$0xff]  }
 0x1f3   :  { %4160 = vmatpush1.bf16.msra.mxu0 %v6182_v7  ;;  %v435_v7 = vsub.s32 4, %v6834_v26 }
 0x1f4   :  { %4161 = vmatprep.subr.bf16.mxu0 %v6187_v41  ;;  %v439_v41 = vsub.s32 5, %v6834_v26 }
 0x1f7   :  { %4162 = vmatpush1.bf16.msra.mxu0 %v6185_v42  ;;  %v6287_v42 = vld [vmem:[#allocation8 + $0x848] ss:$24 sps:$4 sm:$0xff]  }
 0x1f8   :  { %4163 = vmatprep.subr.bf16.mxu0 %v6190_v36  ;;  %v6295_v36 = vld [vmem:[#allocation8 + $0x81c] ss:$24 sps:$4 sm:$0xff]  }
 0x1fb   :  { %4164 = vmatpush1.bf16.msra.mxu0 %v6188_v43  ;;  %v436_v43 = vrot.slane %v6836_v30, %v435_v7 }
 0x1fc   :  { %4165 = vmatprep.subr.bf16.mxu0 %v6193_v44  ;;  %v440_v44 = vrot.slane %v6836_v30, %v439_v41  ;;  %v6305_v30 = vld [vmem:[#allocation8 + $0x7b8] ss:$24 sps:$4 sm:$0xff]  }
 0x1ff   :  { %4166 = vmatpush1.bf16.msra.mxu0 %v6191_v45  ;;  %v6293_v45 = vld [vmem:[#allocation8 + $0x818] ss:$24 sps:$4 sm:$0xff]  }
 0x200   :  { %4167 = vmatprep.subr.bf16.mxu0 %v6196_v10  ;;  %v6301_v10 = vld [vmem:[#allocation8 + $0x7ec] ss:$24 sps:$4 sm:$0xff]  }
 0x203   :  { %4168 = vmatpush2.bf16.msra.mxu0 %v6194_v46 }
 0x204   :  { %4169 = vmatprep.subr.bf16.mxu0 %v6199_v47 }
 0x207   :  { %4170 = vmatpush2.bf16.msra.mxu0 %v6197_v49  ;;  %v6299_v49 = vld [vmem:[#allocation8 + $0x7e8] ss:$24 sps:$4 sm:$0xff]  }
 0x208   :  { %4171 = vmatprep.subr.bf16.mxu0 %v6202_v50  ;;  %v6307_v50 = vld [vmem:[#allocation8 + $0x7bc] ss:$24 sps:$4 sm:$0xff]  }
 0x20b   :  { %4172 = vmatpush2.bf16.msra.mxu0 %v6200_v51 }
 0x20c   :  { %4173 = vmatprep.subr.bf16.mxu0 %v6205_v53 }
 0x20f   :  { %4174 = vmatpush2.bf16.msra.mxu0 %v6203_v54 }
 0x210   :  { %4175 = vmatprep.subr.bf16.mxu0 %v6208_v48 }
 0x213   :  { %4176 = vmatpush2.bf16.msra.mxu0 %v6206_v56 }
 0x214   :  { %4177 = vmatprep.subr.bf16.mxu0 %v6211_v58  ;;  %v6313_v58 = vld [vmem:[#allocation8 + $0x78c] ss:$24 sps:$4 sm:$0xff]  }
 0x216   :  { %v6878_v16 = vpop.f32.mrf.mxu0 }
 0x217   :  { %4178 = vmatpush2.bf16.msra.mxu0 %v6209_v37  ;;  %v2168_v46 = vadd.f32 %v6878_v16, %v436_v43  ;;  %v6353_v43 = vld [vmem:[#allocation8 + $0x340] ss:$24 sps:$4 sm:$0xff]  }
 0x218   :  { %v6880_v62 = vpop.f32.mrf.mxu0  ;;  %v6882_v0 = vpop.f32.mrf.mxu1  ;;  %4179 = vmatprep.subr.bf16.mxu0 %v6214_v60 }
 0x219   :  { %v2170_v47 = vadd.f32 %v6880_v62, %v440_v44  ;;  %v2209_v51 = vadd.f32 %v6882_v0, %v2168_v46  ;;  %v6311_v62 = vld [vmem:[#allocation8 + $0x788] ss:$24 sps:$4 sm:$0xff]   ;;  %v6314_v0 = vld [vmem:[#allocation8 + $0x458] ss:$24 sps:$4 sm:$0xff]   ;;  %v6361_v44 = vld [vmem:[#allocation8 + $0x314] ss:$24 sps:$4 sm:$0xff]  }
 0x21a   :  { %v2171_v2 = vpop.f32.mrf.mxu0  ;;  %v6884_v3 = vpop.f32.mrf.mxu1  ;;  %v6359_v46 = vld [vmem:[#allocation8 + $0x310] ss:$24 sps:$4 sm:$0xff]  }
 0x21b   :  { %4180 = vmatpush2.bf16.msra.mxu0 %v6212_v61  ;;  %v2211_v54 = vadd.f32 %v6884_v3, %v2170_v47  ;;  %v6319_v3 = vld [vmem:[#allocation8 + $0x464] ss:$24 sps:$4 sm:$0xff]  }
 0x21c   :  { %v2172_v5 = vpop.f32.mrf.mxu0  ;;  %4181 = vmatprep.subr.bf16.mxu0 %v6217_v1  ;;  %v2212_v8 = vpop.f32.mrf.mxu1  ;;  %v6367_v47 = vld [vmem:[#allocation8 + $0x5e4] ss:$24 sps:$4 sm:$0xff]  }
 0x21d   :  { %v6317_v5 = vld [vmem:[#allocation8 + $0x460] ss:$24 sps:$4 sm:$0xff]   ;;  %v6322_v8 = vld [vmem:[#allocation8 + $0x42c] ss:$24 sps:$4 sm:$0xff]  }
 0x21e   :  { %v2213_v9 = vpop.f32.mrf.mxu1 }
 0x21f   :  { %4182 = vmatpush2.bf16.msra.mxu0 %v6215_v4  ;;  %v6325_v9 = vld [vmem:[#allocation8 + $0x434] ss:$24 sps:$4 sm:$0xff]  }
 0x220   :  { %4233 = vmatprep.subr.bf16.mxu0 %v6223_v6 }
 0x222   :  { %4184 = vmatmul.mubr.bf16.vlgmr.msra.gmra.mxu0 %v6857_v63 }
 0x223   :  { %4234 = vmatpush1.bf16.msra.mxu0 %v6221_v11  ;;  %v6320_v11 = vld [vmem:[#allocation8 + $0x428] ss:$24 sps:$4 sm:$0xff]  }
 0x224   :  { %4235 = vmatprep.subr.bf16.mxu0 %v6229_v12 }
 0x227   :  { %4236 = vmatpush1.bf16.msra.mxu0 %v6227_v13  ;;  %v6328_v13 = vld [vmem:[#allocation8 + $0x3fc] ss:$24 sps:$4 sm:$0xff]  }
 0x228   :  { %4237 = vmatprep.subr.bf16.mxu0 %v6235_v14  ;;  %v6323_v14 = vld [vmem:[#allocation8 + $0x430] ss:$24 sps:$4 sm:$0xff]  }
 0x22b   :  { %4238 = vmatpush1.bf16.msra.mxu0 %v6233_v15 }
 0x22c   :  { %4239 = vmatprep.subr.bf16.mxu0 %v6241_v55  ;;  %v6331_v55 = vld [vmem:[#allocation8 + $0x404] ss:$24 sps:$4 sm:$0xff]  }
 0x22f   :  { %4240 = vmatpush1.bf16.msra.mxu0 %v6239_v17  ;;  %v6326_v17 = vld [vmem:[#allocation8 + $0x3f8] ss:$24 sps:$4 sm:$0xff]  }
 0x230   :  { %4241 = vmatprep.subr.bf16.mxu0 %v6247_v18 }
 0x233   :  { %4242 = vmatpush1.bf16.msra.mxu0 %v6245_v19  ;;  %v6334_v19 = vld [vmem:[#allocation8 + $0x3cc] ss:$24 sps:$4 sm:$0xff]  }
 0x234   :  { %4243 = vmatprep.subr.bf16.mxu0 %v6253_v20  ;;  %v6329_v20 = vld [vmem:[#allocation8 + $0x400] ss:$24 sps:$4 sm:$0xff]  }
 0x237   :  { %4244 = vmatpush1.bf16.msra.mxu0 %v6251_v21  ;;  %v6337_v21 = vld [vmem:[#allocation8 + $0x3d4] ss:$24 sps:$4 sm:$0xff]  }
 0x238   :  { %4245 = vmatprep.subr.bf16.mxu0 %v6259_v59  ;;  %v6332_v59 = vld [vmem:[#allocation8 + $0x3c8] ss:$24 sps:$4 sm:$0xff]  }
 0x23b   :  { %4246 = vmatpush1.bf16.msra.mxu0 %v6257_v22  ;;  %v6340_v22 = vld [vmem:[#allocation8 + $0x39c] ss:$24 sps:$4 sm:$0xff]  }
 0x23c   :  { %4247 = vmatprep.subr.bf16.mxu0 %v6265_v23  ;;  %v6343_v23 = vld [vmem:[#allocation8 + $0x3a4] ss:$24 sps:$4 sm:$0xff]  }
 0x23f   :  { %4248 = vmatpush1.bf16.msra.mxu0 %v6263_v25  ;;  %v6338_v25 = vld [vmem:[#allocation8 + $0x398] ss:$24 sps:$4 sm:$0xff]  }
 0x240   :  { %4249 = vmatprep.subr.bf16.mxu0 %v6271_v28  ;;  %v6346_v28 = vld [vmem:[#allocation8 + $0x36c] ss:$24 sps:$4 sm:$0xff]  }
 0x243   :  { %4250 = vmatpush2.bf16.msra.mxu0 %v6269_v29  ;;  %v6341_v29 = vld [vmem:[#allocation8 + $0x3a0] ss:$24 sps:$4 sm:$0xff]  }
 0x244   :  { %4251 = vmatprep.subr.bf16.mxu0 %v6277_v31  ;;  %v6349_v31 = vld [vmem:[#allocation8 + $0x374] ss:$24 sps:$4 sm:$0xff]  }
 0x247   :  { %4252 = vmatpush2.bf16.msra.mxu0 %v6275_v34  ;;  %v6344_v34 = vld [vmem:[#allocation8 + $0x368] ss:$24 sps:$4 sm:$0xff]  }
 0x248   :  { %4253 = vmatprep.subr.bf16.mxu0 %v6283_v38  ;;  %v6352_v38 = vld [vmem:[#allocation8 + $0x33c] ss:$24 sps:$4 sm:$0xff]  }
 0x24b   :  { %4254 = vmatpush2.bf16.msra.mxu0 %v6281_v39  ;;  %v6347_v39 = vld [vmem:[#allocation8 + $0x370] ss:$24 sps:$4 sm:$0xff]  }
 0x24c   :  { %4255 = vmatprep.subr.bf16.mxu0 %v6289_v52  ;;  %v6355_v52 = vld [vmem:[#allocation8 + $0x344] ss:$24 sps:$4 sm:$0xff]  }
 0x24f   :  { %4256 = vmatpush2.bf16.msra.mxu0 %v6287_v42  ;;  %v6350_v42 = vld [vmem:[#allocation8 + $0x338] ss:$24 sps:$4 sm:$0xff]  }
 0x250   :  { %4257 = vmatprep.subr.bf16.mxu0 %v6295_v36  ;;  %v6358_v36 = vld [vmem:[#allocation8 + $0x30c] ss:$24 sps:$4 sm:$0xff]  }
 0x253   :  { %4258 = vmatpush2.bf16.msra.mxu0 %v6293_v45  ;;  %v6356_v45 = vld [vmem:[#allocation8 + $0x308] ss:$24 sps:$4 sm:$0xff]  }
 0x254   :  { %4259 = vmatprep.subr.bf16.mxu0 %v6301_v10  ;;  %v6364_v10 = vld [vmem:[#allocation8 + $0x5dc] ss:$24 sps:$4 sm:$0xff]  }
 0x256   :  { %v2249_v53 = vpop.f32.mrf.mxu0 }
 0x257   :  { %v2250_v48 = vadd.f32 %v2249_v53, %v2209_v51  ;;  %4260 = vmatpush2.bf16.msra.mxu0 %v6299_v49  ;;  %v6362_v49 = vld [vmem:[#allocation8 + $0x5d8] ss:$24 sps:$4 sm:$0xff]   ;;  %v6373_v53 = vld [vmem:[#allocation8 + $0x5b4] ss:$24 sps:$4 sm:$0xff]  }
 0x258   :  { %v2251_v56 = vpop.f32.mrf.mxu0  ;;  %4261 = vmatprep.subr.bf16.mxu0 %v6307_v50  ;;  %v6370_v50 = vld [vmem:[#allocation8 + $0x5ac] ss:$24 sps:$4 sm:$0xff]   ;;  %v6365_v51 = vld [vmem:[#allocation8 + $0x5e0] ss:$24 sps:$4 sm:$0xff]  }
 0x259   :  { %v2252_v37 = vadd.f32 %v2251_v56, %v2211_v54  ;;  %v2260_v60 = vmax.f32 %v2250_v48, 0.0  ;;  %v6368_v54 = vld [vmem:[#allocation8 + $0x5a8] ss:$24 sps:$4 sm:$0xff]   ;;  %v6376_v48 = vld [vmem:[#allocation8 + $0x57c] ss:$24 sps:$4 sm:$0xff]  }
 0x25a   :  { %v2253_v16 = vpop.f32.mrf.mxu0  ;;  %v6379_v56 = vld [vmem:[#allocation8 + $0x584] ss:$24 sps:$4 sm:$0xff]  }
 0x25b   :  { %v2261_v61 = vmax.f32 %v2252_v37, 0.0  ;;  %4262 = vmatpush2.bf16.msra.mxu0 %v6305_v30  ;;  %v6901_v4 = vpack.c.bf16 %v2260_v60, %v2260_v60  ;;  %v6371_v30 = vld [vmem:[#allocation8 + $0x5b0] ss:$24 sps:$4 sm:$0xff]   ;;  %v6382_v37 = vld [vmem:[#allocation8 + $0x54c] ss:$24 sps:$4 sm:$0xff]  }
 0x25c   :  { %v2254_v1 = vpop.f32.mrf.mxu0  ;;  %4263 = vmatprep.subr.bf16.mxu0 %v6313_v58  ;;  %v6374_v58 = vld [vmem:[#allocation8 + $0x578] ss:$24 sps:$4 sm:$0xff]   ;;  %v6385_v16 = vld [vmem:[#allocation8 + $0x554] ss:$24 sps:$4 sm:$0xff]  }
 0x25d   :  { %v6899_v2 = vpack.c.bf16 %v2261_v61, %v2261_v61  ;;  %v6377_v60 = vld [vmem:[#allocation8 + $0x580] ss:$24 sps:$4 sm:$0xff]   ;;  %v6383_v1 = vld [vmem:[#allocation8 + $0x550] ss:$24 sps:$4 sm:$0xff]  }
 0x25e   :  { %v6380_v61 = vld [vmem:[#allocation8 + $0x548] ss:$24 sps:$4 sm:$0xff]  }
 0x25f   :  { %4264 = vmatpush2.bf16.msra.mxu0 %v6311_v62  ;;  %4142 = vmatprep.mubr.bf16.mxu1 %v6899_v2  ;;  %v6388_v62 = vld [vmem:[#allocation8 + $0x51c] ss:$24 sps:$4 sm:$0xff]  }
 0x260   :  { %4265 = vmatprep.mubr.bf16.mxu0 %v6899_v2  ;;  %v6905_v6 = vpop.f32.mrf.mxu1  ;;  %4143 = vmatmul.mubr.bf16.vlgmr.msra.gmra.mxu1 %v6901_v4 }
 0x261   :  { %4193 = vmatpush1.bf16.msra.mxu1 %v6314_v0  ;;  %4224 = vmatprep.mubr.bf16.mxu1 %v6871_v24  ;;  %v6391_v0 = vld [vmem:[#allocation8 + $0x524] ss:$24 sps:$4 sm:$0xff]  }
 0x262   :  { %4266 = vmatmul.mubr.bf16.vlgmr.msra.gmra.mxu0 %v6901_v4  ;;  %4315 = vmatprep.subr.bf16.mxu0 %v6319_v3  ;;  %v6910_v12 = vpop.f32.mrf.mxu1  ;;  %v6386_v3 = vld [vmem:[#allocation8 + $0x518] ss:$24 sps:$4 sm:$0xff]  }
 0x263   :  { %4316 = vmatpush1.bf16.msra.mxu0 %v6317_v5  ;;  %4347 = vmatprep.mubr.bf16.mxu0 %v6871_v24  ;;  %v6335_v24 = vld [vmem:[#allocation8 + $0x3d0] ss:$24 sps:$4 sm:$0xff]   ;;  %v6394_v5 = vld [vmem:[#allocation8 + $0x4ec] ss:$24 sps:$4 sm:$0xff]  }
 0x264   :  { %4194 = vmatprep.subr.bf16.mxu1 %v6322_v8  ;;  %v4066_v15 = vpop.f32.mrf.mxu1  ;;  %4317 = vmatprep.subr.bf16.mxu0 %v6325_v9  ;;  %v6389_v8 = vld [vmem:[#allocation8 + $0x520] ss:$24 sps:$4 sm:$0xff]   ;;  %v6397_v9 = vld [vmem:[#allocation8 + $0x4f4] ss:$24 sps:$4 sm:$0xff]  }
 0x265   :  { %4195 = vmatpush1.bf16.msra.mxu1 %v6320_v11  ;;  %v6392_v11 = vld [vmem:[#allocation8 + $0x4e8] ss:$24 sps:$4 sm:$0xff]   ;;  %v6403_v15 = vld [vmem:[#allocation8 + $0x4c4] ss:$24 sps:$4 sm:$0xff]  }
 0x266   :  { %v4067_v18 = vpop.f32.mrf.mxu1  ;;  %4196 = vmatprep.subr.bf16.mxu1 %v6328_v13  ;;  %v6400_v13 = vld [vmem:[#allocation8 + $0x4bc] ss:$24 sps:$4 sm:$0xff]  }
 0x267   :  { %4318 = vmatpush1.bf16.msra.mxu0 %v6323_v14  ;;  %v6395_v14 = vld [vmem:[#allocation8 + $0x4f0] ss:$24 sps:$4 sm:$0xff]   ;;  %v6401_v18 = vld [vmem:[#allocation8 + $0x4c0] ss:$24 sps:$4 sm:$0xff]  }
 0x268   :  { %4319 = vmatprep.subr.bf16.mxu0 %v6331_v55  ;;  %v6398_v55 = vld [vmem:[#allocation8 + $0x4b8] ss:$24 sps:$4 sm:$0xff]  }
 0x269   :  { %4197 = vmatpush1.bf16.msra.mxu1 %v6326_v17  ;;  %v6406_v17 = vld [vmem:[#allocation8 + $0x48c] ss:$24 sps:$4 sm:$0xff]  }
 0x26a   :  { %4198 = vmatprep.subr.bf16.mxu1 %v6334_v19  ;;  %v6409_v19 = vld [vmem:[#allocation8 + $0x494] ss:$24 sps:$4 sm:$0xff]  }
 0x26b   :  { %4320 = vmatpush1.bf16.msra.mxu0 %v6329_v20  ;;  %v6404_v20 = vld [vmem:[#allocation8 + $0x488] ss:$24 sps:$4 sm:$0xff]  }
 0x26c   :  { %4321 = vmatprep.subr.bf16.mxu0 %v6337_v21  ;;  %v6913_v21 = vld [vmem:[#allocation10] sm:$0x3f] }
 0x26d   :  { %4199 = vmatpush1.bf16.msra.mxu1 %v6332_v59  ;;  %v6412_v59 = vld [vmem:[#allocation8 + $0x164] ss:$24 sps:$4 sm:$0xff]  }
 0x26e   :  { %4200 = vmatprep.subr.bf16.mxu1 %v6340_v22  ;;  %v6407_v22 = vld [vmem:[#allocation8 + $0x490] ss:$24 sps:$4 sm:$0xff]  }
 0x26f   :  { %4322 = vmatpush1.bf16.msra.mxu0 %v6335_v24  ;;  %v6491_v24 = vld [vmem:[#allocation11 + $0x78] sm:$0xff]  }
 0x270   :  { %4323 = vmatprep.subr.bf16.mxu0 %v6343_v23  ;;  %v2561_v23 = vrot.slane %v6913_v21, %v419_v32  ;;  %v6413_v32 = vld [vmem:[#allocation8 + $0x130] ss:$24 sps:$4 sm:$0xff]  }
 0x271   :  { %4201 = vmatpush1.bf16.msra.mxu1 %v6338_v25  ;;  %v6410_v25 = vld [vmem:[#allocation8 + $0x160] ss:$24 sps:$4 sm:$0xff]  }
 0x272   :  { %4202 = vmatprep.subr.bf16.mxu1 %v6346_v28  ;;  %v6415_v28 = vld [vmem:[#allocation8 + $0x134] ss:$24 sps:$4 sm:$0xff]  }
 0x273   :  { %4324 = vmatpush1.bf16.msra.mxu0 %v6341_v29  ;;  %v2565_v29 = vrot.slane %v6913_v21, %v423_v35 }
 0x274   :  { %4325 = vmatprep.subr.bf16.mxu0 %v6349_v31  ;;  %v6495_v31 = vld [vmem:[#allocation11 + $0x38] sm:$0xff]  }
 0x275   :  { %4203 = vmatpush1.bf16.msra.mxu1 %v6344_v34  ;;  %v6496_v34 = vld [vmem:[#allocation11 + $0x70] sm:$0xff]  }
 0x276   :  { %4204 = vmatprep.subr.bf16.mxu1 %v6352_v38  ;;  %v4063_v38 = vadd.f32 %v6905_v6, %v2561_v23  ;;  %v6416_v6 = vld [vmem:[#allocation8 + $0x100] ss:$24 sps:$4 sm:$0xff]   ;;  %v6455_v23 = vld [vmem:[#allocation8 + $0x190] ss:$24 sps:$4 sm:$0xff]  }
 0x277   :  { %4326 = vmatpush1.bf16.msra.mxu0 %v6347_v39 }
 0x278   :  { %4327 = vmatprep.subr.bf16.mxu0 %v6355_v52  ;;  %v6418_v52 = vld [vmem:[#allocation8 + $0x104] ss:$24 sps:$4 sm:$0xff]  }
 0x279   :  { %4205 = vmatpush1.bf16.msra.mxu1 %v6350_v42  ;;  %v4065_v42 = vadd.f32 %v6910_v12, %v2565_v29  ;;  %v6419_v12 = vld [vmem:[#allocation8 + $0xd0] ss:$24 sps:$4 sm:$0xff]   ;;  %v6463_v29 = vld [vmem:[#allocation8 + $0x734] ss:$24 sps:$4 sm:$0xff]  }
 0x27a   :  { %4206 = vmatprep.subr.bf16.mxu1 %v6358_v36  ;;  %v6500_v36 = vld [vmem:[#allocation11 + $0x30] sm:$0xff]  }
 0x27b   :  { %4328 = vmatpush1.bf16.msra.mxu0 %v6353_v43 }
 0x27c   :  { %4329 = vmatprep.subr.bf16.mxu0 %v6361_v44  ;;  %v6501_v44 = vld [vmem:[#allocation11 + $0x68] sm:$0xff]  }
 0x27d   :  { %4207 = vmatpush1.bf16.msra.mxu1 %v6356_v45 }
 0x27e   :  { %4208 = vmatprep.subr.bf16.mxu1 %v6364_v10  ;;  %v6421_v10 = vld [vmem:[#allocation8 + $0xd4] ss:$24 sps:$4 sm:$0xff]  }
 0x27f   :  { %4330 = vmatpush1.bf16.msra.mxu0 %v6359_v46 }
 0x280   :  { %4331 = vmatprep.subr.bf16.mxu0 %v6367_v47  ;;  %v6506_v47 = vld [vmem:[#allocation11 + $0x60] sm:$0xff]  }
 0x281   :  { %4209 = vmatpush2.bf16.msra.mxu1 %v6362_v49  ;;  %v6424_v49 = vld [vmem:[#allocation8 + $0xa4] ss:$24 sps:$4 sm:$0xff]  }
 0x282   :  { %4210 = vmatprep.subr.bf16.mxu1 %v6370_v50  ;;  %v6510_v50 = vld [vmem:[#allocation11 + $0x20] sm:$0xff]  }
 0x283   :  { %4332 = vmatpush2.bf16.msra.mxu0 %v6365_v51  ;;  %v6511_v51 = vld [vmem:[#allocation11 + $0x58] sm:$0xff]  }
 0x284   :  { %4333 = vmatprep.subr.bf16.mxu0 %v6373_v53  ;;  %v6422_v53 = vld [vmem:[#allocation8 + $0xa0] ss:$24 sps:$4 sm:$0xff]  }
 0x285   :  { %4211 = vmatpush2.bf16.msra.mxu1 %v6368_v54  ;;  %v6427_v54 = vld [vmem:[#allocation8 + $0x74] ss:$24 sps:$4 sm:$0xff]  }
 0x286   :  { %4212 = vmatprep.subr.bf16.mxu1 %v6376_v48  ;;  %v6515_v48 = vld [vmem:[#allocation11 + $0x18] sm:$0xff]  }
 0x287   :  { %4334 = vmatpush2.bf16.msra.mxu0 %v6371_v30  ;;  %v6516_v30 = vld [vmem:[#allocation11 + $0x50] sm:$0xff]  }
 0x288   :  { %4335 = vmatprep.subr.bf16.mxu0 %v6379_v56  ;;  %v6425_v56 = vld [vmem:[#allocation8 + $0x70] ss:$24 sps:$4 sm:$0xff]  }
 0x289   :  { %4213 = vmatpush2.bf16.msra.mxu1 %v6374_v58  ;;  %v6430_v58 = vld [vmem:[#allocation8 + $0x44] ss:$24 sps:$4 sm:$0xff]  }
 0x28a   :  { %4214 = vmatprep.subr.bf16.mxu1 %v6382_v37  ;;  %v6517_v37 = vld [vmem:[#allocation11 + $0x10] sm:$0xff]  }
 0x28b   :  { %4336 = vmatpush2.bf16.msra.mxu0 %v6377_v60  ;;  %v6518_v60 = vld [vmem:[#allocation11 + $0x48] sm:$0xff]  }
 0x28c   :  { %4337 = vmatprep.subr.bf16.mxu0 %v6385_v16  ;;  %v6428_v16 = vld [vmem:[#allocation8 + $0x40] ss:$24 sps:$4 sm:$0xff]  }
 0x28d   :  { %4215 = vmatpush2.bf16.msra.mxu1 %v6380_v61  ;;  %v6433_v61 = vld [vmem:[#allocation8 + $0x14] ss:$24 sps:$4 sm:$0xff]  }
 0x28e   :  { %4216 = vmatprep.subr.bf16.mxu1 %v6388_v62  ;;  %v6519_v62 = vld [vmem:[#allocation11 + $0x8] sm:$0xff]  }
 0x28f   :  { %4338 = vmatpush2.bf16.msra.mxu0 %v6383_v1  ;;  %v6520_v1 = vld [vmem:[#allocation11 + $0x40] sm:$0xff]  }
 0x290   :  { %4339 = vmatprep.subr.bf16.mxu0 %v6391_v0  ;;  %v6431_v0 = vld [vmem:[#allocation8 + $0x10] ss:$24 sps:$4 sm:$0xff]  }
 0x291   :  { %4217 = vmatpush2.bf16.msra.mxu1 %v6386_v3  ;;  %v6436_v3 = vld [vmem:[#allocation8 + $0x2e4] ss:$24 sps:$4 sm:$0xff]  }
 0x292   :  { %4218 = vmatprep.subr.bf16.mxu1 %v6394_v5  ;;  %v6521_v5 = vld [vmem:[#allocation11] sm:$0xff]  }
 0x293   :  { %4340 = vmatpush2.bf16.msra.mxu0 %v6389_v8  ;;  %v6434_v8 = vld [vmem:[#allocation8 + $0x2e0] ss:$24 sps:$4 sm:$0xff]  }
 0x294   :  { %4341 = vmatprep.subr.bf16.mxu0 %v6397_v9  ;;  %v6439_v9 = vld [vmem:[#allocation8 + $0x2b4] ss:$24 sps:$4 sm:$0xff]  }
 0x295   :  { %4219 = vmatpush2.bf16.msra.mxu1 %v6392_v11  ;;  %v6437_v11 = vld [vmem:[#allocation8 + $0x2b0] ss:$24 sps:$4 sm:$0xff]  }
 0x296   :  { %4220 = vmatprep.subr.bf16.mxu1 %v6400_v13  ;;  %v6442_v13 = vld [vmem:[#allocation8 + $0x284] ss:$24 sps:$4 sm:$0xff]  }
 0x297   :  { %4342 = vmatpush2.bf16.msra.mxu0 %v6395_v14  ;;  %v6440_v14 = vld [vmem:[#allocation8 + $0x280] ss:$24 sps:$4 sm:$0xff]  }
 0x298   :  { %4343 = vmatprep.subr.bf16.mxu0 %v6403_v15  ;;  %v6445_v15 = vld [vmem:[#allocation8 + $0x254] ss:$24 sps:$4 sm:$0xff]  }
 0x299   :  { %4221 = vmatpush2.bf16.msra.mxu1 %v6398_v55  ;;  %v6443_v55 = vld [vmem:[#allocation8 + $0x250] ss:$24 sps:$4 sm:$0xff]  }
 0x29a   :  { %4222 = vmatprep.subr.bf16.mxu1 %v6406_v17  ;;  %v6448_v17 = vld [vmem:[#allocation8 + $0x224] ss:$24 sps:$4 sm:$0xff]  }
 0x29b   :  { %4344 = vmatpush2.bf16.msra.mxu0 %v6401_v18  ;;  %v6446_v18 = vld [vmem:[#allocation8 + $0x220] ss:$24 sps:$4 sm:$0xff]  }
 0x29c   :  { %4345 = vmatprep.subr.bf16.mxu0 %v6409_v19  ;;  %v6451_v19 = vld [vmem:[#allocation8 + $0x1f4] ss:$24 sps:$4 sm:$0xff]  }
 0x29d   :  { %4223 = vmatpush2.bf16.msra.mxu1 %v6404_v20  ;;  %v6449_v20 = vld [vmem:[#allocation8 + $0x1f0] ss:$24 sps:$4 sm:$0xff]  }
 0x29e   :  { %4274 = vmatprep.subr.bf16.mxu1 %v6412_v59  ;;  %v6454_v59 = vld [vmem:[#allocation8 + $0x1c4] ss:$24 sps:$4 sm:$0xff]  }
 0x29f   :  { %4346 = vmatpush2.bf16.msra.mxu0 %v6407_v22  ;;  %v6452_v22 = vld [vmem:[#allocation8 + $0x1c0] ss:$24 sps:$4 sm:$0xff]  }
 0x2a0   :  { %4225 = vmatmul.mubr.bf16.vlgmr.msra.gmra.mxu1 %v6873_v27  ;;  %5564 = vmatprep.subr.bf16.mxu0 %v6491_v24  ;;  %v6457_v24 = vld [vmem:[#allocation8 + $0x194] ss:$24 sps:$4 sm:$0xff]  }
 0x2a1   :  { %4275 = vmatpush1.bf16.msra.mxu1 %v6410_v25  ;;  %4306 = vmatprep.mubr.bf16.mxu1 %v6855_v40  ;;  %v6460_v25 = vld [vmem:[#allocation8 + $0x764] ss:$24 sps:$4 sm:$0xff]  }
 0x2a2   :  { %4348 = vmatmul.mubr.bf16.vlgmr.msra.gmra.mxu0 %v6873_v27  ;;  %v4103_v39 = vpop.f32.mrf.mxu0  ;;  %4276 = vmatprep.subr.bf16.mxu1 %v6415_v28  ;;  %v6505_v27 = vld [vmem:[#allocation11 + $0x28] sm:$0xff]   ;;  %v6458_v28 = vld [vmem:[#allocation8 + $0x760] ss:$24 sps:$4 sm:$0xff]  }
 0x2a3   :  { %v6926_v35 = vadd.f32 %v4103_v39, %v4063_v38  ;;  %5565 = vmatpush3.bf16.msra.mxu0 %v6495_v31  ;;  %v6461_v31 = vld [vmem:[#allocation8 + $0x730] ss:$24 sps:$4 sm:$0xff]   ;;  %v6466_v38 = vld [vmem:[#allocation8 + $0x704] ss:$24 sps:$4 sm:$0xff]   ;;  %v6464_v39 = vld [vmem:[#allocation8 + $0x700] ss:$24 sps:$4 sm:$0xff]  }
 0x2a4   :  { %v4105_v43 = vpop.f32.mrf.mxu0  ;;  %5566 = vmatprep.subr.bf16.mxu0 %v6496_v34 }
 0x2a5   :  { %v6928_v45 = vadd.f32 %v4105_v43, %v4065_v42  ;;  %4277 = vmatpush1.bf16.msra.mxu1 %v6413_v32  ;;  %v6469_v42 = vld [vmem:[#allocation8 + $0x6d4] ss:$24 sps:$4 sm:$0xff]   ;;  %v6467_v43 = vld [vmem:[#allocation8 + $0x6d0] ss:$24 sps:$4 sm:$0xff]  }
 0x2a6   :  { %v4107_v40 = vpop.f32.mrf.mxu0  ;;  %4278 = vmatprep.subr.bf16.mxu1 %v6418_v52 }
 0x2a7   :  { %5567 = vmatpush3.bf16.msra.mxu0 %v6500_v36  ;;  %v6478_v40 = vld [vmem:[#allocation8 + $0x644] ss:$24 sps:$4 sm:$0xff]  }
 0x2a8   :  { %v4108_v46 = vpop.f32.mrf.mxu0  ;;  %5568 = vmatprep.subr.bf16.mxu0 %v6501_v44  ;;  %v6470_v44 = vld [vmem:[#allocation8 + $0x6a0] ss:$24 sps:$4 sm:$0xff]  }
 0x2a9   :  { %4279 = vmatpush1.bf16.msra.mxu1 %v6416_v6  ;;  %v6473_v6 = vld [vmem:[#allocation8 + $0x670] ss:$24 sps:$4 sm:$0xff]  }
 0x2aa   :  { %4280 = vmatprep.subr.bf16.mxu1 %v6421_v10  ;;  %v6476_v10 = vld [vmem:[#allocation8 + $0x640] ss:$24 sps:$4 sm:$0xff]   ;;  %v6479_v46 = vld [vmem:[#allocation8 + $0x610] ss:$24 sps:$4 sm:$0xff]  }
 0x2ab   :  { %5569 = vmatpush3.bf16.msra.mxu0 %v6505_v27  ;;  %v6481_v27 = vld [vmem:[#allocation8 + $0x614] ss:$24 sps:$4 sm:$0xff]  }
 0x2ac   :  { %5570 = vmatprep.subr.bf16.mxu0 %v6506_v47  ;;  %v6484_v47 = vld [vmem:[#allocation8 + $0x8e4] ss:$24 sps:$4 sm:$0xff]  }
 0x2ad   :  { %4281 = vmatpush1.bf16.msra.mxu1 %v6419_v12  ;;  %v6482_v12 = vld [vmem:[#allocation8 + $0x8e0] ss:$24 sps:$4 sm:$0xff]  }
 0x2ae   :  { %4282 = vmatprep.subr.bf16.mxu1 %v6424_v49  ;;  %v6487_v49 = vld [vmem:[#allocation8 + $0x8b4] ss:$24 sps:$4 sm:$0xff]  }
 0x2af   :  { %5571 = vmatpush3.bf16.msra.mxu0 %v6510_v50  ;;  %v6485_v50 = vld [vmem:[#allocation8 + $0x8b0] ss:$24 sps:$4 sm:$0xff]  }
 0x2b0   :  { %5572 = vmatprep.subr.bf16.mxu0 %v6511_v51  ;;  %v6490_v51 = vld [vmem:[#allocation8 + $0x884] ss:$24 sps:$4 sm:$0xff]  }
 0x2b1   :  { %4283 = vmatpush1.bf16.msra.mxu1 %v6422_v53  ;;  %v6488_v53 = vld [vmem:[#allocation8 + $0x880] ss:$24 sps:$4 sm:$0xff]  }
 0x2b2   :  { %4284 = vmatprep.subr.bf16.mxu1 %v6427_v54  ;;  %v6494_v54 = vld [vmem:[#allocation8 + $0x854] ss:$24 sps:$4 sm:$0xff]  }
 0x2b3   :  { %5573 = vmatpush3.bf16.msra.mxu0 %v6515_v48  ;;  %v6492_v48 = vld [vmem:[#allocation8 + $0x850] ss:$24 sps:$4 sm:$0xff]  }
 0x2b4   :  { %5574 = vmatprep.subr.bf16.mxu0 %v6516_v30  ;;  %v6499_v30 = vld [vmem:[#allocation8 + $0x824] ss:$24 sps:$4 sm:$0xff]  }
 0x2b5   :  { %4285 = vmatpush1.bf16.msra.mxu1 %v6425_v56  ;;  %v6497_v56 = vld [vmem:[#allocation8 + $0x820] ss:$24 sps:$4 sm:$0xff]  }
 0x2b6   :  { %4286 = vmatprep.subr.bf16.mxu1 %v6430_v58  ;;  %v6504_v58 = vld [vmem:[#allocation8 + $0x7f4] ss:$24 sps:$4 sm:$0xff]  }
 0x2b7   :  { %5575 = vmatpush3.bf16.msra.mxu0 %v6517_v37  ;;  %v6502_v37 = vld [vmem:[#allocation8 + $0x7f0] ss:$24 sps:$4 sm:$0xff]  }
 0x2b8   :  { %5576 = vmatprep.subr.bf16.mxu0 %v6518_v60  ;;  %v6509_v60 = vld [vmem:[#allocation8 + $0x7c4] ss:$24 sps:$4 sm:$0xff]  }
 0x2b9   :  { %4287 = vmatpush1.bf16.msra.mxu1 %v6428_v16  ;;  %v6507_v16 = vld [vmem:[#allocation8 + $0x7c0] ss:$24 sps:$4 sm:$0xff]  }
 0x2ba   :  { %4288 = vmatprep.subr.bf16.mxu1 %v6433_v61  ;;  %v6514_v61 = vld [vmem:[#allocation8 + $0x794] ss:$24 sps:$4 sm:$0xff]  }
 0x2bb   :  { %5577 = vmatpush3.bf16.msra.mxu0 %v6519_v62  ;;  %v6512_v62 = vld [vmem:[#allocation8 + $0x790] ss:$24 sps:$4 sm:$0xff]  }
 0x2bc   :  { %5578 = vmatprep.subr.bf16.mxu0 %v6520_v1  ;;  %v6522_v1 = vld [vmem:[#allocation11 + $0xf8] sm:$0xff]  }
 0x2bd   :  { %4289 = vmatpush1.bf16.msra.mxu1 %v6431_v0  ;;  %v6523_v0 = vld [vmem:[#allocation11 + $0xb8] sm:$0xff]  }
 0x2be   :  { %4290 = vmatprep.subr.bf16.mxu1 %v6436_v3  ;;  %v6524_v3 = vld [vmem:[#allocation11 + $0xf0] sm:$0xff]  }
 0x2bf   :  { %5579 = vmatpush3.bf16.msra.mxu0 %v6521_v5 }
 0x2c1   :  { %4291 = vmatpush2.bf16.msra.mxu1 %v6434_v8 }
 0x2c2   :  { %4292 = vmatprep.subr.bf16.mxu1 %v6439_v9  ;;  %v6525_v9 = vld [vmem:[#allocation11 + $0xb0] sm:$0xff]  }
 0x2c5   :  { %4293 = vmatpush2.bf16.msra.mxu1 %v6437_v11 }
 0x2c6   :  { %4294 = vmatprep.subr.bf16.mxu1 %v6442_v13 }
 0x2c9   :  { %4295 = vmatpush2.bf16.msra.mxu1 %v6440_v14  ;;  %v6526_v14 = vld [vmem:[#allocation11 + $0xe8] sm:$0xff]  }
 0x2ca   :  { %4296 = vmatprep.subr.bf16.mxu1 %v6445_v15 }
 0x2cd   :  { %4297 = vmatpush2.bf16.msra.mxu1 %v6443_v55 }
 0x2ce   :  { %4298 = vmatprep.subr.bf16.mxu1 %v6448_v17 }
 0x2d1   :  { %4299 = vmatpush2.bf16.msra.mxu1 %v6446_v18 }
 0x2d2   :  { %4300 = vmatprep.subr.bf16.mxu1 %v6451_v19 }
 0x2d5   :  { %4301 = vmatpush2.bf16.msra.mxu1 %v6449_v20  ;;  %v6527_v20 = vld [vmem:[#allocation11 + $0xa8] sm:$0xff]  }
 0x2d6   :  { %4302 = vmatprep.subr.bf16.mxu1 %v6454_v59 }
 0x2d9   :  { %4303 = vmatpush2.bf16.msra.mxu1 %v6452_v22  ;;  %v6538_v22 = vld [vmem:[#allocation11 + $0x178] sm:$0xff]  }
 0x2da   :  { %4304 = vmatprep.subr.bf16.mxu1 %v6457_v24  ;;  %5608 = vmatprep.subr.bf16.mxu0 %v6538_v22 }
 0x2dd   :  { %4305 = vmatpush2.bf16.msra.mxu1 %v6455_v23  ;;  %v6539_v23 = vld [vmem:[#allocation11 + $0x138] sm:$0xff]  }
 0x2de   :  { %4356 = vmatprep.subr.bf16.mxu1 %v6460_v25 }
 0x2e0   :  { %4307 = vmatmul.mubr.bf16.vlgmr.msra.gmra.mxu1 %v6857_v63  ;;  %v6472_v63 = vld [vmem:[#allocation8 + $0x6a4] ss:$24 sps:$4 sm:$0xff]  }
 0x2e1   :  { %4357 = vmatpush1.bf16.msra.mxu1 %v6458_v28  ;;  %4388 = vmatprep.mubr.bf16.mxu1 %v6899_v2  ;;  %v6475_v2 = vld [vmem:[#allocation8 + $0x674] ss:$24 sps:$4 sm:$0xff]  }
 0x2e2   :  { %v6932_v34 = vpop.f32.mrf.mxu0  ;;  %4358 = vmatprep.subr.bf16.mxu1 %v6463_v29  ;;  %v6540_v29 = vld [vmem:[#allocation11 + $0x170] sm:$0xff]  }
 0x2e4   :  { %v6934_v32 = vpop.f32.mrf.mxu0 }
 0x2e5   :  { %4359 = vmatpush1.bf16.msra.mxu1 %v6461_v31  ;;  %v6530_v31 = vld [vmem:[#allocation11 + $0xd8] sm:$0xff]  }
 0x2e6   :  { %v4189_v52 = vpop.f32.mrf.mxu0  ;;  %4360 = vmatprep.subr.bf16.mxu1 %v6466_v38  ;;  %v6541_v38 = vld [vmem:[#allocation11 + $0x130] sm:$0xff]  }
 0x2e7   :  { %v6531_v52 = vld [vmem:[#allocation11 + $0x98] sm:$0xff]  }
 0x2e8   :  { %v4190_v36 = vpop.f32.mrf.mxu0 }
 0x2e9   :  { %4361 = vmatpush1.bf16.msra.mxu1 %v6464_v39  ;;  %v6542_v39 = vld [vmem:[#allocation11 + $0x168] sm:$0xff]  }
 0x2ea   :  { %4362 = vmatprep.subr.bf16.mxu1 %v6469_v42  ;;  %v6532_v42 = vld [vmem:[#allocation11 + $0xd0] sm:$0xff]   ;;  %v6543_v36 = vld [vmem:[#allocation11 + $0x128] sm:$0xff]  }
 0x2ed   :  { %4363 = vmatpush1.bf16.msra.mxu1 %v6467_v43  ;;  %v6544_v43 = vld [vmem:[#allocation11 + $0x160] sm:$0xff]  }
 0x2ee   :  { %4364 = vmatprep.subr.bf16.mxu1 %v6472_v63  ;;  %v6533_v63 = vld [vmem:[#allocation11 + $0x90] sm:$0xff]  }
 0x2f1   :  { %4365 = vmatpush1.bf16.msra.mxu1 %v6470_v44  ;;  %v6534_v44 = vld [vmem:[#allocation11 + $0xc8] sm:$0xff]  }
 0x2f2   :  { %4366 = vmatprep.subr.bf16.mxu1 %v6475_v2  ;;  %v6545_v2 = vld [vmem:[#allocation11 + $0x120] sm:$0xff]  }
 0x2f5   :  { %4367 = vmatpush1.bf16.msra.mxu1 %v6473_v6  ;;  %v6546_v6 = vld [vmem:[#allocation11 + $0x158] sm:$0xff]  }
 0x2f6   :  { %4368 = vmatprep.subr.bf16.mxu1 %v6478_v40  ;;  %v6535_v40 = vld [vmem:[#allocation11 + $0x88] sm:$0xff]  }
 0x2f9   :  { %4369 = vmatpush1.bf16.msra.mxu1 %v6476_v10  ;;  %v6536_v10 = vld [vmem:[#allocation11 + $0xc0] sm:$0xff]  }
 0x2fa   :  { %4370 = vmatprep.subr.bf16.mxu1 %v6481_v27  ;;  %v6547_v27 = vld [vmem:[#allocation11 + $0x118] sm:$0xff]  }
 0x2fd   :  { %4371 = vmatpush1.bf16.msra.mxu1 %v6479_v46  ;;  %v6548_v46 = vld [vmem:[#allocation11 + $0x150] sm:$0xff]  }
 0x2fe   :  { %4372 = vmatprep.subr.bf16.mxu1 %v6484_v47  ;;  %v6537_v47 = vld [vmem:[#allocation11 + $0x80] sm:$0xff]  }
 0x301   :  { %4373 = vmatpush2.bf16.msra.mxu1 %v6482_v12  ;;  %v6549_v12 = vld [vmem:[#allocation11 + $0x110] sm:$0xff]  }
 0x302   :  { %4374 = vmatprep.subr.bf16.mxu1 %v6487_v49  ;;  %v2569_v49 = vrot.slane %v6913_v21, %v427_v33 }
 0x305   :  { %4375 = vmatpush2.bf16.msra.mxu1 %v6485_v50  ;;  %v2573_v50 = vrot.slane %v6913_v21, %v431_v57 }
 0x306   :  { %4376 = vmatprep.subr.bf16.mxu1 %v6490_v51  ;;  %v4186_v51 = vadd.f32 %v6932_v34, %v2569_v49 }
 0x309   :  { %4377 = vmatpush2.bf16.msra.mxu1 %v6488_v53 }
 0x30a   :  { %4378 = vmatprep.subr.bf16.mxu1 %v6494_v54  ;;  %v6550_v54 = vld [vmem:[#allocation11 + $0x148] sm:$0xff]  }
 0x30d   :  { %4379 = vmatpush2.bf16.msra.mxu1 %v6492_v48  ;;  %v4188_v48 = vadd.f32 %v6934_v32, %v2573_v50 }
 0x30e   :  { %4380 = vmatprep.subr.bf16.mxu1 %v6499_v30 }
 0x311   :  { %4381 = vmatpush2.bf16.msra.mxu1 %v6497_v56  ;;  %v6551_v56 = vld [vmem:[#allocation11 + $0x108] sm:$0xff]  }
 0x312   :  { %4382 = vmatprep.subr.bf16.mxu1 %v6504_v58 }
 0x315   :  { %4383 = vmatpush2.bf16.msra.mxu1 %v6502_v37 }
 0x316   :  { %4384 = vmatprep.subr.bf16.mxu1 %v6509_v60 }
 0x319   :  { %4385 = vmatpush2.bf16.msra.mxu1 %v6507_v16 }
 0x31a   :  { %4386 = vmatprep.subr.bf16.mxu1 %v6514_v61 }
 0x31d   :  { %4387 = vmatpush2.bf16.msra.mxu1 %v6512_v62  ;;  %v6552_v62 = vld [vmem:[#allocation11 + $0x140] sm:$0xff]  }
 0x31e   :  { %5586 = vmatprep.subr.bf16.mxu1 %v6522_v1  ;;  %v6553_v1 = vld [vmem:[#allocation11 + $0x100] sm:$0xff]  }
 0x320   :  { %4389 = vmatmul.mubr.bf16.vlgmr.msra.gmra.mxu1 %v6901_v4  ;;  %v4144_v5 = vpop.f32.mrf.mxu1 }
 0x321   :  { %v4145_v8 = vadd.f32 %v4144_v5, %v6926_v35  ;;  %5587 = vmatpush3.bf16.msra.mxu1 %v6523_v0  ;;  %v6528_v35 = vld [vmem:[#allocation11 + $0xe0] sm:$0xff]  }
 0x322   :  { %v6938_v11 = vpop.f32.mrf.mxu0  ;;  %v4146_v13 = vpop.f32.mrf.mxu1  ;;  %5588 = vmatprep.subr.bf16.mxu1 %v6524_v3 }
 0x323   :  { %v4147_v15 = vadd.f32 %v4146_v13, %v6928_v45  ;;  %v4397_v55 = vmax.f32 %v4145_v8, 0.0  ;;  %v6529_v45 = vld [vmem:[#allocation11 + $0xa0] sm:$0xff]  }
 0x324   :  { %v6941_v17 = vpop.f32.mrf.mxu0  ;;  %v4148_v18 = vpop.f32.mrf.mxu1 }
 0x325   :  { %v4398_v19 = vmax.f32 %v4147_v15, 0.0  ;;  %5589 = vmatpush3.bf16.msra.mxu1 %v6525_v9  ;;  %v4403_v25 = vpack.c.bf16 %v4397_v55, %v4397_v55  ;;  %v2577_v55 = vrot.slane %v6913_v21, %v435_v7 }
 0x326   :  { %v4271_v4 = vpop.f32.mrf.mxu0  ;;  %v4149_v59 = vpop.f32.mrf.mxu1  ;;  %5590 = vmatprep.subr.bf16.mxu1 %v6526_v14 }
 0x327   :  { %v4404_v24 = vpack.c.bf16 %v4398_v19, %v4398_v19 }
 0x328   :  { %v4272_v28 = vpop.f32.mrf.mxu0 }
 0x329   :  { %4832 = vmatprep.mubr.bf16.mxu0 %v4404_v24  ;;  %5591 = vmatpush3.bf16.msra.mxu1 %v6527_v20 }
 0x32a   :  { %4833 = vmatmul.mubr.bf16.vlgmr.msra.gmra.mxu0 %v4403_v25  ;;  %5592 = vmatprep.subr.bf16.mxu1 %v6528_v35 }
 0x32b   :  { %5609 = vmatpush3.bf16.msra.mxu0 %v6539_v23 }
 0x32c   :  { %5610 = vmatprep.subr.bf16.mxu0 %v6540_v29 }
 0x32d   :  { %5593 = vmatpush3.bf16.msra.mxu1 %v6529_v45 }
 0x32e   :  { %5594 = vmatprep.subr.bf16.mxu1 %v6530_v31 }
 0x32f   :  { %5611 = vmatpush3.bf16.msra.mxu0 %v6541_v38 }
 0x330   :  { %5612 = vmatprep.subr.bf16.mxu0 %v6542_v39  ;;  %v5515_v39 = vld [vmem:[#allocation13] ss:$0 sm:$0xff] }
 0x331   :  { %5595 = vmatpush3.bf16.msra.mxu1 %v6531_v52 }
 0x332   :  { %5596 = vmatprep.subr.bf16.mxu1 %v6532_v42 }
 0x333   :  { %5613 = vmatpush3.bf16.msra.mxu0 %v6543_v36 }
 0x334   :  { %5614 = vmatprep.subr.bf16.mxu0 %v6544_v43 }
 0x335   :  { %5597 = vmatpush3.bf16.msra.mxu1 %v6533_v63 }
 0x336   :  { %5598 = vmatprep.subr.bf16.mxu1 %v6534_v44 }
 0x337   :  { %5615 = vmatpush3.bf16.msra.mxu0 %v6545_v2 }
 0x338   :  { %5616 = vmatprep.subr.bf16.mxu0 %v6546_v6 }
 0x339   :  { %5599 = vmatpush3.bf16.msra.mxu1 %v6535_v40 }
 0x33a   :  { %5600 = vmatprep.subr.bf16.mxu1 %v6536_v10 }
 0x33b   :  { %5617 = vmatpush3.bf16.msra.mxu0 %v6547_v27 }
 0x33c   :  { %5618 = vmatprep.subr.bf16.mxu0 %v6548_v46 }
 0x33d   :  { %5601 = vmatpush3.bf16.msra.mxu1 %v6537_v47 }
 0x33f   :  { %5619 = vmatpush3.bf16.msra.mxu0 %v6549_v12 }
 0x340   :  { %5620 = vmatprep.subr.bf16.mxu0 %v6550_v54 }
 0x343   :  { %5621 = vmatpush3.bf16.msra.mxu0 %v6551_v56 }
 0x344   :  { %5622 = vmatprep.subr.bf16.mxu0 %v6552_v62 }
 0x347   :  { %5623 = vmatpush3.bf16.msra.mxu0 %v6553_v1 }
 0x360   :  { %v4226_v53 = vpop.f32.mrf.mxu1 }
 0x361   :  { %v4227_v30 = vadd.f32 %v4226_v53, %v4186_v51 }
 0x362   :  { %v4228_v58 = vpop.f32.mrf.mxu1  ;;  %v4349_v37 = vpop.f32.mrf.mxu0 }
 0x363   :  { %v4268_v60 = vadd.f32 %v6938_v11, %v4227_v30  ;;  %v4229_v16 = vadd.f32 %v4228_v58, %v4188_v48 }
 0x364   :  { %v4230_v33 = vpop.f32.mrf.mxu1  ;;  %v4351_v61 = vpop.f32.mrf.mxu0 }
 0x365   :  { %v4270_v57 = vadd.f32 %v6941_v17, %v4229_v16  ;;  %v4399_v34 = vmax.f32 %v4268_v60, 0.0  ;;  %v2581_v17 = vrot.slane %v6913_v21, %v439_v41 }
 0x366   :  { %v4231_v0 = vpop.f32.mrf.mxu1  ;;  %v4353_v3 = vpop.f32.mrf.mxu0 }
 0x367   :  { %v4400_v32 = vmax.f32 %v4270_v57, 0.0  ;;  %v4405_v9 = vpack.c.bf16 %v4399_v34, %v4399_v34 }
 0x368   :  { %v4354_v5 = vpop.f32.mrf.mxu0 }
 0x369   :  { %v4406_v8 = vpack.c.bf16 %v4400_v32, %v4400_v32 }
 0x36b   :  { %4872 = vmatprep.mubr.bf16.mxu1 %v4406_v8 }
 0x36c   :  { %4873 = vmatmul.mubr.bf16.vlgmr.msra.gmra.mxu1 %v4405_v9 }
 0x3a0   :  { %v4308_v11 = vpop.f32.mrf.mxu1 }
 0x3a1   :  { %v4309_v18 = vadd.f32 %v4308_v11, %v2577_v55 }
 0x3a2   :  { %v4310_v13 = vpop.f32.mrf.mxu1 }
 0x3a3   :  { %v4311_v19 = vadd.f32 %v4310_v13, %v2581_v17  ;;  %v4350_v20 = vadd.f32 %v4349_v37, %v4309_v18 }
 0x3a4   :  { %v4312_v14 = vpop.f32.mrf.mxu1 }
 0x3a5   :  { %v4352_v35 = vadd.f32 %v4351_v61, %v4311_v19 }
 0x3a6   :  { %v4313_v15 = vpop.f32.mrf.mxu1 }
 0x3e0   :  { %v4390_v4 = vpop.f32.mrf.mxu1 }
 0x3e1   :  { %v4391_v59 = vadd.f32 %v4390_v4, %v4350_v20 }
 0x3e2   :  { %v4392_v22 = vpop.f32.mrf.mxu1 }
 0x3e3   :  { %v4393_v24 = vadd.f32 %v4392_v22, %v4352_v35  ;;  %v4401_v23 = vmax.f32 %v4391_v59, 0.0 }
 0x3e4   :  { %v4394_v25 = vpop.f32.mrf.mxu1 }
 0x3e5   :  { %v4402_v28 = vmax.f32 %v4393_v24, 0.0  ;;  %v4407_v31 = vpack.c.bf16 %v4401_v23, %v4401_v23 }
 0x3e6   :  { %v4395_v29 = vpop.f32.mrf.mxu1 }
 0x3e7   :  { %v4408_v45 = vpack.c.bf16 %v4402_v28, %v4402_v28 }
 0x3e9   :  { %4912 = vmatprep.mubr.bf16.mxu0 %v4408_v45 }
 0x3ea   :  { %4913 = vmatmul.mubr.bf16.vlgmr.msra.gmra.mxu0 %v4407_v31  ;;  %v5580_v7 = vpop.f32.mrf.mxu0 }
 0x3ec   :  { %v5581_v26 = vpop.f32.mrf.mxu0 }
 0x3ed   :  { %v5582_v38 = vadd.f32 %v5581_v26, %v5580_v7 }
 0x3ee   :  { %v5583_v41 = vpop.f32.mrf.mxu0 }
 0x3ef   :  { %v4835_v36 = vadd.f32 %v5582_v38, %v5515_v39 }
 0x3f0   :  { %v5584_v21 = vpop.f32.mrf.mxu0 }
 0x42c   :  { %v5602_v52 = vpop.f32.mrf.mxu1 }
 0x42e   :  { %v5603_v42 = vpop.f32.mrf.mxu1 }
 0x42f   :  { %v5604_v43 = vadd.f32 %v5603_v42, %v5602_v52 }
 0x430   :  { %v5605_v63 = vpop.f32.mrf.mxu1 }
 0x431   :  { %v4875_v44 = vadd.f32 %v5604_v43, %v4835_v36 }
 0x432   :  { %v5606_v2 = vpop.f32.mrf.mxu1 }
 0x4aa   :  { %v5624_v6 = vpop.f32.mrf.mxu0 }
 0x4ac   :  { %v5625_v40 = vpop.f32.mrf.mxu0 }
 0x4ad   :  { %v5626_v10 = vadd.f32 %v5625_v40, %v5624_v6 }
 0x4ae   :  { %v5627_v27 = vpop.f32.mrf.mxu0 }
 0x4af   :  { %v4915_v46 = vadd.f32 %v5626_v10, %v4875_v44 }
 0x4b0   :  { %v5628_v47 = vpop.f32.mrf.mxu0 }
 0x4b1   :  { %4920 = vst [vmem:[#allocation14] sm:$0xff] %v4915_v46 }
 0x4b2   :  { %6705 = shalt.err (!%p6702_p11)
}
 0x4b3   :  { %4930 = dma.vmem_to_hbm [thread:$0]  %s4928_s6, 128, %s6969_s7, [#allocation4]  }
 0x4b4   :  { %6722 = dma.done.wait [#allocation4], 128  }
 0x4b5   :  { %6723 = vsyncadd [#allocation4], 4294967168 }
 0x4b6   :  { %4934 = vsyncpa [#allocation3], 1 }
 0x4b7   :  { %4935 = vsyncpa [#allocation6], 1 }
 0x4b8   :  { %4936 = vsyncpa [#allocation9], 1 }
 0x4b9   :  { %4937 = vsyncpa [#allocation12], 1 }
 0x4ba   :  { %4938 = vsyncpa [#allocation4], 1 }

// kernel: tpu_custom_call.1
= control target key start
LH: loop header
LB: loop body
LE: loop exit
PB: predicated region body
PF: predicated region fallthrough
CT: control target
= control target key end

     0   :  { %12 = vsyncpa [#allocation3], 0  ;;  %s6962_s0 = inlined_call_operand.hbm [shape: f32[8,768], index: 0, kind: input, shape index: {}]   ;;  %s6963_s1 = inlined_call_operand.hbm [shape: bf16[768,768], index: 1, kind: input, shape index: {}]   ;;  %s6964_s2 = inlined_call_operand.hbm [shape: f32[1,768], index: 2, kind: input, shape index: {}]   ;;  %s6965_s3 = inlined_call_operand.hbm [shape: bf16[768,768], index: 3, kind: input, shape index: {}]   ;;  %s6966_s4 = inlined_call_operand.hbm [shape: f32[1,768], index: 4, kind: input, shape index: {}]   ;;  %s6967_s5 = inlined_call_operand.hbm [shape: bf16[768,128], index: 5, kind: input, shape index: {}]   ;;  %s6968_s6 = inlined_call_operand.hbm [shape: f32[1,128], index: 6, kind: input, shape index: {}]   ;;  %s6969_s7 = inlined_call_operand.hbm [shape: f32[8,128], index: 7, kind: output, shape index: {}]  }
   0x1   :  { %13 = vsyncpa [#allocation6], 0 }
   0x2   :  { %14 = vsyncpa [#allocation9], 0 }
   0x3   :  { %15 = vsyncpa [#allocation12], 0 }
   0x4   :  { %16 = vsyncpa [#allocation4], 0  ;;  %s6724_s24 = smov [#allocation5]  }
   0x5   :  { %s32_s25 = sshll.u32 %s6724_s24, 4  ;;  %s33_s25 = int_to_ptr.vmem [resolvable:$true] %s32_s25 }
   0x6   :  { %s6562_s26 = scalar_lea.vmem %s33_s25, 36864  ;;  %p6567_p1 = scmp.lt.s32.totalorder %s33_s25, %s33_s25 }
   0x7   :  { %p6563_p0 = scmp.ne.s32.totalorder %s33_s25, %s6562_s26  ;;  %p6568_p2 = scmp.lt.s32.totalorder %s6562_s26, %s6562_s26 }
   0x9   :  { %p6569_p3 = por %p6568_p2, %p6567_p1 }
   0xb   :  { %p6570_p4 = pnand %p6569_p3, %p6563_p0 }
   0xd   :  { %6573 = shalt.err (!%p6570_p4)
}
   0xe   :  { %s6725_s27 = smov 384   ;;  %s6726_s28 = smov 24  }
   0xf   :  { %38 = dma.hbm_to_vmem [thread:$0]  %s6963_s1, 36864, %s33_s25, [#allocation6], %s6725_s27, %s6725_s27, %s6726_s28  }
  0x10   :  { %s6727_s8 = smov [#allocation8]   ;;  %s6728_s10 = smov [#allocation11]  }
  0x11   :  { %s54_s9 = sshll.u32 %s6727_s8, 4  ;;  %s76_s11 = sshll.u32 %s6728_s10, 4  ;;  %s55_s9 = int_to_ptr.vmem [resolvable:$true] %s54_s9  ;;  %s77_s11 = int_to_ptr.vmem [resolvable:$true] %s76_s11 }
  0x12   :  { %s6582_s12 = scalar_lea.vmem %s55_s9, 36864  ;;  %p6587_p6 = scmp.lt.s32.totalorder %s55_s9, %s55_s9 }
  0x13   :  { %p6583_p5 = scmp.ne.s32.totalorder %s55_s9, %s6582_s12  ;;  %p6588_p7 = scmp.lt.s32.totalorder %s6582_s12, %s6582_s12 }
  0x15   :  { %p6589_p8 = por %p6588_p7, %p6587_p6 }
  0x17   :  { %p6590_p9 = pnand %p6589_p8, %p6583_p5 }
  0x19   :  { %6593 = shalt.err (!%p6590_p9)
}
  0x1a   :  { %60 = dma.hbm_to_vmem [thread:$0]  %s6965_s3, 36864, %s55_s9, [#allocation9], %s6725_s27, %s6725_s27, %s6726_s28  }
  0x1b   :  { %s6602_s15 = scalar_lea.vmem %s77_s11, 6144  ;;  %p6607_p11 = scmp.lt.s32.totalorder %s77_s11, %s77_s11 }
  0x1c   :  { %p6603_p10 = scmp.ne.s32.totalorder %s77_s11, %s6602_s15  ;;  %p6608_p12 = scmp.lt.s32.totalorder %s6602_s15, %s6602_s15 }
  0x1e   :  { %p6609_p13 = por %p6608_p12, %p6607_p11 }
  0x20   :  { %p6610_p0 = pnand %p6609_p13, %p6603_p10 }
  0x22   :  { %6613 = shalt.err (!%p6610_p0)
}
  0x23   :  { %s6729_s1 = smov 64   ;;  %s6730_s16 = smov 4  }
  0x24   :  { %82 = dma.hbm_to_vmem [thread:$0]  %s6967_s5, 6144, %s77_s11, [#allocation12], %s6729_s1, %s6729_s1, %s6730_s16  }
  0x25   :  { %s6731_s19 = smov [#allocation2]   ;;  %s6732_s21 = smov [#allocation7]  }
  0x26   :  { %s23_s20 = sshll.u32 %s6731_s19, 4  ;;  %s45_s22 = sshll.u32 %s6732_s21, 4  ;;  %s24_s20 = int_to_ptr.vmem [resolvable:$true] %s23_s20  ;;  %s46_s22 = int_to_ptr.vmem [resolvable:$true] %s45_s22 }
  0x27   :  { %s6622_s3 = scalar_lea.vmem %s24_s20, 768  ;;  %p6627_p2 = scmp.lt.s32.totalorder %s24_s20, %s24_s20 }
  0x28   :  { %p6623_p1 = scmp.ne.s32.totalorder %s24_s20, %s6622_s3  ;;  %p6628_p3 = scmp.lt.s32.totalorder %s6622_s3, %s6622_s3 }
  0x2a   :  { %p6629_p4 = por %p6628_p3, %p6627_p2 }
  0x2c   :  { %p6630_p5 = pnand %p6629_p4, %p6623_p1 }
  0x2e   :  { %6633 = shalt.err (!%p6630_p5)
}
  0x2f   :  { %26 = dma.hbm_to_vmem [thread:$0]  %s6962_s0, 768, %s24_s20, [#allocation3]  }
  0x30   :  { %s6642_s25 = scalar_lea.vmem %s46_s22, 96  ;;  %p6647_p7 = scmp.lt.s32.totalorder %s46_s22, %s46_s22 }
  0x31   :  { %p6643_p6 = scmp.ne.s32.totalorder %s46_s22, %s6642_s25  ;;  %p6648_p8 = scmp.lt.s32.totalorder %s6642_s25, %s6642_s25 }
  0x33   :  { %p6649_p9 = por %p6648_p8, %p6647_p7 }
  0x35   :  { %p6650_p10 = pnand %p6649_p9, %p6643_p6 }
  0x37   :  { %6653 = shalt.err (!%p6650_p10)
}
  0x38   :  { %48 = dma.hbm_to_vmem [thread:$0]  %s6964_s2, 96, %s46_s22, [#allocation6]  }
  0x39   :  { %s6733_s27 = smov [#allocation10]   ;;  %s6734_s29 = smov [#allocation13]  }
  0x3a   :  { %s67_s28 = sshll.u32 %s6733_s27, 4  ;;  %s89_s30 = sshll.u32 %s6734_s29, 4  ;;  %s68_s28 = int_to_ptr.vmem [resolvable:$true] %s67_s28  ;;  %s90_s30 = int_to_ptr.vmem [resolvable:$true] %s89_s30 }
  0x3b   :  { %s6662_s8 = scalar_lea.vmem %s68_s28, 96  ;;  %p6667_p12 = scmp.lt.s32.totalorder %s68_s28, %s68_s28 }
  0x3c   :  { %p6663_p11 = scmp.ne.s32.totalorder %s68_s28, %s6662_s8  ;;  %p6668_p13 = scmp.lt.s32.totalorder %s6662_s8, %s6662_s8 }
  0x3e   :  { %p6669_p0 = por %p6668_p13, %p6667_p12 }
  0x40   :  { %p6670_p1 = pnand %p6669_p0, %p6663_p11 }
  0x42   :  { %6673 = shalt.err (!%p6670_p1)
}
  0x43   :  { %70 = dma.hbm_to_vmem [thread:$0]  %s6966_s4, 96, %s68_s28, [#allocation9]  }
  0x44   :  { %s6682_s10 = scalar_lea.vmem %s90_s30, 16  ;;  %s6686_s2 = scalar_lea.vmem %s90_s30, 32 }
  0x45   :  { %p6683_p2 = scmp.ne.s32.totalorder %s90_s30, %s6682_s10  ;;  %p6687_p3 = scmp.lt.s32.totalorder %s90_s30, %s90_s30 }
  0x46   :  { %p6688_p4 = scmp.lt.s32.totalorder %s6686_s2, %s6682_s10 }
  0x48   :  { %p6689_p5 = por %p6688_p4, %p6687_p3 }
  0x4a   :  { %p6690_p6 = pnand %p6689_p5, %p6683_p2 }
  0x4c   :  { %6693 = shalt.err (!%p6690_p6)
}
  0x4d   :  { %92 = dma.hbm_to_vmem [thread:$0]  %s6968_s6, 16, %s90_s30, [#allocation12]  }
  0x4e   :  { %6714 = dma.done.wait [#allocation3], 768  }
  0x4f   :  { %6715 = vsyncadd [#allocation3], 4294966528 }
  0x50   :  { %6716 = dma.done.wait [#allocation6], 36960  }
  0x51   :  { %6717 = vsyncadd [#allocation6], 4294930336 }
  0x52   :  { %6718 = dma.done.wait [#allocation9], 36960  }
  0x53   :  { %6719 = vsyncadd [#allocation9], 4294930336 }
  0x54   :  { %6720 = dma.done.wait [#allocation12], 6160  }
  0x55   :  { %6721 = vsyncadd [#allocation12], 4294961136  ;;  %v5642_v0 = vld [vmem:[#allocation5 + $0x154] ss:$24 sps:$4 sm:$0xff]   ;;  %v5644_v1 = vld [vmem:[#allocation5 + $0x150] ss:$24 sps:$4 sm:$0xff]  }
  0x56   :  { %1887 = vmatprep.subr.bf16.mxu0 %v5642_v0  ;;  %v5645_v2 = vld [vmem:[#allocation5 + $0x454] ss:$24 sps:$4 sm:$0xff]   ;;  %v5647_v3 = vld [vmem:[#allocation5 + $0x450] ss:$24 sps:$4 sm:$0xff]   ;;  %v5648_v4 = vld [vmem:[#allocation5 + $0x124] ss:$24 sps:$4 sm:$0xff]  }
  0x57   :  { %1888 = vmatpush1.bf16.msra.mxu0 %v5644_v1  ;;  %v5650_v5 = vld [vmem:[#allocation5 + $0x120] ss:$24 sps:$4 sm:$0xff]   ;;  %1928 = vmatprep.subr.bf16.mxu1 %v5645_v2  ;;  %v5651_v6 = vld [vmem:[#allocation5 + $0x424] ss:$24 sps:$4 sm:$0xff]   ;;  %v5654_v8 = vld [vmem:[#allocation5 + $0xf4] ss:$24 sps:$4 sm:$0xff]  }
  0x58   :  { %1929 = vmatpush1.bf16.msra.mxu1 %v5647_v3  ;;  %1889 = vmatprep.subr.bf16.mxu0 %v5648_v4  ;;  %v5653_v7 = vld [vmem:[#allocation5 + $0x420] ss:$24 sps:$4 sm:$0xff]   ;;  %v5656_v9 = vld [vmem:[#allocation5 + $0xf0] ss:$24 sps:$4 sm:$0xff]   ;;  %v5657_v10 = vld [vmem:[#allocation5 + $0x3f4] ss:$24 sps:$4 sm:$0xff]  }
  0x59   :  { %1930 = vmatprep.subr.bf16.mxu1 %v5651_v6  ;;  %v5660_v11 = vld [vmem:[#allocation5 + $0xc4] ss:$24 sps:$4 sm:$0xff]   ;;  %v5659_v12 = vld [vmem:[#allocation5 + $0x3f0] ss:$24 sps:$4 sm:$0xff]   ;;  %v5662_v14 = vld [vmem:[#allocation5 + $0xc0] ss:$24 sps:$4 sm:$0xff]  }
  0x5a   :  { %v5663_v13 = vld [vmem:[#allocation5 + $0x3c4] ss:$24 sps:$4 sm:$0xff]   ;;  %v5666_v15 = vld [vmem:[#allocation5 + $0x94] ss:$24 sps:$4 sm:$0xff]   ;;  %v5665_v16 = vld [vmem:[#allocation5 + $0x3c0] ss:$24 sps:$4 sm:$0xff]  }
  0x5b   :  { %1890 = vmatpush1.bf16.msra.mxu0 %v5650_v5  ;;  %v5669_v17 = vld [vmem:[#allocation5 + $0x394] ss:$24 sps:$4 sm:$0xff]   ;;  %v5668_v18 = vld [vmem:[#allocation5 + $0x90] ss:$24 sps:$4 sm:$0xff]   ;;  %v5672_v19 = vld [vmem:[#allocation5 + $0x64] ss:$24 sps:$4 sm:$0xff]  }
  0x5c   :  { %1891 = vmatprep.subr.bf16.mxu0 %v5654_v8  ;;  %1931 = vmatpush1.bf16.msra.mxu1 %v5653_v7  ;;  %v5671_v20 = vld [vmem:[#allocation5 + $0x390] ss:$24 sps:$4 sm:$0xff]   ;;  %v5675_v21 = vld [vmem:[#allocation5 + $0x364] ss:$24 sps:$4 sm:$0xff]   ;;  %v5674_v22 = vld [vmem:[#allocation5 + $0x60] ss:$24 sps:$4 sm:$0xff]  }
  0x5d   :  { %1932 = vmatprep.subr.bf16.mxu1 %v5657_v10  ;;  %v5678_v23 = vld [vmem:[#allocation5 + $0x34] ss:$24 sps:$4 sm:$0xff]   ;;  %v5677_v24 = vld [vmem:[#allocation5 + $0x360] ss:$24 sps:$4 sm:$0xff]   ;;  %v5680_v26 = vld [vmem:[#allocation5 + $0x30] ss:$24 sps:$4 sm:$0xff]  }
  0x5e   :  { %v5681_v25 = vld [vmem:[#allocation5 + $0x334] ss:$24 sps:$4 sm:$0xff]   ;;  %v5684_v27 = vld [vmem:[#allocation5 + $0x4] ss:$24 sps:$4 sm:$0xff]   ;;  %v5683_v28 = vld [vmem:[#allocation5 + $0x330] ss:$24 sps:$4 sm:$0xff]  }
  0x5f   :  { %1892 = vmatpush1.bf16.msra.mxu0 %v5656_v9  ;;  %v5687_v29 = vld [vmem:[#allocation5 + $0x304] ss:$24 sps:$4 sm:$0xff]   ;;  %v5686_v30 = vld [vmem:[#allocation5] ss:$24 sps:$4 sm:$0xff]   ;;  %v5690_v31 = vld [vmem:[#allocation5 + $0x2d4] ss:$24 sps:$4 sm:$0xff]  }
  0x60   :  { %1893 = vmatprep.subr.bf16.mxu0 %v5660_v11  ;;  %1933 = vmatpush1.bf16.msra.mxu1 %v5659_v12  ;;  %v5689_v32 = vld [vmem:[#allocation5 + $0x300] ss:$24 sps:$4 sm:$0xff]   ;;  %v5693_v33 = vld [vmem:[#allocation5 + $0x5d4] ss:$24 sps:$4 sm:$0xff]   ;;  %v5692_v34 = vld [vmem:[#allocation5 + $0x2d0] ss:$24 sps:$4 sm:$0xff]  }
  0x61   :  { %1934 = vmatprep.subr.bf16.mxu1 %v5663_v13  ;;  %v5696_v35 = vld [vmem:[#allocation5 + $0x2a4] ss:$24 sps:$4 sm:$0xff]   ;;  %v5695_v36 = vld [vmem:[#allocation5 + $0x5d0] ss:$24 sps:$4 sm:$0xff]   ;;  %v5698_v38 = vld [vmem:[#allocation5 + $0x2a0] ss:$24 sps:$4 sm:$0xff]  }
  0x62   :  { %v5699_v37 = vld [vmem:[#allocation5 + $0x5a4] ss:$24 sps:$4 sm:$0xff]   ;;  %v5702_v39 = vld [vmem:[#allocation5 + $0x274] ss:$24 sps:$4 sm:$0xff]   ;;  %v5701_v40 = vld [vmem:[#allocation5 + $0x5a0] ss:$24 sps:$4 sm:$0xff]  }
  0x63   :  { %1894 = vmatpush1.bf16.msra.mxu0 %v5662_v14  ;;  %v5705_v41 = vld [vmem:[#allocation5 + $0x574] ss:$24 sps:$4 sm:$0xff]   ;;  %v5704_v42 = vld [vmem:[#allocation5 + $0x270] ss:$24 sps:$4 sm:$0xff]   ;;  %v5708_v43 = vld [vmem:[#allocation5 + $0x244] ss:$24 sps:$4 sm:$0xff]  }
  0x64   :  { %1895 = vmatprep.subr.bf16.mxu0 %v5666_v15  ;;  %1935 = vmatpush1.bf16.msra.mxu1 %v5665_v16  ;;  %v5707_v44 = vld [vmem:[#allocation5 + $0x570] ss:$24 sps:$4 sm:$0xff]   ;;  %v5711_v45 = vld [vmem:[#allocation5 + $0x544] ss:$24 sps:$4 sm:$0xff]   ;;  %v5710_v47 = vld [vmem:[#allocation5 + $0x240] ss:$24 sps:$4 sm:$0xff]  }
  0x65   :  { %1936 = vmatprep.subr.bf16.mxu1 %v5669_v17  ;;  %v116_v46 = vld [vmem:[#allocation2 + $0x8] sm:$0xff]  ;;  %v5714_v49 = vld [vmem:[#allocation5 + $0x214] ss:$24 sps:$4 sm:$0xff]   ;;  %v5716_v54 = vld [vmem:[#allocation5 + $0x210] ss:$24 sps:$4 sm:$0xff]   ;;  %s6735_s4 = smov [#allocation14]  }
  0x66   :  { %v6797_v48 = vpack.c.bf16 %v116_v46, %v116_v46  ;;  %v118_v50 = vld [vmem:[#allocation2 + $0x18] sm:$0xff]  ;;  %v5713_v51 = vld [vmem:[#allocation5 + $0x540] ss:$24 sps:$4 sm:$0xff]   ;;  %v5720_v55 = vld [vmem:[#allocation5 + $0x1e4] ss:$24 sps:$4 sm:$0xff]   ;;  %s4927_s6 = sshll.u32 %s6735_s4, 4  ;;  %s4928_s6 = int_to_ptr.vmem [resolvable:$true] %s4927_s6 }
  0x67   :  { %1896 = vmatpush1.bf16.msra.mxu0 %v5668_v18  ;;  %v6800_v52 = vpack.c.bf16 %v118_v50, %v118_v50  ;;  %v5717_v53 = vld [vmem:[#allocation5 + $0x514] ss:$24 sps:$4 sm:$0xff]   ;;  %v5719_v56 = vld [vmem:[#allocation5 + $0x510] ss:$24 sps:$4 sm:$0xff]   ;;  %v5723_v57 = vld [vmem:[#allocation5 + $0x4e4] ss:$24 sps:$4 sm:$0xff]   ;;  %p6699_p8 = scmp.lt.s32.totalorder %s4928_s6, %s4928_s6 }
  0x68   :  { %1897 = vmatprep.subr.bf16.mxu0 %v5672_v19  ;;  %1937 = vmatpush1.bf16.msra.mxu1 %v5671_v20  ;;  %v5722_v58 = vld [vmem:[#allocation5 + $0x1e0] ss:$24 sps:$4 sm:$0xff]   ;;  %v5726_v59 = vld [vmem:[#allocation5 + $0x1b4] ss:$24 sps:$4 sm:$0xff]   ;;  %v5728_v62 = vld [vmem:[#allocation5 + $0x1b0] ss:$24 sps:$4 sm:$0xff]  }
  0x69   :  { %1938 = vmatprep.subr.bf16.mxu1 %v5675_v21  ;;  %1919 = vmatprep.mubr.bf16.mxu0 %v6797_v48  ;;  %v5725_v60 = vld [vmem:[#allocation5 + $0x4e0] ss:$24 sps:$4 sm:$0xff]   ;;  %v5729_v61 = vld [vmem:[#allocation5 + $0x4b4] ss:$24 sps:$4 sm:$0xff]   ;;  %v5732_v63 = vld [vmem:[#allocation5 + $0x184] ss:$24 sps:$4 sm:$0xff]  }
  0x6a   :  { %1960 = vmatprep.mubr.bf16.mxu1 %v6800_v52  ;;  %v5731_v0 = vld [vmem:[#allocation5 + $0x4b0] ss:$24 sps:$4 sm:$0xff]   ;;  %v5734_v1 = vld [vmem:[#allocation5 + $0x180] ss:$24 sps:$4 sm:$0xff]   ;;  %v5735_v2 = vld [vmem:[#allocation5 + $0x484] ss:$24 sps:$4 sm:$0xff]  }
  0x6b   :  { %1898 = vmatpush1.bf16.msra.mxu0 %v5674_v22  ;;  %v5737_v3 = vld [vmem:[#allocation5 + $0x480] ss:$24 sps:$4 sm:$0xff]   ;;  %v115_v4 = vld [vmem:[#allocation2] sm:$0xff]  ;;  %v5746_v11 = vld [vmem:[#allocation5 + $0x724] ss:$24 sps:$4 sm:$0xff]   ;;  %s6694_s13 = scalar_lea.vmem %s4928_s6, 128 }
  0x6c   :  { %1899 = vmatprep.subr.bf16.mxu0 %v5678_v23  ;;  %1939 = vmatpush1.bf16.msra.mxu1 %v5677_v24  ;;  %v5740_v5 = vld [vmem:[#allocation5 + $0x754] ss:$24 sps:$4 sm:$0xff]   ;;  %v117_v6 = vld [vmem:[#allocation2 + $0x10] sm:$0xff]  ;;  %v6803_v7 = vpack.c.bf16 %v115_v4, %v115_v4  ;;  %v5738_v9 = vld [vmem:[#allocation5 + $0x750] ss:$24 sps:$4 sm:$0xff]   ;;  %p6695_p7 = scmp.ne.s32.totalorder %s4928_s6, %s6694_s13  ;;  %p6700_p9 = scmp.lt.s32.totalorder %s6694_s13, %s6694_s13 }
  0x6d   :  { %1940 = vmatprep.subr.bf16.mxu1 %v5681_v25  ;;  %v5743_v8 = vld [vmem:[#allocation5 + $0x15c] ss:$24 sps:$4 sm:$0xff]   ;;  %v6805_v10 = vpack.c.bf16 %v117_v6, %v117_v6  ;;  %v5741_v12 = vld [vmem:[#allocation5 + $0x158] ss:$24 sps:$4 sm:$0xff]   ;;  %v5749_v13 = vld [vmem:[#allocation5 + $0x12c] ss:$24 sps:$4 sm:$0xff]  }
  0x6e   :  { %v5744_v14 = vld [vmem:[#allocation5 + $0x720] ss:$24 sps:$4 sm:$0xff]   ;;  %v5752_v15 = vld [vmem:[#allocation5 + $0x6f4] ss:$24 sps:$4 sm:$0xff]   ;;  %v5750_v18 = vld [vmem:[#allocation5 + $0x6f0] ss:$24 sps:$4 sm:$0xff]   ;;  %p6701_p10 = por %p6700_p9, %p6699_p8 }
  0x6f   :  { %1900 = vmatpush1.bf16.msra.mxu0 %v5680_v26  ;;  %v5747_v16 = vld [vmem:[#allocation5 + $0x128] ss:$24 sps:$4 sm:$0xff]   ;;  %v5755_v17 = vld [vmem:[#allocation5 + $0xfc] ss:$24 sps:$4 sm:$0xff]   ;;  %v5753_v20 = vld [vmem:[#allocation5 + $0xf8] ss:$24 sps:$4 sm:$0xff]  }
  0x70   :  { %1901 = vmatprep.subr.bf16.mxu0 %v5684_v27  ;;  %1941 = vmatpush1.bf16.msra.mxu1 %v5683_v28  ;;  %v5758_v19 = vld [vmem:[#allocation5 + $0x6c4] ss:$24 sps:$4 sm:$0xff]   ;;  %v5756_v22 = vld [vmem:[#allocation5 + $0x6c0] ss:$24 sps:$4 sm:$0xff]   ;;  %v5764_v23 = vld [vmem:[#allocation5 + $0x694] ss:$24 sps:$4 sm:$0xff]   ;;  %p6702_p11 = pnand %p6701_p10, %p6695_p7 }
  0x71   :  { %1942 = vmatprep.subr.bf16.mxu1 %v5687_v29  ;;  %v5761_v21 = vld [vmem:[#allocation5 + $0xcc] ss:$24 sps:$4 sm:$0xff]   ;;  %v5759_v24 = vld [vmem:[#allocation5 + $0xc8] ss:$24 sps:$4 sm:$0xff]   ;;  %v5767_v25 = vld [vmem:[#allocation5 + $0x9c] ss:$24 sps:$4 sm:$0xff]  }
  0x72   :  { %v5762_v26 = vld [vmem:[#allocation5 + $0x690] ss:$24 sps:$4 sm:$0xff]   ;;  %v5770_v27 = vld [vmem:[#allocation5 + $0x664] ss:$24 sps:$4 sm:$0xff]   ;;  %v5800_v50 = vld [vmem:[#allocation5 + $0x874] ss:$24 sps:$4 sm:$0xff]  }
  0x73   :  { %1902 = vmatpush1.bf16.msra.mxu0 %v5686_v30  ;;  %v5765_v28 = vld [vmem:[#allocation5 + $0x98] ss:$24 sps:$4 sm:$0xff]   ;;  %v5773_v29 = vld [vmem:[#allocation5 + $0x6c] ss:$24 sps:$4 sm:$0xff]   ;;  %v5819_v4 = vld [vmem:[#allocation5 + $0x1e8] ss:$24 sps:$4 sm:$0xff]  }
  0x74   :  { %1903 = vmatprep.subr.bf16.mxu0 %v5690_v31  ;;  %1943 = vmatpush1.bf16.msra.mxu1 %v5689_v32  ;;  %v5768_v30 = vld [vmem:[#allocation5 + $0x660] ss:$24 sps:$4 sm:$0xff]   ;;  %v5776_v31 = vld [vmem:[#allocation5 + $0x634] ss:$24 sps:$4 sm:$0xff]   ;;  %v5822_v6 = vld [vmem:[#allocation5 + $0x7b0] ss:$24 sps:$4 sm:$0xff]  }
  0x75   :  { %1944 = vmatprep.subr.bf16.mxu1 %v5693_v33  ;;  %v5771_v32 = vld [vmem:[#allocation5 + $0x68] ss:$24 sps:$4 sm:$0xff]   ;;  %v5779_v33 = vld [vmem:[#allocation5 + $0x3c] ss:$24 sps:$4 sm:$0xff]   ;;  %v5789_v46 = vld [vmem:[#allocation5 + $0x2d8] ss:$24 sps:$4 sm:$0xff]  }
  0x77   :  { %1904 = vmatpush2.bf16.msra.mxu0 %v5692_v34  ;;  %v120_v34 = vld [vmem:[#allocation2 + $0x28] sm:$0xff] }
  0x78   :  { %1905 = vmatprep.subr.bf16.mxu0 %v5696_v35  ;;  %1945 = vmatpush2.bf16.msra.mxu1 %v5695_v36  ;;  %v5774_v35 = vld [vmem:[#allocation5 + $0x630] ss:$24 sps:$4 sm:$0xff]   ;;  %v6810_v36 = vpack.c.bf16 %v120_v34, %v120_v34 }
  0x79   :  { %1946 = vmatprep.subr.bf16.mxu1 %v5699_v37  ;;  %v5782_v37 = vld [vmem:[#allocation5 + $0x604] ss:$24 sps:$4 sm:$0xff]   ;;  %v5858_v34 = vld [vmem:[#allocation5 + $0x398] ss:$24 sps:$4 sm:$0xff]  }
  0x7b   :  { %1906 = vmatpush2.bf16.msra.mxu0 %v5698_v38  ;;  %v5777_v38 = vld [vmem:[#allocation5 + $0x38] ss:$24 sps:$4 sm:$0xff]  }
  0x7c   :  { %1907 = vmatprep.subr.bf16.mxu0 %v5702_v39  ;;  %1947 = vmatpush2.bf16.msra.mxu1 %v5701_v40  ;;  %v5785_v39 = vld [vmem:[#allocation5 + $0xc] ss:$24 sps:$4 sm:$0xff]   ;;  %v5780_v40 = vld [vmem:[#allocation5 + $0x600] ss:$24 sps:$4 sm:$0xff]  }
  0x7d   :  { %1948 = vmatprep.subr.bf16.mxu1 %v5705_v41  ;;  %v5788_v41 = vld [vmem:[#allocation5 + $0x8d4] ss:$24 sps:$4 sm:$0xff]  }
  0x7f   :  { %1908 = vmatpush2.bf16.msra.mxu0 %v5704_v42  ;;  %v5783_v42 = vld [vmem:[#allocation5 + $0x8] ss:$24 sps:$4 sm:$0xff]  }
  0x80   :  { %1909 = vmatprep.subr.bf16.mxu0 %v5708_v43  ;;  %1949 = vmatpush2.bf16.msra.mxu1 %v5707_v44  ;;  %v5791_v43 = vld [vmem:[#allocation5 + $0x2dc] ss:$24 sps:$4 sm:$0xff]   ;;  %v5786_v44 = vld [vmem:[#allocation5 + $0x8d0] ss:$24 sps:$4 sm:$0xff]  }
  0x81   :  { %1950 = vmatprep.subr.bf16.mxu1 %v5711_v45  ;;  %v5794_v45 = vld [vmem:[#allocation5 + $0x8a4] ss:$24 sps:$4 sm:$0xff]  }
  0x83   :  { %1910 = vmatpush2.bf16.msra.mxu0 %v5710_v47  ;;  %v5797_v47 = vld [vmem:[#allocation5 + $0x2ac] ss:$24 sps:$4 sm:$0xff]  }
  0x84   :  { %1911 = vmatprep.subr.bf16.mxu0 %v5714_v49  ;;  %1951 = vmatpush2.bf16.msra.mxu1 %v5713_v51  ;;  %v5792_v49 = vld [vmem:[#allocation5 + $0x8a0] ss:$24 sps:$4 sm:$0xff]  }
  0x85   :  { %1952 = vmatprep.subr.bf16.mxu1 %v5717_v53  ;;  %v5795_v51 = vld [vmem:[#allocation5 + $0x2a8] ss:$24 sps:$4 sm:$0xff]   ;;  %v5803_v53 = vld [vmem:[#allocation5 + $0x27c] ss:$24 sps:$4 sm:$0xff]  }
  0x87   :  { %1912 = vmatpush2.bf16.msra.mxu0 %v5716_v54  ;;  %v5798_v54 = vld [vmem:[#allocation5 + $0x870] ss:$24 sps:$4 sm:$0xff]  }
  0x88   :  { %1913 = vmatprep.subr.bf16.mxu0 %v5720_v55  ;;  %1953 = vmatpush2.bf16.msra.mxu1 %v5719_v56  ;;  %v5806_v55 = vld [vmem:[#allocation5 + $0x844] ss:$24 sps:$4 sm:$0xff]   ;;  %v5801_v56 = vld [vmem:[#allocation5 + $0x278] ss:$24 sps:$4 sm:$0xff]  }
  0x89   :  { %1954 = vmatprep.subr.bf16.mxu1 %v5723_v57  ;;  %v5809_v57 = vld [vmem:[#allocation5 + $0x24c] ss:$24 sps:$4 sm:$0xff]  }
  0x8b   :  { %1914 = vmatpush2.bf16.msra.mxu0 %v5722_v58  ;;  %v5804_v58 = vld [vmem:[#allocation5 + $0x840] ss:$24 sps:$4 sm:$0xff]  }
  0x8c   :  { %1915 = vmatprep.subr.bf16.mxu0 %v5726_v59  ;;  %1955 = vmatpush2.bf16.msra.mxu1 %v5725_v60  ;;  %v5812_v59 = vld [vmem:[#allocation5 + $0x814] ss:$24 sps:$4 sm:$0xff]   ;;  %v5807_v60 = vld [vmem:[#allocation5 + $0x248] ss:$24 sps:$4 sm:$0xff]  }
  0x8d   :  { %1956 = vmatprep.subr.bf16.mxu1 %v5729_v61  ;;  %v5815_v61 = vld [vmem:[#allocation5 + $0x21c] ss:$24 sps:$4 sm:$0xff]  }
  0x8f   :  { %1916 = vmatpush2.bf16.msra.mxu0 %v5728_v62  ;;  %v5810_v62 = vld [vmem:[#allocation5 + $0x810] ss:$24 sps:$4 sm:$0xff]  }
  0x90   :  { %1917 = vmatprep.subr.bf16.mxu0 %v5732_v63  ;;  %1957 = vmatpush2.bf16.msra.mxu1 %v5731_v0  ;;  %v5818_v63 = vld [vmem:[#allocation5 + $0x7e4] ss:$24 sps:$4 sm:$0xff]   ;;  %v5813_v0 = vld [vmem:[#allocation5 + $0x218] ss:$24 sps:$4 sm:$0xff]  }
  0x91   :  { %1958 = vmatprep.subr.bf16.mxu1 %v5735_v2  ;;  %v5816_v2 = vld [vmem:[#allocation5 + $0x7e0] ss:$24 sps:$4 sm:$0xff]  }
  0x93   :  { %1918 = vmatpush2.bf16.msra.mxu0 %v5734_v1  ;;  %v5821_v1 = vld [vmem:[#allocation5 + $0x1ec] ss:$24 sps:$4 sm:$0xff]  }
  0x94   :  { %1969 = vmatprep.subr.bf16.mxu0 %v5740_v5  ;;  %1959 = vmatpush2.bf16.msra.mxu1 %v5737_v3  ;;  %v5824_v3 = vld [vmem:[#allocation5 + $0x7b4] ss:$24 sps:$4 sm:$0xff]  }
  0x95   :  { %2010 = vmatprep.subr.bf16.mxu1 %v5743_v8  ;;  %v5827_v5 = vld [vmem:[#allocation5 + $0x1bc] ss:$24 sps:$4 sm:$0xff]  }
  0x96   :  { %1920 = vmatmul.mubr.bf16.vlgmr.msra.gmra.mxu0 %v6803_v7  ;;  %v5830_v8 = vld [vmem:[#allocation5 + $0x784] ss:$24 sps:$4 sm:$0xff]  }
  0x97   :  { %1970 = vmatpush1.bf16.msra.mxu0 %v5738_v9  ;;  %1961 = vmatmul.mubr.bf16.vlgmr.msra.gmra.mxu1 %v6805_v10  ;;  %v5825_v9 = vld [vmem:[#allocation5 + $0x1b8] ss:$24 sps:$4 sm:$0xff]  }
  0x98   :  { %1971 = vmatprep.subr.bf16.mxu0 %v5746_v11  ;;  %2011 = vmatpush1.bf16.msra.mxu1 %v5741_v12  ;;  %v5828_v11 = vld [vmem:[#allocation5 + $0x780] ss:$24 sps:$4 sm:$0xff]   ;;  %v5833_v12 = vld [vmem:[#allocation5 + $0x18c] ss:$24 sps:$4 sm:$0xff]  }
  0x99   :  { %2042 = vmatprep.mubr.bf16.mxu1 %v6797_v48  ;;  %2012 = vmatprep.subr.bf16.mxu1 %v5749_v13  ;;  %v119_v13 = vld [vmem:[#allocation2 + $0x20] sm:$0xff] }
  0x9a   :  { %2001 = vmatprep.mubr.bf16.mxu0 %v6810_v36 }
  0x9b   :  { %1972 = vmatpush1.bf16.msra.mxu0 %v5744_v14  ;;  %v5836_v14 = vld [vmem:[#allocation5 + $0x45c] ss:$24 sps:$4 sm:$0xff]  }
  0x9c   :  { %1973 = vmatprep.subr.bf16.mxu0 %v5752_v15  ;;  %2013 = vmatpush1.bf16.msra.mxu1 %v5747_v16  ;;  %v5831_v15 = vld [vmem:[#allocation5 + $0x188] ss:$24 sps:$4 sm:$0xff]   ;;  %v6813_v16 = vpack.c.bf16 %v119_v13, %v119_v13 }
  0x9d   :  { %2014 = vmatprep.subr.bf16.mxu1 %v5755_v17  ;;  %v5839_v17 = vld [vmem:[#allocation5 + $0x75c] ss:$24 sps:$4 sm:$0xff]   ;;  %v5915_v13 = vld [vmem:[#allocation5 + $0x7e8] ss:$24 sps:$4 sm:$0xff]  }
  0x9f   :  { %1974 = vmatpush1.bf16.msra.mxu0 %v5750_v18  ;;  %v5834_v18 = vld [vmem:[#allocation5 + $0x458] ss:$24 sps:$4 sm:$0xff]  }
  0xa0   :  { %1975 = vmatprep.subr.bf16.mxu0 %v5758_v19  ;;  %2015 = vmatpush1.bf16.msra.mxu1 %v5753_v20  ;;  %v5842_v19 = vld [vmem:[#allocation5 + $0x42c] ss:$24 sps:$4 sm:$0xff]   ;;  %v5837_v20 = vld [vmem:[#allocation5 + $0x758] ss:$24 sps:$4 sm:$0xff]  }
  0xa1   :  { %2016 = vmatprep.subr.bf16.mxu1 %v5761_v21  ;;  %v5845_v21 = vld [vmem:[#allocation5 + $0x72c] ss:$24 sps:$4 sm:$0xff]  }
  0xa3   :  { %1976 = vmatpush1.bf16.msra.mxu0 %v5756_v22  ;;  %v5840_v22 = vld [vmem:[#allocation5 + $0x428] ss:$24 sps:$4 sm:$0xff]  }
  0xa4   :  { %1977 = vmatprep.subr.bf16.mxu0 %v5764_v23  ;;  %2017 = vmatpush1.bf16.msra.mxu1 %v5759_v24  ;;  %v5848_v23 = vld [vmem:[#allocation5 + $0x3fc] ss:$24 sps:$4 sm:$0xff]   ;;  %v5843_v24 = vld [vmem:[#allocation5 + $0x728] ss:$24 sps:$4 sm:$0xff]  }
  0xa5   :  { %2018 = vmatprep.subr.bf16.mxu1 %v5767_v25  ;;  %v5851_v25 = vld [vmem:[#allocation5 + $0x6fc] ss:$24 sps:$4 sm:$0xff]  }
  0xa7   :  { %1978 = vmatpush1.bf16.msra.mxu0 %v5762_v26  ;;  %v5846_v26 = vld [vmem:[#allocation5 + $0x3f8] ss:$24 sps:$4 sm:$0xff]  }
  0xa8   :  { %1979 = vmatprep.subr.bf16.mxu0 %v5770_v27  ;;  %2019 = vmatpush1.bf16.msra.mxu1 %v5765_v28  ;;  %v5854_v27 = vld [vmem:[#allocation5 + $0x3cc] ss:$24 sps:$4 sm:$0xff]   ;;  %v5849_v28 = vld [vmem:[#allocation5 + $0x6f8] ss:$24 sps:$4 sm:$0xff]  }
  0xa9   :  { %2020 = vmatprep.subr.bf16.mxu1 %v5773_v29  ;;  %v5857_v29 = vld [vmem:[#allocation5 + $0x6cc] ss:$24 sps:$4 sm:$0xff]  }
  0xab   :  { %1980 = vmatpush1.bf16.msra.mxu0 %v5768_v30  ;;  %v5852_v30 = vld [vmem:[#allocation5 + $0x3c8] ss:$24 sps:$4 sm:$0xff]  }
  0xac   :  { %1981 = vmatprep.subr.bf16.mxu0 %v5776_v31  ;;  %2021 = vmatpush1.bf16.msra.mxu1 %v5771_v32  ;;  %v5860_v31 = vld [vmem:[#allocation5 + $0x39c] ss:$24 sps:$4 sm:$0xff]   ;;  %v5855_v32 = vld [vmem:[#allocation5 + $0x6c8] ss:$24 sps:$4 sm:$0xff]  }
  0xad   :  { %2022 = vmatprep.subr.bf16.mxu1 %v5779_v33  ;;  %v5863_v33 = vld [vmem:[#allocation5 + $0x69c] ss:$24 sps:$4 sm:$0xff]  }
  0xaf   :  { %1982 = vmatpush1.bf16.msra.mxu0 %v5774_v35  ;;  %v5866_v35 = vld [vmem:[#allocation5 + $0x36c] ss:$24 sps:$4 sm:$0xff]  }
  0xb0   :  { %1983 = vmatprep.subr.bf16.mxu0 %v5782_v37  ;;  %2023 = vmatpush1.bf16.msra.mxu1 %v5777_v38  ;;  %v5861_v37 = vld [vmem:[#allocation5 + $0x698] ss:$24 sps:$4 sm:$0xff]   ;;  %v5869_v38 = vld [vmem:[#allocation5 + $0x66c] ss:$24 sps:$4 sm:$0xff]  }
  0xb1   :  { %2024 = vmatprep.subr.bf16.mxu1 %v5785_v39  ;;  %v5864_v39 = vld [vmem:[#allocation5 + $0x368] ss:$24 sps:$4 sm:$0xff]  }
  0xb3   :  { %1984 = vmatpush1.bf16.msra.mxu0 %v5780_v40  ;;  %v5872_v40 = vld [vmem:[#allocation5 + $0x33c] ss:$24 sps:$4 sm:$0xff]  }
  0xb4   :  { %1985 = vmatprep.subr.bf16.mxu0 %v5788_v41  ;;  %2025 = vmatpush1.bf16.msra.mxu1 %v5783_v42  ;;  %v5867_v41 = vld [vmem:[#allocation5 + $0x668] ss:$24 sps:$4 sm:$0xff]   ;;  %v5875_v42 = vld [vmem:[#allocation5 + $0x63c] ss:$24 sps:$4 sm:$0xff]  }
  0xb5   :  { %2026 = vmatprep.subr.bf16.mxu1 %v5791_v43  ;;  %v5870_v43 = vld [vmem:[#allocation5 + $0x338] ss:$24 sps:$4 sm:$0xff]  }
  0xb7   :  { %1986 = vmatpush2.bf16.msra.mxu0 %v5786_v44  ;;  %v5878_v44 = vld [vmem:[#allocation5 + $0x30c] ss:$24 sps:$4 sm:$0xff]  }
  0xb8   :  { %1987 = vmatprep.subr.bf16.mxu0 %v5794_v45  ;;  %2027 = vmatpush2.bf16.msra.mxu1 %v5789_v46  ;;  %v5873_v45 = vld [vmem:[#allocation5 + $0x638] ss:$24 sps:$4 sm:$0xff]   ;;  %v5881_v46 = vld [vmem:[#allocation5 + $0x60c] ss:$24 sps:$4 sm:$0xff]  }
  0xb9   :  { %2028 = vmatprep.subr.bf16.mxu1 %v5797_v47  ;;  %v5876_v47 = vld [vmem:[#allocation5 + $0x308] ss:$24 sps:$4 sm:$0xff]  }
  0xbb   :  { %1988 = vmatpush2.bf16.msra.mxu0 %v5792_v49  ;;  %v5884_v49 = vld [vmem:[#allocation5 + $0x5dc] ss:$24 sps:$4 sm:$0xff]  }
  0xbc   :  { %1989 = vmatprep.subr.bf16.mxu0 %v5800_v50  ;;  %2029 = vmatpush2.bf16.msra.mxu1 %v5795_v51  ;;  %v5879_v50 = vld [vmem:[#allocation5 + $0x608] ss:$24 sps:$4 sm:$0xff]   ;;  %v5887_v51 = vld [vmem:[#allocation5 + $0x8dc] ss:$24 sps:$4 sm:$0xff]  }
  0xbd   :  { %2030 = vmatprep.subr.bf16.mxu1 %v5803_v53  ;;  %v5882_v53 = vld [vmem:[#allocation5 + $0x5d8] ss:$24 sps:$4 sm:$0xff]  }
  0xbf   :  { %1990 = vmatpush2.bf16.msra.mxu0 %v5798_v54  ;;  %v5890_v54 = vld [vmem:[#allocation5 + $0x5ac] ss:$24 sps:$4 sm:$0xff]  }
  0xc0   :  { %1991 = vmatprep.subr.bf16.mxu0 %v5806_v55  ;;  %2031 = vmatpush2.bf16.msra.mxu1 %v5801_v56  ;;  %v5885_v55 = vld [vmem:[#allocation5 + $0x8d8] ss:$24 sps:$4 sm:$0xff]   ;;  %v5893_v56 = vld [vmem:[#allocation5 + $0x8ac] ss:$24 sps:$4 sm:$0xff]  }
  0xc1   :  { %2032 = vmatprep.subr.bf16.mxu1 %v5809_v57  ;;  %v5888_v57 = vld [vmem:[#allocation5 + $0x5a8] ss:$24 sps:$4 sm:$0xff]  }
  0xc3   :  { %1992 = vmatpush2.bf16.msra.mxu0 %v5804_v58  ;;  %v5896_v58 = vld [vmem:[#allocation5 + $0x57c] ss:$24 sps:$4 sm:$0xff]  }
  0xc4   :  { %1993 = vmatprep.subr.bf16.mxu0 %v5812_v59  ;;  %2033 = vmatpush2.bf16.msra.mxu1 %v5807_v60  ;;  %v5891_v59 = vld [vmem:[#allocation5 + $0x8a8] ss:$24 sps:$4 sm:$0xff]   ;;  %v5899_v60 = vld [vmem:[#allocation5 + $0x87c] ss:$24 sps:$4 sm:$0xff]  }
  0xc5   :  { %2034 = vmatprep.subr.bf16.mxu1 %v5815_v61  ;;  %v5894_v61 = vld [vmem:[#allocation5 + $0x578] ss:$24 sps:$4 sm:$0xff]  }
  0xc7   :  { %1994 = vmatpush2.bf16.msra.mxu0 %v5810_v62  ;;  %v5902_v62 = vld [vmem:[#allocation5 + $0x54c] ss:$24 sps:$4 sm:$0xff]  }
  0xc8   :  { %1995 = vmatprep.subr.bf16.mxu0 %v5818_v63  ;;  %2035 = vmatpush2.bf16.msra.mxu1 %v5813_v0  ;;  %v5897_v63 = vld [vmem:[#allocation5 + $0x878] ss:$24 sps:$4 sm:$0xff]   ;;  %v5905_v0 = vld [vmem:[#allocation5 + $0x84c] ss:$24 sps:$4 sm:$0xff]  }
  0xc9   :  { %2036 = vmatprep.subr.bf16.mxu1 %v5821_v1  ;;  %v5900_v1 = vld [vmem:[#allocation5 + $0x548] ss:$24 sps:$4 sm:$0xff]  }
  0xcb   :  { %1996 = vmatpush2.bf16.msra.mxu0 %v5816_v2  ;;  %v5908_v2 = vld [vmem:[#allocation5 + $0x51c] ss:$24 sps:$4 sm:$0xff]  }
  0xcc   :  { %1997 = vmatprep.subr.bf16.mxu0 %v5824_v3  ;;  %2037 = vmatpush2.bf16.msra.mxu1 %v5819_v4  ;;  %v5903_v3 = vld [vmem:[#allocation5 + $0x848] ss:$24 sps:$4 sm:$0xff]   ;;  %v5911_v4 = vld [vmem:[#allocation5 + $0x81c] ss:$24 sps:$4 sm:$0xff]  }
  0xcd   :  { %2038 = vmatprep.subr.bf16.mxu1 %v5827_v5  ;;  %v5906_v5 = vld [vmem:[#allocation5 + $0x518] ss:$24 sps:$4 sm:$0xff]  }
  0xcf   :  { %1998 = vmatpush2.bf16.msra.mxu0 %v5822_v6  ;;  %v5914_v6 = vld [vmem:[#allocation5 + $0x4ec] ss:$24 sps:$4 sm:$0xff]  }
  0xd0   :  { %1999 = vmatprep.subr.bf16.mxu0 %v5830_v8  ;;  %2039 = vmatpush2.bf16.msra.mxu1 %v5825_v9  ;;  %v5909_v8 = vld [vmem:[#allocation5 + $0x818] ss:$24 sps:$4 sm:$0xff]   ;;  %v5917_v9 = vld [vmem:[#allocation5 + $0x7ec] ss:$24 sps:$4 sm:$0xff]  }
  0xd1   :  { %2040 = vmatprep.subr.bf16.mxu1 %v5833_v12  ;;  %v5920_v12 = vld [vmem:[#allocation5 + $0x4bc] ss:$24 sps:$4 sm:$0xff]  }
  0xd3   :  { %2000 = vmatpush2.bf16.msra.mxu0 %v5828_v11  ;;  %v5912_v11 = vld [vmem:[#allocation5 + $0x4e8] ss:$24 sps:$4 sm:$0xff]  }
  0xd4   :  { %2051 = vmatprep.subr.bf16.mxu0 %v5836_v14  ;;  %2041 = vmatpush2.bf16.msra.mxu1 %v5831_v15  ;;  %v5923_v14 = vld [vmem:[#allocation5 + $0x7bc] ss:$24 sps:$4 sm:$0xff]   ;;  %v5918_v15 = vld [vmem:[#allocation5 + $0x4b8] ss:$24 sps:$4 sm:$0xff]  }
  0xd5   :  { %2092 = vmatprep.subr.bf16.mxu1 %v5839_v17  ;;  %v5926_v17 = vld [vmem:[#allocation5 + $0x48c] ss:$24 sps:$4 sm:$0xff]  }
  0xd6   :  { %2002 = vmatmul.mubr.bf16.vlgmr.msra.gmra.mxu0 %v6813_v16 }
  0xd7   :  { %2052 = vmatpush1.bf16.msra.mxu0 %v5834_v18  ;;  %2083 = vmatprep.mubr.bf16.mxu0 %v6800_v52  ;;  %v5921_v18 = vld [vmem:[#allocation5 + $0x7b8] ss:$24 sps:$4 sm:$0xff]  }
  0xd8   :  { %2043 = vmatmul.mubr.bf16.vlgmr.msra.gmra.mxu1 %v6803_v7  ;;  %2053 = vmatprep.subr.bf16.mxu0 %v5842_v19  ;;  %v5929_v19 = vld [vmem:[#allocation5 + $0x78c] ss:$24 sps:$4 sm:$0xff]  }
  0xd9   :  { %2093 = vmatpush1.bf16.msra.mxu1 %v5837_v20  ;;  %2124 = vmatprep.mubr.bf16.mxu1 %v6810_v36  ;;  %v5924_v20 = vld [vmem:[#allocation5 + $0x488] ss:$24 sps:$4 sm:$0xff]  }
  0xda   :  { %2094 = vmatprep.subr.bf16.mxu1 %v5845_v21  ;;  %v5932_v21 = vld [vmem:[#allocation5 + $0x164] ss:$24 sps:$4 sm:$0xff]  }
  0xdb   :  { %2054 = vmatpush1.bf16.msra.mxu0 %v5840_v22  ;;  %v5927_v22 = vld [vmem:[#allocation5 + $0x788] ss:$24 sps:$4 sm:$0xff]  }
  0xdc   :  { %2055 = vmatprep.subr.bf16.mxu0 %v5848_v23  ;;  %v5935_v23 = vld [vmem:[#allocation5 + $0x464] ss:$24 sps:$4 sm:$0xff]  }
  0xdd   :  { %2095 = vmatpush1.bf16.msra.mxu1 %v5843_v24  ;;  %v5930_v24 = vld [vmem:[#allocation5 + $0x160] ss:$24 sps:$4 sm:$0xff]  }
  0xde   :  { %2096 = vmatprep.subr.bf16.mxu1 %v5851_v25  ;;  %v5938_v25 = vld [vmem:[#allocation5 + $0x134] ss:$24 sps:$4 sm:$0xff]  }
  0xdf   :  { %2056 = vmatpush1.bf16.msra.mxu0 %v5846_v26  ;;  %v5933_v26 = vld [vmem:[#allocation5 + $0x460] ss:$24 sps:$4 sm:$0xff]  }
  0xe0   :  { %2057 = vmatprep.subr.bf16.mxu0 %v5854_v27  ;;  %v5941_v27 = vld [vmem:[#allocation5 + $0x434] ss:$24 sps:$4 sm:$0xff]  }
  0xe1   :  { %2097 = vmatpush1.bf16.msra.mxu1 %v5849_v28  ;;  %v5936_v28 = vld [vmem:[#allocation5 + $0x130] ss:$24 sps:$4 sm:$0xff]  }
  0xe2   :  { %2098 = vmatprep.subr.bf16.mxu1 %v5857_v29  ;;  %v5944_v29 = vld [vmem:[#allocation5 + $0x104] ss:$24 sps:$4 sm:$0xff]  }
  0xe3   :  { %2058 = vmatpush1.bf16.msra.mxu0 %v5852_v30  ;;  %v5939_v30 = vld [vmem:[#allocation5 + $0x430] ss:$24 sps:$4 sm:$0xff]  }
  0xe4   :  { %2059 = vmatprep.subr.bf16.mxu0 %v5860_v31  ;;  %v5947_v31 = vld [vmem:[#allocation5 + $0x404] ss:$24 sps:$4 sm:$0xff]  }
  0xe5   :  { %2099 = vmatpush1.bf16.msra.mxu1 %v5855_v32  ;;  %v5942_v32 = vld [vmem:[#allocation5 + $0x100] ss:$24 sps:$4 sm:$0xff]  }
  0xe6   :  { %2100 = vmatprep.subr.bf16.mxu1 %v5863_v33  ;;  %v5950_v33 = vld [vmem:[#allocation5 + $0xd4] ss:$24 sps:$4 sm:$0xff]  }
  0xe7   :  { %2060 = vmatpush1.bf16.msra.mxu0 %v5858_v34  ;;  %v5945_v34 = vld [vmem:[#allocation5 + $0x400] ss:$24 sps:$4 sm:$0xff]  }
  0xe8   :  { %2061 = vmatprep.subr.bf16.mxu0 %v5866_v35  ;;  %v5953_v35 = vld [vmem:[#allocation5 + $0x3d4] ss:$24 sps:$4 sm:$0xff]  }
  0xe9   :  { %2101 = vmatpush1.bf16.msra.mxu1 %v5861_v37  ;;  %v5956_v37 = vld [vmem:[#allocation5 + $0xa4] ss:$24 sps:$4 sm:$0xff]  }
  0xea   :  { %2102 = vmatprep.subr.bf16.mxu1 %v5869_v38  ;;  %v5951_v38 = vld [vmem:[#allocation5 + $0x3d0] ss:$24 sps:$4 sm:$0xff]  }
  0xeb   :  { %2062 = vmatpush1.bf16.msra.mxu0 %v5864_v39  ;;  %v5959_v39 = vld [vmem:[#allocation5 + $0x3a4] ss:$24 sps:$4 sm:$0xff]  }
  0xec   :  { %2063 = vmatprep.subr.bf16.mxu0 %v5872_v40  ;;  %v5962_v40 = vld [vmem:[#allocation5 + $0x74] ss:$24 sps:$4 sm:$0xff]  }
  0xed   :  { %2103 = vmatpush1.bf16.msra.mxu1 %v5867_v41  ;;  %v5957_v41 = vld [vmem:[#allocation5 + $0x3a0] ss:$24 sps:$4 sm:$0xff]  }
  0xee   :  { %2104 = vmatprep.subr.bf16.mxu1 %v5875_v42  ;;  %v5965_v42 = vld [vmem:[#allocation5 + $0x374] ss:$24 sps:$4 sm:$0xff]  }
  0xef   :  { %2064 = vmatpush1.bf16.msra.mxu0 %v5870_v43  ;;  %v5960_v43 = vld [vmem:[#allocation5 + $0x70] ss:$24 sps:$4 sm:$0xff]  }
  0xf0   :  { %2065 = vmatprep.subr.bf16.mxu0 %v5878_v44  ;;  %v5968_v44 = vld [vmem:[#allocation5 + $0x44] ss:$24 sps:$4 sm:$0xff]  }
  0xf1   :  { %2105 = vmatpush1.bf16.msra.mxu1 %v5873_v45  ;;  %v5963_v45 = vld [vmem:[#allocation5 + $0x370] ss:$24 sps:$4 sm:$0xff]  }
  0xf2   :  { %2106 = vmatprep.subr.bf16.mxu1 %v5881_v46  ;;  %v5971_v46 = vld [vmem:[#allocation5 + $0x344] ss:$24 sps:$4 sm:$0xff]  }
  0xf3   :  { %2066 = vmatpush1.bf16.msra.mxu0 %v5876_v47  ;;  %v5966_v47 = vld [vmem:[#allocation5 + $0x40] ss:$24 sps:$4 sm:$0xff]  }
  0xf4   :  { %2067 = vmatprep.subr.bf16.mxu0 %v5884_v49  ;;  %v5974_v49 = vld [vmem:[#allocation5 + $0x14] ss:$24 sps:$4 sm:$0xff]  }
  0xf5   :  { %2107 = vmatpush1.bf16.msra.mxu1 %v5879_v50  ;;  %v5969_v50 = vld [vmem:[#allocation5 + $0x340] ss:$24 sps:$4 sm:$0xff]  }
  0xf6   :  { %2108 = vmatprep.subr.bf16.mxu1 %v5887_v51  ;;  %v5977_v51 = vld [vmem:[#allocation5 + $0x314] ss:$24 sps:$4 sm:$0xff]  }
  0xf7   :  { %2068 = vmatpush2.bf16.msra.mxu0 %v5882_v53  ;;  %v5972_v53 = vld [vmem:[#allocation5 + $0x10] ss:$24 sps:$4 sm:$0xff]  }
  0xf8   :  { %2069 = vmatprep.subr.bf16.mxu0 %v5890_v54  ;;  %v5980_v54 = vld [vmem:[#allocation5 + $0x2e4] ss:$24 sps:$4 sm:$0xff]  }
  0xf9   :  { %2109 = vmatpush2.bf16.msra.mxu1 %v5885_v55  ;;  %v5975_v55 = vld [vmem:[#allocation5 + $0x310] ss:$24 sps:$4 sm:$0xff]  }
  0xfa   :  { %2110 = vmatprep.subr.bf16.mxu1 %v5893_v56  ;;  %v5983_v56 = vld [vmem:[#allocation5 + $0x5e4] ss:$24 sps:$4 sm:$0xff]  }
  0xfb   :  { %2070 = vmatpush2.bf16.msra.mxu0 %v5888_v57  ;;  %v5978_v57 = vld [vmem:[#allocation5 + $0x2e0] ss:$24 sps:$4 sm:$0xff]  }
  0xfc   :  { %2071 = vmatprep.subr.bf16.mxu0 %v5896_v58  ;;  %v5986_v58 = vld [vmem:[#allocation5 + $0x2b4] ss:$24 sps:$4 sm:$0xff]  }
  0xfd   :  { %2111 = vmatpush2.bf16.msra.mxu1 %v5891_v59  ;;  %v5981_v59 = vld [vmem:[#allocation5 + $0x5e0] ss:$24 sps:$4 sm:$0xff]  }
  0xfe   :  { %2112 = vmatprep.subr.bf16.mxu1 %v5899_v60  ;;  %v5989_v60 = vld [vmem:[#allocation5 + $0x5b4] ss:$24 sps:$4 sm:$0xff]  }
  0xff   :  { %2072 = vmatpush2.bf16.msra.mxu0 %v5894_v61  ;;  %v5984_v61 = vld [vmem:[#allocation5 + $0x2b0] ss:$24 sps:$4 sm:$0xff]  }
 0x100   :  { %2073 = vmatprep.subr.bf16.mxu0 %v5902_v62  ;;  %v5987_v62 = vld [vmem:[#allocation5 + $0x5b0] ss:$24 sps:$4 sm:$0xff]  }
 0x101   :  { %2113 = vmatpush2.bf16.msra.mxu1 %v5897_v63  ;;  %v5992_v63 = vld [vmem:[#allocation5 + $0x284] ss:$24 sps:$4 sm:$0xff]  }
 0x102   :  { %2114 = vmatprep.subr.bf16.mxu1 %v5905_v0  ;;  %v5995_v0 = vld [vmem:[#allocation5 + $0x584] ss:$24 sps:$4 sm:$0xff]  }
 0x103   :  { %2074 = vmatpush2.bf16.msra.mxu0 %v5900_v1  ;;  %v5990_v1 = vld [vmem:[#allocation5 + $0x280] ss:$24 sps:$4 sm:$0xff]  }
 0x104   :  { %2075 = vmatprep.subr.bf16.mxu0 %v5908_v2  ;;  %v5993_v2 = vld [vmem:[#allocation5 + $0x580] ss:$24 sps:$4 sm:$0xff]  }
 0x105   :  { %2115 = vmatpush2.bf16.msra.mxu1 %v5903_v3  ;;  %v5998_v3 = vld [vmem:[#allocation5 + $0x254] ss:$24 sps:$4 sm:$0xff]  }
 0x106   :  { %2116 = vmatprep.subr.bf16.mxu1 %v5911_v4  ;;  %v6001_v4 = vld [vmem:[#allocation5 + $0x554] ss:$24 sps:$4 sm:$0xff]  }
 0x107   :  { %2076 = vmatpush2.bf16.msra.mxu0 %v5906_v5  ;;  %v5996_v5 = vld [vmem:[#allocation5 + $0x250] ss:$24 sps:$4 sm:$0xff]  }
 0x108   :  { %2077 = vmatprep.subr.bf16.mxu0 %v5914_v6  ;;  %v5999_v6 = vld [vmem:[#allocation5 + $0x550] ss:$24 sps:$4 sm:$0xff]  }
 0x109   :  { %2117 = vmatpush2.bf16.msra.mxu1 %v5909_v8  ;;  %v6004_v8 = vld [vmem:[#allocation5 + $0x224] ss:$24 sps:$4 sm:$0xff]  }
 0x10a   :  { %2118 = vmatprep.subr.bf16.mxu1 %v5917_v9  ;;  %v6007_v9 = vld [vmem:[#allocation5 + $0x524] ss:$24 sps:$4 sm:$0xff]  }
 0x10b   :  { %2078 = vmatpush2.bf16.msra.mxu0 %v5912_v11  ;;  %v6002_v11 = vld [vmem:[#allocation5 + $0x220] ss:$24 sps:$4 sm:$0xff]  }
 0x10c   :  { %2079 = vmatprep.subr.bf16.mxu0 %v5920_v12  ;;  %v6005_v12 = vld [vmem:[#allocation5 + $0x520] ss:$24 sps:$4 sm:$0xff]  }
 0x10d   :  { %2119 = vmatpush2.bf16.msra.mxu1 %v5915_v13  ;;  %v6010_v13 = vld [vmem:[#allocation5 + $0x1f4] ss:$24 sps:$4 sm:$0xff]  }
 0x10e   :  { %2120 = vmatprep.subr.bf16.mxu1 %v5923_v14  ;;  %v6013_v14 = vld [vmem:[#allocation5 + $0x4f4] ss:$24 sps:$4 sm:$0xff]  }
 0x10f   :  { %2080 = vmatpush2.bf16.msra.mxu0 %v5918_v15  ;;  %v6008_v15 = vld [vmem:[#allocation5 + $0x1f0] ss:$24 sps:$4 sm:$0xff]  }
 0x110   :  { %2081 = vmatprep.subr.bf16.mxu0 %v5926_v17  ;;  %v6011_v17 = vld [vmem:[#allocation5 + $0x4f0] ss:$24 sps:$4 sm:$0xff]  }
 0x111   :  { %2121 = vmatpush2.bf16.msra.mxu1 %v5921_v18  ;;  %v6016_v18 = vld [vmem:[#allocation5 + $0x1c4] ss:$24 sps:$4 sm:$0xff]  }
 0x112   :  { %2122 = vmatprep.subr.bf16.mxu1 %v5929_v19  ;;  %v6019_v19 = vld [vmem:[#allocation5 + $0x4c4] ss:$24 sps:$4 sm:$0xff]  }
 0x113   :  { %2082 = vmatpush2.bf16.msra.mxu0 %v5924_v20  ;;  %v6014_v20 = vld [vmem:[#allocation5 + $0x1c0] ss:$24 sps:$4 sm:$0xff]  }
 0x114   :  { %2133 = vmatprep.subr.bf16.mxu0 %v5932_v21  ;;  %v6022_v21 = vld [vmem:[#allocation5 + $0x194] ss:$24 sps:$4 sm:$0xff]  }
 0x115   :  { %2123 = vmatpush2.bf16.msra.mxu1 %v5927_v22  ;;  %v6017_v22 = vld [vmem:[#allocation5 + $0x4c0] ss:$24 sps:$4 sm:$0xff]  }
 0x116   :  { %2084 = vmatmul.mubr.bf16.vlgmr.msra.gmra.mxu0 %v6805_v10  ;;  %2174 = vmatprep.subr.bf16.mxu1 %v5935_v23  ;;  %v6025_v23 = vld [vmem:[#allocation5 + $0x494] ss:$24 sps:$4 sm:$0xff]  }
 0x117   :  { %2134 = vmatpush1.bf16.msra.mxu0 %v5930_v24  ;;  %2165 = vmatprep.mubr.bf16.mxu0 %v6797_v48  ;;  %v5948_v48 = vld [vmem:[#allocation5 + $0xd0] ss:$24 sps:$4 sm:$0xff]  }
 0x118   :  { %2125 = vmatmul.mubr.bf16.vlgmr.msra.gmra.mxu1 %v6813_v16  ;;  %2135 = vmatprep.subr.bf16.mxu0 %v5938_v25  ;;  %v6020_v24 = vld [vmem:[#allocation5 + $0x190] ss:$24 sps:$4 sm:$0xff]   ;;  %v6028_v25 = vld [vmem:[#allocation5 + $0x764] ss:$24 sps:$4 sm:$0xff]  }
 0x119   :  { %2175 = vmatpush1.bf16.msra.mxu1 %v5933_v26  ;;  %2206 = vmatprep.mubr.bf16.mxu1 %v6800_v52  ;;  %v5954_v52 = vld [vmem:[#allocation5 + $0xa0] ss:$24 sps:$4 sm:$0xff]   ;;  %v6023_v26 = vld [vmem:[#allocation5 + $0x490] ss:$24 sps:$4 sm:$0xff]  }
 0x11a   :  { %2176 = vmatprep.subr.bf16.mxu1 %v5941_v27  ;;  %v6037_v27 = vld [vmem:[#allocation8 + $0x154] ss:$24 sps:$4 sm:$0xff]  }
 0x11b   :  { %2136 = vmatpush1.bf16.msra.mxu0 %v5936_v28  ;;  %v6026_v28 = vld [vmem:[#allocation5 + $0x760] ss:$24 sps:$4 sm:$0xff]  }
 0x11c   :  { %2137 = vmatprep.subr.bf16.mxu0 %v5944_v29  ;;  %v6031_v29 = vld [vmem:[#allocation5 + $0x734] ss:$24 sps:$4 sm:$0xff]  }
 0x11d   :  { %2177 = vmatpush1.bf16.msra.mxu1 %v5939_v30  ;;  %v6035_v30 = vld [vmem:[#allocation8 + $0x150] ss:$24 sps:$4 sm:$0xff]  }
 0x11e   :  { %2178 = vmatprep.subr.bf16.mxu1 %v5947_v31  ;;  %v6043_v31 = vld [vmem:[#allocation8 + $0x124] ss:$24 sps:$4 sm:$0xff]  }
 0x11f   :  { %2138 = vmatpush1.bf16.msra.mxu0 %v5942_v32  ;;  %v6029_v32 = vld [vmem:[#allocation5 + $0x730] ss:$24 sps:$4 sm:$0xff]  }
 0x120   :  { %2139 = vmatprep.subr.bf16.mxu0 %v5950_v33 }
 0x121   :  { %2179 = vmatpush1.bf16.msra.mxu1 %v5945_v34  ;;  %v6034_v34 = vld [vmem:[#allocation5 + $0x704] ss:$24 sps:$4 sm:$0xff]  }
 0x122   :  { %2180 = vmatprep.subr.bf16.mxu1 %v5953_v35  ;;  %v6041_v35 = vld [vmem:[#allocation8 + $0x120] ss:$24 sps:$4 sm:$0xff]  }
 0x123   :  { %2140 = vmatpush1.bf16.msra.mxu0 %v5948_v48 }
 0x124   :  { %2141 = vmatprep.subr.bf16.mxu0 %v5956_v37 }
 0x125   :  { %2181 = vmatpush1.bf16.msra.mxu1 %v5951_v38  ;;  %v6049_v38 = vld [vmem:[#allocation8 + $0xf4] ss:$24 sps:$4 sm:$0xff]  }
 0x126   :  { %2182 = vmatprep.subr.bf16.mxu1 %v5959_v39  ;;  %v6032_v39 = vld [vmem:[#allocation5 + $0x700] ss:$24 sps:$4 sm:$0xff]  }
 0x127   :  { %2142 = vmatpush1.bf16.msra.mxu0 %v5954_v52 }
 0x128   :  { %2143 = vmatprep.subr.bf16.mxu0 %v5962_v40 }
 0x129   :  { %2183 = vmatpush1.bf16.msra.mxu1 %v5957_v41  ;;  %v6047_v41 = vld [vmem:[#allocation8 + $0xf0] ss:$24 sps:$4 sm:$0xff]  }
 0x12a   :  { %2184 = vmatprep.subr.bf16.mxu1 %v5965_v42 }
 0x12b   :  { %2144 = vmatpush1.bf16.msra.mxu0 %v5960_v43 }
 0x12c   :  { %2145 = vmatprep.subr.bf16.mxu0 %v5968_v44  ;;  %v6038_v44 = vld [vmem:[#allocation5 + $0x6d0] ss:$24 sps:$4 sm:$0xff]  }
 0x12d   :  { %2185 = vmatpush1.bf16.msra.mxu1 %v5963_v45  ;;  %v6046_v45 = vld [vmem:[#allocation5 + $0x6a4] ss:$24 sps:$4 sm:$0xff]  }
 0x12e   :  { %2186 = vmatprep.subr.bf16.mxu1 %v5971_v46  ;;  %v6053_v46 = vld [vmem:[#allocation8 + $0xc0] ss:$24 sps:$4 sm:$0xff]  }
 0x12f   :  { %2146 = vmatpush1.bf16.msra.mxu0 %v5966_v47  ;;  %v6061_v47 = vld [vmem:[#allocation8 + $0x94] ss:$24 sps:$4 sm:$0xff]  }
 0x130   :  { %2147 = vmatprep.subr.bf16.mxu0 %v5974_v49  ;;  %v6044_v49 = vld [vmem:[#allocation5 + $0x6a0] ss:$24 sps:$4 sm:$0xff]  }
 0x131   :  { %2187 = vmatpush1.bf16.msra.mxu1 %v5969_v50  ;;  %v6052_v50 = vld [vmem:[#allocation5 + $0x674] ss:$24 sps:$4 sm:$0xff]  }
 0x132   :  { %2188 = vmatprep.subr.bf16.mxu1 %v5977_v51  ;;  %v6059_v51 = vld [vmem:[#allocation8 + $0x90] ss:$24 sps:$4 sm:$0xff]  }
 0x133   :  { %2148 = vmatpush1.bf16.msra.mxu0 %v5972_v53  ;;  %v6067_v53 = vld [vmem:[#allocation8 + $0x64] ss:$24 sps:$4 sm:$0xff]  }
 0x134   :  { %2149 = vmatprep.subr.bf16.mxu0 %v5980_v54  ;;  %v6050_v54 = vld [vmem:[#allocation5 + $0x670] ss:$24 sps:$4 sm:$0xff]  }
 0x135   :  { %2189 = vmatpush1.bf16.msra.mxu1 %v5975_v55  ;;  %v6058_v55 = vld [vmem:[#allocation5 + $0x644] ss:$24 sps:$4 sm:$0xff]  }
 0x136   :  { %2190 = vmatprep.subr.bf16.mxu1 %v5983_v56  ;;  %v6065_v56 = vld [vmem:[#allocation8 + $0x60] ss:$24 sps:$4 sm:$0xff]  }
 0x137   :  { %2150 = vmatpush2.bf16.msra.mxu0 %v5978_v57  ;;  %v6073_v57 = vld [vmem:[#allocation8 + $0x34] ss:$24 sps:$4 sm:$0xff]  }
 0x138   :  { %2151 = vmatprep.subr.bf16.mxu0 %v5986_v58  ;;  %v6056_v58 = vld [vmem:[#allocation5 + $0x640] ss:$24 sps:$4 sm:$0xff]  }
 0x139   :  { %2191 = vmatpush2.bf16.msra.mxu1 %v5981_v59  ;;  %v6064_v59 = vld [vmem:[#allocation5 + $0x614] ss:$24 sps:$4 sm:$0xff]  }
 0x13a   :  { %2192 = vmatprep.subr.bf16.mxu1 %v5989_v60  ;;  %v6071_v60 = vld [vmem:[#allocation8 + $0x30] ss:$24 sps:$4 sm:$0xff]  }
 0x13b   :  { %2152 = vmatpush2.bf16.msra.mxu0 %v5984_v61  ;;  %v6079_v61 = vld [vmem:[#allocation8 + $0x4] ss:$24 sps:$4 sm:$0xff]  }
 0x13c   :  { %2153 = vmatprep.subr.bf16.mxu0 %v5992_v63  ;;  %v6070_v63 = vld [vmem:[#allocation5 + $0x8e4] ss:$24 sps:$4 sm:$0xff]  }
 0x13d   :  { %2193 = vmatpush2.bf16.msra.mxu1 %v5987_v62  ;;  %v6062_v62 = vld [vmem:[#allocation5 + $0x610] ss:$24 sps:$4 sm:$0xff]  }
 0x13e   :  { %2194 = vmatprep.subr.bf16.mxu1 %v5995_v0  ;;  %v6077_v0 = vld [vmem:[#allocation8] ss:$24 sps:$4 sm:$0xff]  }
 0x13f   :  { %2154 = vmatpush2.bf16.msra.mxu0 %v5990_v1  ;;  %v6085_v1 = vld [vmem:[#allocation8 + $0x2d4] ss:$24 sps:$4 sm:$0xff]  }
 0x140   :  { %2155 = vmatprep.subr.bf16.mxu0 %v5998_v3  ;;  %v6076_v3 = vld [vmem:[#allocation5 + $0x8b4] ss:$24 sps:$4 sm:$0xff]  }
 0x141   :  { %2195 = vmatpush2.bf16.msra.mxu1 %v5993_v2  ;;  %v6068_v2 = vld [vmem:[#allocation5 + $0x8e0] ss:$24 sps:$4 sm:$0xff]  }
 0x142   :  { %2196 = vmatprep.subr.bf16.mxu1 %v6001_v4  ;;  %v6083_v4 = vld [vmem:[#allocation8 + $0x2d0] ss:$24 sps:$4 sm:$0xff]  }
 0x143   :  { %2156 = vmatpush2.bf16.msra.mxu0 %v5996_v5  ;;  %v6091_v5 = vld [vmem:[#allocation8 + $0x2a4] ss:$24 sps:$4 sm:$0xff]  }
 0x144   :  { %2157 = vmatprep.subr.bf16.mxu0 %v6004_v8  ;;  %v6082_v8 = vld [vmem:[#allocation5 + $0x884] ss:$24 sps:$4 sm:$0xff]  }
 0x145   :  { %2197 = vmatpush2.bf16.msra.mxu1 %v5999_v6  ;;  %v6074_v6 = vld [vmem:[#allocation5 + $0x8b0] ss:$24 sps:$4 sm:$0xff]  }
 0x146   :  { %2198 = vmatprep.subr.bf16.mxu1 %v6007_v9  ;;  %v6089_v9 = vld [vmem:[#allocation8 + $0x2a0] ss:$24 sps:$4 sm:$0xff]  }
 0x147   :  { %2158 = vmatpush2.bf16.msra.mxu0 %v6002_v11  ;;  %v6097_v11 = vld [vmem:[#allocation8 + $0x274] ss:$24 sps:$4 sm:$0xff]  }
 0x148   :  { %2159 = vmatprep.subr.bf16.mxu0 %v6010_v13  ;;  %v6088_v13 = vld [vmem:[#allocation5 + $0x854] ss:$24 sps:$4 sm:$0xff]  }
 0x149   :  { %2199 = vmatpush2.bf16.msra.mxu1 %v6005_v12  ;;  %v6080_v12 = vld [vmem:[#allocation5 + $0x880] ss:$24 sps:$4 sm:$0xff]  }
 0x14a   :  { %2200 = vmatprep.subr.bf16.mxu1 %v6013_v14  ;;  %v6095_v14 = vld [vmem:[#allocation8 + $0x270] ss:$24 sps:$4 sm:$0xff]  }
 0x14b   :  { %2160 = vmatpush2.bf16.msra.mxu0 %v6008_v15  ;;  %v6103_v15 = vld [vmem:[#allocation8 + $0x244] ss:$24 sps:$4 sm:$0xff]  }
 0x14c   :  { %2161 = vmatprep.subr.bf16.mxu0 %v6016_v18  ;;  %v6094_v18 = vld [vmem:[#allocation5 + $0x824] ss:$24 sps:$4 sm:$0xff]  }
 0x14d   :  { %2201 = vmatpush2.bf16.msra.mxu1 %v6011_v17  ;;  %v6086_v17 = vld [vmem:[#allocation5 + $0x850] ss:$24 sps:$4 sm:$0xff]  }
 0x14e   :  { %2202 = vmatprep.subr.bf16.mxu1 %v6019_v19  ;;  %v6101_v19 = vld [vmem:[#allocation8 + $0x240] ss:$24 sps:$4 sm:$0xff]  }
 0x14f   :  { %2162 = vmatpush2.bf16.msra.mxu0 %v6014_v20  ;;  %v6109_v20 = vld [vmem:[#allocation8 + $0x214] ss:$24 sps:$4 sm:$0xff]  }
 0x150   :  { %2163 = vmatprep.subr.bf16.mxu0 %v6022_v21  ;;  %v417_v21 = vlaneseq }
 0x151   :  { %2203 = vmatpush2.bf16.msra.mxu1 %v6017_v22  ;;  %v6092_v22 = vld [vmem:[#allocation5 + $0x820] ss:$24 sps:$4 sm:$0xff]  }
 0x152   :  { %2204 = vmatprep.subr.bf16.mxu1 %v6025_v23  ;;  %v6100_v23 = vld [vmem:[#allocation5 + $0x7f4] ss:$24 sps:$4 sm:$0xff]  }
 0x153   :  { %2164 = vmatpush2.bf16.msra.mxu0 %v6020_v24  ;;  %v6107_v24 = vld [vmem:[#allocation8 + $0x210] ss:$24 sps:$4 sm:$0xff]  }
 0x154   :  { %2215 = vmatprep.subr.bf16.mxu0 %v6028_v25  ;;  %v6115_v25 = vld [vmem:[#allocation8 + $0x1e4] ss:$24 sps:$4 sm:$0xff]  }
 0x155   :  { %2205 = vmatpush2.bf16.msra.mxu1 %v6023_v26  ;;  %v6834_v26 = vshrl.u32 %v417_v21, 7  ;;  %v6148_v21 = vld [vmem:[#allocation8 + $0x5d4] ss:$24 sps:$4 sm:$0xff]  }
 0x156   :  { %v6823_v33 = vpop.f32.mrf.mxu0  ;;  %2166 = vmatmul.mubr.bf16.vlgmr.msra.gmra.mxu0 %v6803_v7  ;;  %4028 = vmatprep.subr.bf16.mxu1 %v6037_v27  ;;  %v6040_v7 = vld [vmem:[#allocation5 + $0x6d4] ss:$24 sps:$4 sm:$0xff]   ;;  %v6098_v27 = vld [vmem:[#allocation5 + $0x7f0] ss:$24 sps:$4 sm:$0xff]  }
 0x157   :  { %2216 = vmatpush1.bf16.msra.mxu0 %v6026_v28  ;;  %2247 = vmatprep.mubr.bf16.mxu0 %v6810_v36  ;;  %v6829_v37 = vpop.f32.mrf.mxu1  ;;  %v6055_v36 = vld [vmem:[#allocation8 + $0xc4] ss:$24 sps:$4 sm:$0xff]  }
 0x158   :  { %v6827_v48 = vpop.f32.mrf.mxu0  ;;  %2207 = vmatmul.mubr.bf16.vlgmr.msra.gmra.mxu1 %v6805_v10  ;;  %2217 = vmatprep.subr.bf16.mxu0 %v6031_v29  ;;  %v6106_v28 = vld [vmem:[#allocation5 + $0x7c4] ss:$24 sps:$4 sm:$0xff]  }
 0x159   :  { %4029 = vmatpush1.bf16.msra.mxu1 %v6035_v30  ;;  %v6832_v40 = vpop.f32.mrf.mxu1  ;;  %v6113_v29 = vld [vmem:[#allocation8 + $0x1e0] ss:$24 sps:$4 sm:$0xff]  }
 0x15a   :  { %v1925_v52 = vpop.f32.mrf.mxu0  ;;  %4030 = vmatprep.subr.bf16.mxu1 %v6043_v31  ;;  %v6836_v30 = vld [vmem:[#allocation7] sm:$0x3f]  ;;  %v6118_v31 = vld [vmem:[#allocation8 + $0x1b4] ss:$24 sps:$4 sm:$0xff]  }
 0x15b   :  { %2218 = vmatpush1.bf16.msra.mxu0 %v6029_v32  ;;  %v1966_v43 = vpop.f32.mrf.mxu1  ;;  %v419_v32 = vsub.s32 0, %v6834_v26  ;;  %v6121_v52 = vld [vmem:[#allocation8 + $0x184] ss:$24 sps:$4 sm:$0xff]  }
 0x15c   :  { %v1926_v42 = vpop.f32.mrf.mxu0  ;;  %2219 = vmatprep.subr.bf16.mxu0 %v6034_v34  ;;  %v6104_v34 = vld [vmem:[#allocation5 + $0x7c0] ss:$24 sps:$4 sm:$0xff]  }
 0x15d   :  { %4031 = vmatpush1.bf16.msra.mxu1 %v6041_v35  ;;  %v1967_v10 = vpop.f32.mrf.mxu1  ;;  %v423_v35 = vsub.s32 1, %v6834_v26  ;;  %v6124_v43 = vld [vmem:[#allocation8 + $0x454] ss:$24 sps:$4 sm:$0xff]  }
 0x15e   :  { %4032 = vmatprep.subr.bf16.mxu1 %v6049_v38  ;;  %v6112_v38 = vld [vmem:[#allocation5 + $0x794] ss:$24 sps:$4 sm:$0xff]  }
 0x15f   :  { %2220 = vmatpush1.bf16.msra.mxu0 %v6032_v39  ;;  %v6116_v39 = vld [vmem:[#allocation8 + $0x1b0] ss:$24 sps:$4 sm:$0xff]   ;;  %v424_v42 = vrot.slane %v6836_v30, %v423_v35 }
 0x160   :  { %2221 = vmatprep.subr.bf16.mxu0 %v6040_v7  ;;  %v420_v7 = vrot.slane %v6836_v30, %v419_v32  ;;  %v6122_v10 = vld [vmem:[#allocation8 + $0x450] ss:$24 sps:$4 sm:$0xff]  }
 0x161   :  { %4033 = vmatpush1.bf16.msra.mxu1 %v6047_v41  ;;  %v6110_v41 = vld [vmem:[#allocation5 + $0x790] ss:$24 sps:$4 sm:$0xff]  }
 0x162   :  { %4034 = vmatprep.subr.bf16.mxu1 %v6055_v36  ;;  %v6119_v36 = vld [vmem:[#allocation8 + $0x180] ss:$24 sps:$4 sm:$0xff]  }
 0x163   :  { %2222 = vmatpush1.bf16.msra.mxu0 %v6038_v44  ;;  %v1922_v44 = vadd.f32 %v6823_v33, %v420_v7  ;;  %v6260_v7 = vld [vmem:[#allocation8 + $0x600] ss:$24 sps:$4 sm:$0xff]  }
 0x164   :  { %2223 = vmatprep.subr.bf16.mxu0 %v6046_v45  ;;  %v1924_v45 = vadd.f32 %v6827_v48, %v424_v42  ;;  %v6155_v42 = vld [vmem:[#allocation8 + $0x540] ss:$24 sps:$4 sm:$0xff]  }
 0x165   :  { %4035 = vmatpush1.bf16.msra.mxu1 %v6053_v46  ;;  %v6127_v46 = vld [vmem:[#allocation8 + $0x424] ss:$24 sps:$4 sm:$0xff]  }
 0x166   :  { %4036 = vmatprep.subr.bf16.mxu1 %v6061_v47  ;;  %v1963_v47 = vadd.f32 %v6829_v37, %v1922_v44  ;;  %v6274_v44 = vld [vmem:[#allocation8 + $0x8a4] ss:$24 sps:$4 sm:$0xff]  }
 0x167   :  { %2224 = vmatpush1.bf16.msra.mxu0 %v6044_v49  ;;  %v6125_v49 = vld [vmem:[#allocation8 + $0x420] ss:$24 sps:$4 sm:$0xff]  }
 0x168   :  { %2225 = vmatprep.subr.bf16.mxu0 %v6052_v50 }
 0x169   :  { %4037 = vmatpush1.bf16.msra.mxu1 %v6059_v51  ;;  %v1965_v51 = vadd.f32 %v6832_v40, %v1924_v45  ;;  %v6158_v45 = vld [vmem:[#allocation8 + $0x510] ss:$24 sps:$4 sm:$0xff]  }
 0x16a   :  { %4038 = vmatprep.subr.bf16.mxu1 %v6067_v53 }
 0x16b   :  { %2226 = vmatpush1.bf16.msra.mxu0 %v6050_v54  ;;  %v6130_v54 = vld [vmem:[#allocation8 + $0x3f4] ss:$24 sps:$4 sm:$0xff]  }
 0x16c   :  { %2227 = vmatprep.subr.bf16.mxu0 %v6058_v55 }
 0x16d   :  { %4039 = vmatpush1.bf16.msra.mxu1 %v6065_v56 }
 0x16e   :  { %4040 = vmatprep.subr.bf16.mxu1 %v6073_v57  ;;  %v6128_v57 = vld [vmem:[#allocation8 + $0x3f0] ss:$24 sps:$4 sm:$0xff]  }
 0x16f   :  { %2228 = vmatpush1.bf16.msra.mxu0 %v6056_v58 }
 0x170   :  { %2229 = vmatprep.subr.bf16.mxu0 %v6064_v59 }
 0x171   :  { %4041 = vmatpush1.bf16.msra.mxu1 %v6071_v60 }
 0x172   :  { %4042 = vmatprep.subr.bf16.mxu1 %v6079_v61 }
 0x173   :  { %2230 = vmatpush1.bf16.msra.mxu0 %v6062_v62  ;;  %v6131_v62 = vld [vmem:[#allocation8 + $0x3c0] ss:$24 sps:$4 sm:$0xff]  }
 0x174   :  { %2231 = vmatprep.subr.bf16.mxu0 %v6070_v63 }
 0x175   :  { %4043 = vmatpush1.bf16.msra.mxu1 %v6077_v0 }
 0x176   :  { %4044 = vmatprep.subr.bf16.mxu1 %v6085_v1  ;;  %v6220_v1 = vld [vmem:[#allocation8 + $0x754] ss:$24 sps:$4 sm:$0xff]  }
 0x177   :  { %2232 = vmatpush2.bf16.msra.mxu0 %v6068_v2  ;;  %v6218_v2 = vld [vmem:[#allocation8 + $0x750] ss:$24 sps:$4 sm:$0xff]  }
 0x178   :  { %2233 = vmatprep.subr.bf16.mxu0 %v6076_v3  ;;  %v6136_v3 = vld [vmem:[#allocation8 + $0x394] ss:$24 sps:$4 sm:$0xff]  }
 0x179   :  { %4045 = vmatpush2.bf16.msra.mxu1 %v6083_v4  ;;  %v6226_v4 = vld [vmem:[#allocation8 + $0x724] ss:$24 sps:$4 sm:$0xff]  }
 0x17a   :  { %4046 = vmatprep.subr.bf16.mxu1 %v6091_v5  ;;  %v6134_v5 = vld [vmem:[#allocation8 + $0x390] ss:$24 sps:$4 sm:$0xff]  }
 0x17b   :  { %2234 = vmatpush2.bf16.msra.mxu0 %v6074_v6  ;;  %v6139_v6 = vld [vmem:[#allocation8 + $0x364] ss:$24 sps:$4 sm:$0xff]  }
 0x17c   :  { %2235 = vmatprep.subr.bf16.mxu0 %v6082_v8  ;;  %v6224_v8 = vld [vmem:[#allocation8 + $0x720] ss:$24 sps:$4 sm:$0xff]  }
 0x17d   :  { %4047 = vmatpush2.bf16.msra.mxu1 %v6089_v9  ;;  %v6232_v9 = vld [vmem:[#allocation8 + $0x6f4] ss:$24 sps:$4 sm:$0xff]  }
 0x17e   :  { %4048 = vmatprep.subr.bf16.mxu1 %v6097_v11  ;;  %v6137_v11 = vld [vmem:[#allocation8 + $0x360] ss:$24 sps:$4 sm:$0xff]  }
 0x17f   :  { %2236 = vmatpush2.bf16.msra.mxu0 %v6080_v12  ;;  %v6142_v12 = vld [vmem:[#allocation8 + $0x334] ss:$24 sps:$4 sm:$0xff]  }
 0x180   :  { %2237 = vmatprep.subr.bf16.mxu0 %v6088_v13  ;;  %v6230_v13 = vld [vmem:[#allocation8 + $0x6f0] ss:$24 sps:$4 sm:$0xff]  }
 0x181   :  { %4049 = vmatpush2.bf16.msra.mxu1 %v6095_v14  ;;  %v6238_v14 = vld [vmem:[#allocation8 + $0x6c4] ss:$24 sps:$4 sm:$0xff]  }
 0x182   :  { %4050 = vmatprep.subr.bf16.mxu1 %v6103_v15  ;;  %v6140_v15 = vld [vmem:[#allocation8 + $0x330] ss:$24 sps:$4 sm:$0xff]  }
 0x183   :  { %2238 = vmatpush2.bf16.msra.mxu0 %v6086_v17  ;;  %v6145_v17 = vld [vmem:[#allocation8 + $0x304] ss:$24 sps:$4 sm:$0xff]  }
 0x184   :  { %2239 = vmatprep.subr.bf16.mxu0 %v6094_v18  ;;  %v6236_v18 = vld [vmem:[#allocation8 + $0x6c0] ss:$24 sps:$4 sm:$0xff]  }
 0x185   :  { %4051 = vmatpush2.bf16.msra.mxu1 %v6101_v19  ;;  %v6244_v19 = vld [vmem:[#allocation8 + $0x694] ss:$24 sps:$4 sm:$0xff]  }
 0x186   :  { %4052 = vmatprep.subr.bf16.mxu1 %v6109_v20  ;;  %v6143_v20 = vld [vmem:[#allocation8 + $0x300] ss:$24 sps:$4 sm:$0xff]  }
 0x187   :  { %2240 = vmatpush2.bf16.msra.mxu0 %v6092_v22  ;;  %v6242_v22 = vld [vmem:[#allocation8 + $0x690] ss:$24 sps:$4 sm:$0xff]  }
 0x188   :  { %2241 = vmatprep.subr.bf16.mxu0 %v6100_v23  ;;  %v6250_v23 = vld [vmem:[#allocation8 + $0x664] ss:$24 sps:$4 sm:$0xff]  }
 0x189   :  { %4053 = vmatpush2.bf16.msra.mxu1 %v6107_v24  ;;  %v6146_v24 = vld [vmem:[#allocation8 + $0x5d0] ss:$24 sps:$4 sm:$0xff]  }
 0x18a   :  { %4054 = vmatprep.subr.bf16.mxu1 %v6115_v25  ;;  %v6151_v25 = vld [vmem:[#allocation8 + $0x5a4] ss:$24 sps:$4 sm:$0xff]  }
 0x18b   :  { %2242 = vmatpush2.bf16.msra.mxu0 %v6098_v27  ;;  %v6248_v27 = vld [vmem:[#allocation8 + $0x660] ss:$24 sps:$4 sm:$0xff]  }
 0x18c   :  { %2243 = vmatprep.subr.bf16.mxu0 %v6106_v28  ;;  %v6256_v28 = vld [vmem:[#allocation8 + $0x634] ss:$24 sps:$4 sm:$0xff]  }
 0x18d   :  { %4055 = vmatpush2.bf16.msra.mxu1 %v6113_v29  ;;  %v6149_v29 = vld [vmem:[#allocation8 + $0x5a0] ss:$24 sps:$4 sm:$0xff]  }
 0x18e   :  { %4056 = vmatprep.subr.bf16.mxu1 %v6118_v31  ;;  %v6154_v31 = vld [vmem:[#allocation8 + $0x574] ss:$24 sps:$4 sm:$0xff]  }
 0x18f   :  { %2244 = vmatpush2.bf16.msra.mxu0 %v6104_v34  ;;  %v6254_v34 = vld [vmem:[#allocation8 + $0x630] ss:$24 sps:$4 sm:$0xff]  }
 0x190   :  { %2245 = vmatprep.subr.bf16.mxu0 %v6112_v38  ;;  %v6262_v38 = vld [vmem:[#allocation8 + $0x604] ss:$24 sps:$4 sm:$0xff]  }
 0x191   :  { %4057 = vmatpush2.bf16.msra.mxu1 %v6116_v39  ;;  %v6152_v39 = vld [vmem:[#allocation8 + $0x570] ss:$24 sps:$4 sm:$0xff]  }
 0x192   :  { %4058 = vmatprep.subr.bf16.mxu1 %v6121_v52  ;;  %v6157_v52 = vld [vmem:[#allocation8 + $0x544] ss:$24 sps:$4 sm:$0xff]  }
 0x193   :  { %2246 = vmatpush2.bf16.msra.mxu0 %v6110_v41  ;;  %v6268_v41 = vld [vmem:[#allocation8 + $0x8d4] ss:$24 sps:$4 sm:$0xff]  }
 0x194   :  { %4069 = vmatprep.subr.bf16.mxu0 %v6124_v43  ;;  %v6266_v43 = vld [vmem:[#allocation8 + $0x8d0] ss:$24 sps:$4 sm:$0xff]  }
 0x195   :  { %4059 = vmatpush2.bf16.msra.mxu1 %v6119_v36  ;;  %v6160_v36 = vld [vmem:[#allocation8 + $0x514] ss:$24 sps:$4 sm:$0xff]  }
 0x196   :  { %v2003_v50 = vpop.f32.mrf.mxu0  ;;  %2248 = vmatmul.mubr.bf16.vlgmr.msra.gmra.mxu0 %v6813_v16  ;;  %v6133_v16 = vld [vmem:[#allocation8 + $0x3c4] ss:$24 sps:$4 sm:$0xff]   ;;  %4110 = vmatprep.subr.bf16.mxu1 %v6220_v1 }
 0x197   :  { %v2004_v53 = vadd.f32 %v2003_v50, %v1963_v47  ;;  %4070 = vmatpush1.bf16.msra.mxu0 %v6122_v10  ;;  %v6272_v10 = vld [vmem:[#allocation8 + $0x8a0] ss:$24 sps:$4 sm:$0xff]   ;;  %v6280_v47 = vld [vmem:[#allocation8 + $0x874] ss:$24 sps:$4 sm:$0xff]   ;;  %v6278_v50 = vld [vmem:[#allocation8 + $0x870] ss:$24 sps:$4 sm:$0xff]  }
 0x198   :  { %v2005_v33 = vpop.f32.mrf.mxu0  ;;  %4071 = vmatprep.subr.bf16.mxu0 %v6127_v46  ;;  %v6851_v55 = vpop.f32.mrf.mxu1  ;;  %v6163_v46 = vld [vmem:[#allocation8 + $0x4e4] ss:$24 sps:$4 sm:$0xff]  }
 0x199   :  { %v2256_v48 = vmax.f32 %v2004_v53, 0.0  ;;  %v2006_v56 = vadd.f32 %v2005_v33, %v1965_v51  ;;  %v6166_v51 = vld [vmem:[#allocation8 + $0x4b4] ss:$24 sps:$4 sm:$0xff]   ;;  %v6286_v53 = vld [vmem:[#allocation8 + $0x844] ss:$24 sps:$4 sm:$0xff]   ;;  %v427_v33 = vsub.s32 2, %v6834_v26 }
 0x19a   :  { %v2007_v58 = vpop.f32.mrf.mxu0  ;;  %v6853_v59 = vpop.f32.mrf.mxu1 }
 0x19b   :  { %v2257_v37 = vmax.f32 %v2006_v56, 0.0  ;;  %4072 = vmatpush1.bf16.msra.mxu0 %v6125_v49  ;;  %v6857_v63 = vpack.c.bf16 %v2256_v48, %v2256_v48  ;;  %v6161_v49 = vld [vmem:[#allocation8 + $0x4e0] ss:$24 sps:$4 sm:$0xff]   ;;  %v6169_v56 = vld [vmem:[#allocation8 + $0x484] ss:$24 sps:$4 sm:$0xff]  }
 0x19c   :  { %v2008_v60 = vpop.f32.mrf.mxu0  ;;  %4073 = vmatprep.subr.bf16.mxu0 %v6130_v54  ;;  %v2048_v61 = vpop.f32.mrf.mxu1  ;;  %v6164_v54 = vld [vmem:[#allocation8 + $0x4b0] ss:$24 sps:$4 sm:$0xff]   ;;  %v6284_v48 = vld [vmem:[#allocation8 + $0x840] ss:$24 sps:$4 sm:$0xff]   ;;  %v6292_v58 = vld [vmem:[#allocation8 + $0x814] ss:$24 sps:$4 sm:$0xff]  }
 0x19d   :  { %v6855_v40 = vpack.c.bf16 %v2257_v37, %v2257_v37  ;;  %v428_v37 = vrot.slane %v6836_v30, %v427_v33  ;;  %v6167_v60 = vld [vmem:[#allocation8 + $0x480] ss:$24 sps:$4 sm:$0xff]   ;;  %v6172_v61 = vld [vmem:[#allocation8 + $0x15c] ss:$24 sps:$4 sm:$0xff]  }
 0x19e   :  { %v2049_v0 = vpop.f32.mrf.mxu1 }
 0x19f   :  { %4060 = vmatprep.mubr.bf16.mxu1 %v6855_v40  ;;  %4074 = vmatpush1.bf16.msra.mxu0 %v6128_v57  ;;  %v431_v57 = vsub.s32 3, %v6834_v26  ;;  %v6298_v0 = vld [vmem:[#allocation8 + $0x7e4] ss:$24 sps:$4 sm:$0xff]   ;;  %v2045_v1 = vadd.f32 %v6851_v55, %v428_v37  ;;  %v6209_v37 = vld [vmem:[#allocation8 + $0x1e8] ss:$24 sps:$4 sm:$0xff]  }
 0x1a0   :  { %4061 = vmatmul.mubr.bf16.vlgmr.msra.gmra.mxu1 %v6857_v63  ;;  %4075 = vmatprep.subr.bf16.mxu0 %v6133_v16  ;;  %v6290_v16 = vld [vmem:[#allocation8 + $0x810] ss:$24 sps:$4 sm:$0xff]   ;;  %v6310_v55 = vld [vmem:[#allocation8 + $0x784] ss:$24 sps:$4 sm:$0xff]  }
 0x1a1   :  { %4111 = vmatpush1.bf16.msra.mxu1 %v6218_v2  ;;  %v6296_v2 = vld [vmem:[#allocation8 + $0x7e0] ss:$24 sps:$4 sm:$0xff]  }
 0x1a2   :  { %4112 = vmatprep.subr.bf16.mxu1 %v6226_v4 }
 0x1a3   :  { %4076 = vmatpush1.bf16.msra.mxu0 %v6131_v62  ;;  %v432_v62 = vrot.slane %v6836_v30, %v431_v57 }
 0x1a4   :  { %4077 = vmatprep.subr.bf16.mxu0 %v6136_v3 }
 0x1a5   :  { %4113 = vmatpush1.bf16.msra.mxu1 %v6224_v8  ;;  %v2047_v3 = vadd.f32 %v6853_v59, %v432_v62  ;;  %v6302_v8 = vld [vmem:[#allocation8 + $0x7b0] ss:$24 sps:$4 sm:$0xff]  }
 0x1a6   :  { %4114 = vmatprep.subr.bf16.mxu1 %v6232_v9 }
 0x1a7   :  { %4078 = vmatpush1.bf16.msra.mxu0 %v6134_v5  ;;  %v6304_v5 = vld [vmem:[#allocation8 + $0x7b4] ss:$24 sps:$4 sm:$0xff]  }
 0x1a8   :  { %4079 = vmatprep.subr.bf16.mxu0 %v6139_v6 }
 0x1a9   :  { %4115 = vmatpush1.bf16.msra.mxu1 %v6230_v13 }
 0x1aa   :  { %4116 = vmatprep.subr.bf16.mxu1 %v6238_v14 }
 0x1ab   :  { %4080 = vmatpush1.bf16.msra.mxu0 %v6137_v11 }
 0x1ac   :  { %4081 = vmatprep.subr.bf16.mxu0 %v6142_v12 }
 0x1ad   :  { %4117 = vmatpush1.bf16.msra.mxu1 %v6236_v18  ;;  %v6308_v18 = vld [vmem:[#allocation8 + $0x780] ss:$24 sps:$4 sm:$0xff]  }
 0x1ae   :  { %4118 = vmatprep.subr.bf16.mxu1 %v6244_v19 }
 0x1af   :  { %4082 = vmatpush1.bf16.msra.mxu0 %v6140_v15 }
 0x1b0   :  { %4083 = vmatprep.subr.bf16.mxu0 %v6145_v17 }
 0x1b1   :  { %4119 = vmatpush1.bf16.msra.mxu1 %v6242_v22 }
 0x1b2   :  { %4120 = vmatprep.subr.bf16.mxu1 %v6250_v23  ;;  %v6316_v23 = vld [vmem:[#allocation8 + $0x45c] ss:$24 sps:$4 sm:$0xff]  }
 0x1b3   :  { %4084 = vmatpush1.bf16.msra.mxu0 %v6143_v20 }
 0x1b4   :  { %4085 = vmatprep.subr.bf16.mxu0 %v6148_v21 }
 0x1b5   :  { %4121 = vmatpush1.bf16.msra.mxu1 %v6248_v27 }
 0x1b6   :  { %4122 = vmatprep.subr.bf16.mxu1 %v6256_v28  ;;  %v6175_v28 = vld [vmem:[#allocation8 + $0x12c] ss:$24 sps:$4 sm:$0xff]  }
 0x1b7   :  { %4086 = vmatpush2.bf16.msra.mxu0 %v6146_v24 }
 0x1b8   :  { %4087 = vmatprep.subr.bf16.mxu0 %v6151_v25  ;;  %v6170_v25 = vld [vmem:[#allocation8 + $0x158] ss:$24 sps:$4 sm:$0xff]  }
 0x1b9   :  { %4123 = vmatpush1.bf16.msra.mxu1 %v6254_v34  ;;  %v6176_v34 = vld [vmem:[#allocation8 + $0xf8] ss:$24 sps:$4 sm:$0xff]  }
 0x1ba   :  { %4124 = vmatprep.subr.bf16.mxu1 %v6262_v38  ;;  %v6181_v38 = vld [vmem:[#allocation8 + $0xcc] ss:$24 sps:$4 sm:$0xff]  }
 0x1bb   :  { %4088 = vmatpush2.bf16.msra.mxu0 %v6149_v29  ;;  %v6173_v29 = vld [vmem:[#allocation8 + $0x128] ss:$24 sps:$4 sm:$0xff]  }
 0x1bc   :  { %4089 = vmatprep.subr.bf16.mxu0 %v6154_v31  ;;  %v6178_v31 = vld [vmem:[#allocation8 + $0xfc] ss:$24 sps:$4 sm:$0xff]  }
 0x1bd   :  { %4125 = vmatpush1.bf16.msra.mxu1 %v6260_v7  ;;  %v6182_v7 = vld [vmem:[#allocation8 + $0x98] ss:$24 sps:$4 sm:$0xff]  }
 0x1be   :  { %4126 = vmatprep.subr.bf16.mxu1 %v6268_v41  ;;  %v6187_v41 = vld [vmem:[#allocation8 + $0x6c] ss:$24 sps:$4 sm:$0xff]  }
 0x1bf   :  { %4090 = vmatpush2.bf16.msra.mxu0 %v6152_v39  ;;  %v6179_v39 = vld [vmem:[#allocation8 + $0xc8] ss:$24 sps:$4 sm:$0xff]  }
 0x1c0   :  { %4091 = vmatprep.subr.bf16.mxu0 %v6157_v52  ;;  %v6184_v52 = vld [vmem:[#allocation8 + $0x9c] ss:$24 sps:$4 sm:$0xff]  }
 0x1c1   :  { %4127 = vmatpush2.bf16.msra.mxu1 %v6266_v43  ;;  %v6188_v43 = vld [vmem:[#allocation8 + $0x38] ss:$24 sps:$4 sm:$0xff]  }
 0x1c2   :  { %4128 = vmatprep.subr.bf16.mxu1 %v6274_v44  ;;  %v6193_v44 = vld [vmem:[#allocation8 + $0xc] ss:$24 sps:$4 sm:$0xff]  }
 0x1c3   :  { %4092 = vmatpush2.bf16.msra.mxu0 %v6155_v42  ;;  %v6185_v42 = vld [vmem:[#allocation8 + $0x68] ss:$24 sps:$4 sm:$0xff]  }
 0x1c4   :  { %4093 = vmatprep.subr.bf16.mxu0 %v6160_v36  ;;  %v6190_v36 = vld [vmem:[#allocation8 + $0x3c] ss:$24 sps:$4 sm:$0xff]  }
 0x1c5   :  { %4129 = vmatpush2.bf16.msra.mxu1 %v6272_v10  ;;  %v6196_v10 = vld [vmem:[#allocation8 + $0x2dc] ss:$24 sps:$4 sm:$0xff]  }
 0x1c6   :  { %4130 = vmatprep.subr.bf16.mxu1 %v6280_v47  ;;  %v6199_v47 = vld [vmem:[#allocation8 + $0x2ac] ss:$24 sps:$4 sm:$0xff]  }
 0x1c7   :  { %4094 = vmatpush2.bf16.msra.mxu0 %v6158_v45  ;;  %v6191_v45 = vld [vmem:[#allocation8 + $0x8] ss:$24 sps:$4 sm:$0xff]  }
 0x1c8   :  { %4095 = vmatprep.subr.bf16.mxu0 %v6163_v46  ;;  %v6194_v46 = vld [vmem:[#allocation8 + $0x2d8] ss:$24 sps:$4 sm:$0xff]  }
 0x1c9   :  { %4131 = vmatpush2.bf16.msra.mxu1 %v6278_v50  ;;  %v6202_v50 = vld [vmem:[#allocation8 + $0x27c] ss:$24 sps:$4 sm:$0xff]  }
 0x1ca   :  { %4132 = vmatprep.subr.bf16.mxu1 %v6286_v53  ;;  %v6205_v53 = vld [vmem:[#allocation8 + $0x24c] ss:$24 sps:$4 sm:$0xff]  }
 0x1cb   :  { %4096 = vmatpush2.bf16.msra.mxu0 %v6161_v49  ;;  %v6197_v49 = vld [vmem:[#allocation8 + $0x2a8] ss:$24 sps:$4 sm:$0xff]  }
 0x1cc   :  { %4097 = vmatprep.subr.bf16.mxu0 %v6166_v51  ;;  %v6200_v51 = vld [vmem:[#allocation8 + $0x278] ss:$24 sps:$4 sm:$0xff]  }
 0x1cd   :  { %4133 = vmatpush2.bf16.msra.mxu1 %v6284_v48  ;;  %v6208_v48 = vld [vmem:[#allocation8 + $0x21c] ss:$24 sps:$4 sm:$0xff]  }
 0x1ce   :  { %4134 = vmatprep.subr.bf16.mxu1 %v6292_v58  ;;  %v6211_v58 = vld [vmem:[#allocation8 + $0x1ec] ss:$24 sps:$4 sm:$0xff]  }
 0x1cf   :  { %4098 = vmatpush2.bf16.msra.mxu0 %v6164_v54  ;;  %v6203_v54 = vld [vmem:[#allocation8 + $0x248] ss:$24 sps:$4 sm:$0xff]  }
 0x1d0   :  { %4099 = vmatprep.subr.bf16.mxu0 %v6169_v56  ;;  %v6206_v56 = vld [vmem:[#allocation8 + $0x218] ss:$24 sps:$4 sm:$0xff]  }
 0x1d1   :  { %4135 = vmatpush2.bf16.msra.mxu1 %v6290_v16 }
 0x1d2   :  { %4136 = vmatprep.subr.bf16.mxu1 %v6298_v0 }
 0x1d3   :  { %4100 = vmatpush2.bf16.msra.mxu0 %v6167_v60  ;;  %v6214_v60 = vld [vmem:[#allocation8 + $0x1bc] ss:$24 sps:$4 sm:$0xff]  }
 0x1d4   :  { %4151 = vmatprep.subr.bf16.mxu0 %v6172_v61  ;;  %v6212_v61 = vld [vmem:[#allocation8 + $0x1b8] ss:$24 sps:$4 sm:$0xff]  }
 0x1d5   :  { %4137 = vmatpush2.bf16.msra.mxu1 %v6296_v2 }
 0x1d6   :  { %v2085_v4 = vpop.f32.mrf.mxu0  ;;  %4138 = vmatprep.subr.bf16.mxu1 %v6304_v5 }
 0x1d7   :  { %v2086_v6 = vadd.f32 %v2085_v4, %v2045_v1  ;;  %v6217_v1 = vld [vmem:[#allocation8 + $0x18c] ss:$24 sps:$4 sm:$0xff]   ;;  %v6215_v4 = vld [vmem:[#allocation8 + $0x188] ss:$24 sps:$4 sm:$0xff]  }
 0x1d8   :  { %v2087_v9 = vpop.f32.mrf.mxu0  ;;  %v2126_v11 = vpop.f32.mrf.mxu1 }
 0x1d9   :  { %v2088_v12 = vadd.f32 %v2087_v9, %v2047_v3  ;;  %v2127_v13 = vadd.f32 %v2126_v11, %v2086_v6  ;;  %4139 = vmatpush2.bf16.msra.mxu1 %v6302_v8  ;;  %v6223_v6 = vld [vmem:[#allocation8 + $0x75c] ss:$24 sps:$4 sm:$0xff]   ;;  %v6221_v11 = vld [vmem:[#allocation8 + $0x758] ss:$24 sps:$4 sm:$0xff]  }
 0x1da   :  { %v2089_v14 = vpop.f32.mrf.mxu0  ;;  %v2128_v15 = vpop.f32.mrf.mxu1  ;;  %4140 = vmatprep.subr.bf16.mxu1 %v6310_v55  ;;  %v6241_v55 = vld [vmem:[#allocation8 + $0x6cc] ss:$24 sps:$4 sm:$0xff]  }
 0x1db   :  { %v2129_v17 = vadd.f32 %v2128_v15, %v2088_v12  ;;  %v2258_v19 = vmax.f32 %v2127_v13, 0.0  ;;  %v6229_v12 = vld [vmem:[#allocation8 + $0x72c] ss:$24 sps:$4 sm:$0xff]   ;;  %v6227_v13 = vld [vmem:[#allocation8 + $0x728] ss:$24 sps:$4 sm:$0xff]  }
 0x1dc   :  { %v2090_v20 = vpop.f32.mrf.mxu0  ;;  %v2130_v21 = vpop.f32.mrf.mxu1  ;;  %v6235_v14 = vld [vmem:[#allocation8 + $0x6fc] ss:$24 sps:$4 sm:$0xff]   ;;  %v6233_v15 = vld [vmem:[#allocation8 + $0x6f8] ss:$24 sps:$4 sm:$0xff]  }
 0x1dd   :  { %v2259_v59 = vmax.f32 %v2129_v17, 0.0  ;;  %4141 = vmatpush2.bf16.msra.mxu1 %v6308_v18  ;;  %v6873_v27 = vpack.c.bf16 %v2258_v19, %v2258_v19  ;;  %v6239_v17 = vld [vmem:[#allocation8 + $0x6c8] ss:$24 sps:$4 sm:$0xff]   ;;  %v6247_v18 = vld [vmem:[#allocation8 + $0x69c] ss:$24 sps:$4 sm:$0xff]  }
 0x1de   :  { %v2131_v22 = vpop.f32.mrf.mxu1  ;;  %4192 = vmatprep.subr.bf16.mxu1 %v6316_v23  ;;  %v6245_v19 = vld [vmem:[#allocation8 + $0x698] ss:$24 sps:$4 sm:$0xff]   ;;  %v6253_v20 = vld [vmem:[#allocation8 + $0x66c] ss:$24 sps:$4 sm:$0xff]   ;;  %v6251_v21 = vld [vmem:[#allocation8 + $0x668] ss:$24 sps:$4 sm:$0xff]  }
 0x1df   :  { %v6871_v24 = vpack.c.bf16 %v2259_v59, %v2259_v59  ;;  %v6259_v59 = vld [vmem:[#allocation8 + $0x63c] ss:$24 sps:$4 sm:$0xff]   ;;  %v6257_v22 = vld [vmem:[#allocation8 + $0x638] ss:$24 sps:$4 sm:$0xff]   ;;  %v6265_v23 = vld [vmem:[#allocation8 + $0x60c] ss:$24 sps:$4 sm:$0xff]  }
 0x1e1   :  { %4101 = vmatprep.mubr.bf16.mxu0 %v6871_v24 }
 0x1e2   :  { %4102 = vmatmul.mubr.bf16.vlgmr.msra.gmra.mxu0 %v6873_v27 }
 0x1e3   :  { %4152 = vmatpush1.bf16.msra.mxu0 %v6170_v25  ;;  %4183 = vmatprep.mubr.bf16.mxu0 %v6855_v40  ;;  %v6263_v25 = vld [vmem:[#allocation8 + $0x608] ss:$24 sps:$4 sm:$0xff]  }
 0x1e4   :  { %4153 = vmatprep.subr.bf16.mxu0 %v6175_v28  ;;  %v6271_v28 = vld [vmem:[#allocation8 + $0x8dc] ss:$24 sps:$4 sm:$0xff]  }
 0x1e7   :  { %4154 = vmatpush1.bf16.msra.mxu0 %v6173_v29  ;;  %v6269_v29 = vld [vmem:[#allocation8 + $0x8d8] ss:$24 sps:$4 sm:$0xff]  }
 0x1e8   :  { %4155 = vmatprep.subr.bf16.mxu0 %v6178_v31  ;;  %v6277_v31 = vld [vmem:[#allocation8 + $0x8ac] ss:$24 sps:$4 sm:$0xff]  }
 0x1eb   :  { %4156 = vmatpush1.bf16.msra.mxu0 %v6176_v34  ;;  %v6275_v34 = vld [vmem:[#allocation8 + $0x8a8] ss:$24 sps:$4 sm:$0xff]  }
 0x1ec   :  { %4157 = vmatprep.subr.bf16.mxu0 %v6181_v38  ;;  %v6283_v38 = vld [vmem:[#allocation8 + $0x87c] ss:$24 sps:$4 sm:$0xff]  }
 0x1ef   :  { %4158 = vmatpush1.bf16.msra.mxu0 %v6179_v39  ;;  %v6281_v39 = vld [vmem:[#allocation8 + $0x878] ss:$24 sps:$4 sm:$0xff]  }
 0x1f0   :  { %4159 = vmatprep.subr.bf16.mxu0 %v6184_v52  ;;  %v6289_v52 = vld [vmem:[#allocation8 + $0x84c] ss:$24 sps:$4 sm:$0xff]  }
 0x1f3   :  { %4160 = vmatpush1.bf16.msra.mxu0 %v6182_v7  ;;  %v435_v7 = vsub.s32 4, %v6834_v26 }
 0x1f4   :  { %4161 = vmatprep.subr.bf16.mxu0 %v6187_v41  ;;  %v439_v41 = vsub.s32 5, %v6834_v26 }
 0x1f7   :  { %4162 = vmatpush1.bf16.msra.mxu0 %v6185_v42  ;;  %v6287_v42 = vld [vmem:[#allocation8 + $0x848] ss:$24 sps:$4 sm:$0xff]  }
 0x1f8   :  { %4163 = vmatprep.subr.bf16.mxu0 %v6190_v36  ;;  %v6295_v36 = vld [vmem:[#allocation8 + $0x81c] ss:$24 sps:$4 sm:$0xff]  }
 0x1fb   :  { %4164 = vmatpush1.bf16.msra.mxu0 %v6188_v43  ;;  %v436_v43 = vrot.slane %v6836_v30, %v435_v7 }
 0x1fc   :  { %4165 = vmatprep.subr.bf16.mxu0 %v6193_v44  ;;  %v440_v44 = vrot.slane %v6836_v30, %v439_v41  ;;  %v6305_v30 = vld [vmem:[#allocation8 + $0x7b8] ss:$24 sps:$4 sm:$0xff]  }
 0x1ff   :  { %4166 = vmatpush1.bf16.msra.mxu0 %v6191_v45  ;;  %v6293_v45 = vld [vmem:[#allocation8 + $0x818] ss:$24 sps:$4 sm:$0xff]  }
 0x200   :  { %4167 = vmatprep.subr.bf16.mxu0 %v6196_v10  ;;  %v6301_v10 = vld [vmem:[#allocation8 + $0x7ec] ss:$24 sps:$4 sm:$0xff]  }
 0x203   :  { %4168 = vmatpush2.bf16.msra.mxu0 %v6194_v46 }
 0x204   :  { %4169 = vmatprep.subr.bf16.mxu0 %v6199_v47 }
 0x207   :  { %4170 = vmatpush2.bf16.msra.mxu0 %v6197_v49  ;;  %v6299_v49 = vld [vmem:[#allocation8 + $0x7e8] ss:$24 sps:$4 sm:$0xff]  }
 0x208   :  { %4171 = vmatprep.subr.bf16.mxu0 %v6202_v50  ;;  %v6307_v50 = vld [vmem:[#allocation8 + $0x7bc] ss:$24 sps:$4 sm:$0xff]  }
 0x20b   :  { %4172 = vmatpush2.bf16.msra.mxu0 %v6200_v51 }
 0x20c   :  { %4173 = vmatprep.subr.bf16.mxu0 %v6205_v53 }
 0x20f   :  { %4174 = vmatpush2.bf16.msra.mxu0 %v6203_v54 }
 0x210   :  { %4175 = vmatprep.subr.bf16.mxu0 %v6208_v48 }
 0x213   :  { %4176 = vmatpush2.bf16.msra.mxu0 %v6206_v56 }
 0x214   :  { %4177 = vmatprep.subr.bf16.mxu0 %v6211_v58  ;;  %v6313_v58 = vld [vmem:[#allocation8 + $0x78c] ss:$24 sps:$4 sm:$0xff]  }
 0x216   :  { %v6878_v16 = vpop.f32.mrf.mxu0 }
 0x217   :  { %4178 = vmatpush2.bf16.msra.mxu0 %v6209_v37  ;;  %v2168_v46 = vadd.f32 %v6878_v16, %v436_v43  ;;  %v6353_v43 = vld [vmem:[#allocation8 + $0x340] ss:$24 sps:$4 sm:$0xff]  }
 0x218   :  { %v6880_v62 = vpop.f32.mrf.mxu0  ;;  %v6882_v0 = vpop.f32.mrf.mxu1  ;;  %4179 = vmatprep.subr.bf16.mxu0 %v6214_v60 }
 0x219   :  { %v2170_v47 = vadd.f32 %v6880_v62, %v440_v44  ;;  %v2209_v51 = vadd.f32 %v6882_v0, %v2168_v46  ;;  %v6311_v62 = vld [vmem:[#allocation8 + $0x788] ss:$24 sps:$4 sm:$0xff]   ;;  %v6314_v0 = vld [vmem:[#allocation8 + $0x458] ss:$24 sps:$4 sm:$0xff]   ;;  %v6361_v44 = vld [vmem:[#allocation8 + $0x314] ss:$24 sps:$4 sm:$0xff]  }
 0x21a   :  { %v2171_v2 = vpop.f32.mrf.mxu0  ;;  %v6884_v3 = vpop.f32.mrf.mxu1  ;;  %v6359_v46 = vld [vmem:[#allocation8 + $0x310] ss:$24 sps:$4 sm:$0xff]  }
 0x21b   :  { %4180 = vmatpush2.bf16.msra.mxu0 %v6212_v61  ;;  %v2211_v54 = vadd.f32 %v6884_v3, %v2170_v47  ;;  %v6319_v3 = vld [vmem:[#allocation8 + $0x464] ss:$24 sps:$4 sm:$0xff]  }
 0x21c   :  { %v2172_v5 = vpop.f32.mrf.mxu0  ;;  %4181 = vmatprep.subr.bf16.mxu0 %v6217_v1  ;;  %v2212_v8 = vpop.f32.mrf.mxu1  ;;  %v6367_v47 = vld [vmem:[#allocation8 + $0x5e4] ss:$24 sps:$4 sm:$0xff]  }
 0x21d   :  { %v6317_v5 = vld [vmem:[#allocation8 + $0x460] ss:$24 sps:$4 sm:$0xff]   ;;  %v6322_v8 = vld [vmem:[#allocation8 + $0x42c] ss:$24 sps:$4 sm:$0xff]  }
 0x21e   :  { %v2213_v9 = vpop.f32.mrf.mxu1 }
 0x21f   :  { %4182 = vmatpush2.bf16.msra.mxu0 %v6215_v4  ;;  %v6325_v9 = vld [vmem:[#allocation8 + $0x434] ss:$24 sps:$4 sm:$0xff]  }
 0x220   :  { %4233 = vmatprep.subr.bf16.mxu0 %v6223_v6 }
 0x222   :  { %4184 = vmatmul.mubr.bf16.vlgmr.msra.gmra.mxu0 %v6857_v63 }
 0x223   :  { %4234 = vmatpush1.bf16.msra.mxu0 %v6221_v11  ;;  %v6320_v11 = vld [vmem:[#allocation8 + $0x428] ss:$24 sps:$4 sm:$0xff]  }
 0x224   :  { %4235 = vmatprep.subr.bf16.mxu0 %v6229_v12 }
 0x227   :  { %4236 = vmatpush1.bf16.msra.mxu0 %v6227_v13  ;;  %v6328_v13 = vld [vmem:[#allocation8 + $0x3fc] ss:$24 sps:$4 sm:$0xff]  }
 0x228   :  { %4237 = vmatprep.subr.bf16.mxu0 %v6235_v14  ;;  %v6323_v14 = vld [vmem:[#allocation8 + $0x430] ss:$24 sps:$4 sm:$0xff]  }
 0x22b   :  { %4238 = vmatpush1.bf16.msra.mxu0 %v6233_v15 }
 0x22c   :  { %4239 = vmatprep.subr.bf16.mxu0 %v6241_v55  ;;  %v6331_v55 = vld [vmem:[#allocation8 + $0x404] ss:$24 sps:$4 sm:$0xff]  }
 0x22f   :  { %4240 = vmatpush1.bf16.msra.mxu0 %v6239_v17  ;;  %v6326_v17 = vld [vmem:[#allocation8 + $0x3f8] ss:$24 sps:$4 sm:$0xff]  }
 0x230   :  { %4241 = vmatprep.subr.bf16.mxu0 %v6247_v18 }
 0x233   :  { %4242 = vmatpush1.bf16.msra.mxu0 %v6245_v19  ;;  %v6334_v19 = vld [vmem:[#allocation8 + $0x3cc] ss:$24 sps:$4 sm:$0xff]  }
 0x234   :  { %4243 = vmatprep.subr.bf16.mxu0 %v6253_v20  ;;  %v6329_v20 = vld [vmem:[#allocation8 + $0x400] ss:$24 sps:$4 sm:$0xff]  }
 0x237   :  { %4244 = vmatpush1.bf16.msra.mxu0 %v6251_v21  ;;  %v6337_v21 = vld [vmem:[#allocation8 + $0x3d4] ss:$24 sps:$4 sm:$0xff]  }
 0x238   :  { %4245 = vmatprep.subr.bf16.mxu0 %v6259_v59  ;;  %v6332_v59 = vld [vmem:[#allocation8 + $0x3c8] ss:$24 sps:$4 sm:$0xff]  }
 0x23b   :  { %4246 = vmatpush1.bf16.msra.mxu0 %v6257_v22  ;;  %v6340_v22 = vld [vmem:[#allocation8 + $0x39c] ss:$24 sps:$4 sm:$0xff]  }
 0x23c   :  { %4247 = vmatprep.subr.bf16.mxu0 %v6265_v23  ;;  %v6343_v23 = vld [vmem:[#allocation8 + $0x3a4] ss:$24 sps:$4 sm:$0xff]  }
 0x23f   :  { %4248 = vmatpush1.bf16.msra.mxu0 %v6263_v25  ;;  %v6338_v25 = vld [vmem:[#allocation8 + $0x398] ss:$24 sps:$4 sm:$0xff]  }
 0x240   :  { %4249 = vmatprep.subr.bf16.mxu0 %v6271_v28  ;;  %v6346_v28 = vld [vmem:[#allocation8 + $0x36c] ss:$24 sps:$4 sm:$0xff]  }
 0x243   :  { %4250 = vmatpush2.bf16.msra.mxu0 %v6269_v29  ;;  %v6341_v29 = vld [vmem:[#allocation8 + $0x3a0] ss:$24 sps:$4 sm:$0xff]  }
 0x244   :  { %4251 = vmatprep.subr.bf16.mxu0 %v6277_v31  ;;  %v6349_v31 = vld [vmem:[#allocation8 + $0x374] ss:$24 sps:$4 sm:$0xff]  }
 0x247   :  { %4252 = vmatpush2.bf16.msra.mxu0 %v6275_v34  ;;  %v6344_v34 = vld [vmem:[#allocation8 + $0x368] ss:$24 sps:$4 sm:$0xff]  }
 0x248   :  { %4253 = vmatprep.subr.bf16.mxu0 %v6283_v38  ;;  %v6352_v38 = vld [vmem:[#allocation8 + $0x33c] ss:$24 sps:$4 sm:$0xff]  }
 0x24b   :  { %4254 = vmatpush2.bf16.msra.mxu0 %v6281_v39  ;;  %v6347_v39 = vld [vmem:[#allocation8 + $0x370] ss:$24 sps:$4 sm:$0xff]  }
 0x24c   :  { %4255 = vmatprep.subr.bf16.mxu0 %v6289_v52  ;;  %v6355_v52 = vld [vmem:[#allocation8 + $0x344] ss:$24 sps:$4 sm:$0xff]  }
 0x24f   :  { %4256 = vmatpush2.bf16.msra.mxu0 %v6287_v42  ;;  %v6350_v42 = vld [vmem:[#allocation8 + $0x338] ss:$24 sps:$4 sm:$0xff]  }
 0x250   :  { %4257 = vmatprep.subr.bf16.mxu0 %v6295_v36  ;;  %v6358_v36 = vld [vmem:[#allocation8 + $0x30c] ss:$24 sps:$4 sm:$0xff]  }
 0x253   :  { %4258 = vmatpush2.bf16.msra.mxu0 %v6293_v45  ;;  %v6356_v45 = vld [vmem:[#allocation8 + $0x308] ss:$24 sps:$4 sm:$0xff]  }
 0x254   :  { %4259 = vmatprep.subr.bf16.mxu0 %v6301_v10  ;;  %v6364_v10 = vld [vmem:[#allocation8 + $0x5dc] ss:$24 sps:$4 sm:$0xff]  }
 0x256   :  { %v2249_v53 = vpop.f32.mrf.mxu0 }
 0x257   :  { %v2250_v48 = vadd.f32 %v2249_v53, %v2209_v51  ;;  %4260 = vmatpush2.bf16.msra.mxu0 %v6299_v49  ;;  %v6362_v49 = vld [vmem:[#allocation8 + $0x5d8] ss:$24 sps:$4 sm:$0xff]   ;;  %v6373_v53 = vld [vmem:[#allocation8 + $0x5b4] ss:$24 sps:$4 sm:$0xff]  }
 0x258   :  { %v2251_v56 = vpop.f32.mrf.mxu0  ;;  %4261 = vmatprep.subr.bf16.mxu0 %v6307_v50  ;;  %v6370_v50 = vld [vmem:[#allocation8 + $0x5ac] ss:$24 sps:$4 sm:$0xff]   ;;  %v6365_v51 = vld [vmem:[#allocation8 + $0x5e0] ss:$24 sps:$4 sm:$0xff]  }
 0x259   :  { %v2252_v37 = vadd.f32 %v2251_v56, %v2211_v54  ;;  %v2260_v60 = vmax.f32 %v2250_v48, 0.0  ;;  %v6368_v54 = vld [vmem:[#allocation8 + $0x5a8] ss:$24 sps:$4 sm:$0xff]   ;;  %v6376_v48 = vld [vmem:[#allocation8 + $0x57c] ss:$24 sps:$4 sm:$0xff]  }
 0x25a   :  { %v2253_v16 = vpop.f32.mrf.mxu0  ;;  %v6379_v56 = vld [vmem:[#allocation8 + $0x584] ss:$24 sps:$4 sm:$0xff]  }
 0x25b   :  { %v2261_v61 = vmax.f32 %v2252_v37, 0.0  ;;  %4262 = vmatpush2.bf16.msra.mxu0 %v6305_v30  ;;  %v6901_v4 = vpack.c.bf16 %v2260_v60, %v2260_v60  ;;  %v6371_v30 = vld [vmem:[#allocation8 + $0x5b0] ss:$24 sps:$4 sm:$0xff]   ;;  %v6382_v37 = vld [vmem:[#allocation8 + $0x54c] ss:$24 sps:$4 sm:$0xff]  }
 0x25c   :  { %v2254_v1 = vpop.f32.mrf.mxu0  ;;  %4263 = vmatprep.subr.bf16.mxu0 %v6313_v58  ;;  %v6374_v58 = vld [vmem:[#allocation8 + $0x578] ss:$24 sps:$4 sm:$0xff]   ;;  %v6385_v16 = vld [vmem:[#allocation8 + $0x554] ss:$24 sps:$4 sm:$0xff]  }
 0x25d   :  { %v6899_v2 = vpack.c.bf16 %v2261_v61, %v2261_v61  ;;  %v6377_v60 = vld [vmem:[#allocation8 + $0x580] ss:$24 sps:$4 sm:$0xff]   ;;  %v6383_v1 = vld [vmem:[#allocation8 + $0x550] ss:$24 sps:$4 sm:$0xff]  }
 0x25e   :  { %v6380_v61 = vld [vmem:[#allocation8 + $0x548] ss:$24 sps:$4 sm:$0xff]  }
 0x25f   :  { %4264 = vmatpush2.bf16.msra.mxu0 %v6311_v62  ;;  %4142 = vmatprep.mubr.bf16.mxu1 %v6899_v2  ;;  %v6388_v62 = vld [vmem:[#allocation8 + $0x51c] ss:$24 sps:$4 sm:$0xff]  }
 0x260   :  { %4265 = vmatprep.mubr.bf16.mxu0 %v6899_v2  ;;  %v6905_v6 = vpop.f32.mrf.mxu1  ;;  %4143 = vmatmul.mubr.bf16.vlgmr.msra.gmra.mxu1 %v6901_v4 }
 0x261   :  { %4193 = vmatpush1.bf16.msra.mxu1 %v6314_v0  ;;  %4224 = vmatprep.mubr.bf16.mxu1 %v6871_v24  ;;  %v6391_v0 = vld [vmem:[#allocation8 + $0x524] ss:$24 sps:$4 sm:$0xff]  }
 0x262   :  { %4266 = vmatmul.mubr.bf16.vlgmr.msra.gmra.mxu0 %v6901_v4  ;;  %4315 = vmatprep.subr.bf16.mxu0 %v6319_v3  ;;  %v6910_v12 = vpop.f32.mrf.mxu1  ;;  %v6386_v3 = vld [vmem:[#allocation8 + $0x518] ss:$24 sps:$4 sm:$0xff]  }
 0x263   :  { %4316 = vmatpush1.bf16.msra.mxu0 %v6317_v5  ;;  %4347 = vmatprep.mubr.bf16.mxu0 %v6871_v24  ;;  %v6335_v24 = vld [vmem:[#allocation8 + $0x3d0] ss:$24 sps:$4 sm:$0xff]   ;;  %v6394_v5 = vld [vmem:[#allocation8 + $0x4ec] ss:$24 sps:$4 sm:$0xff]  }
 0x264   :  { %4194 = vmatprep.subr.bf16.mxu1 %v6322_v8  ;;  %v4066_v15 = vpop.f32.mrf.mxu1  ;;  %4317 = vmatprep.subr.bf16.mxu0 %v6325_v9  ;;  %v6389_v8 = vld [vmem:[#allocation8 + $0x520] ss:$24 sps:$4 sm:$0xff]   ;;  %v6397_v9 = vld [vmem:[#allocation8 + $0x4f4] ss:$24 sps:$4 sm:$0xff]  }
 0x265   :  { %4195 = vmatpush1.bf16.msra.mxu1 %v6320_v11  ;;  %v6392_v11 = vld [vmem:[#allocation8 + $0x4e8] ss:$24 sps:$4 sm:$0xff]   ;;  %v6403_v15 = vld [vmem:[#allocation8 + $0x4c4] ss:$24 sps:$4 sm:$0xff]  }
 0x266   :  { %v4067_v18 = vpop.f32.mrf.mxu1  ;;  %4196 = vmatprep.subr.bf16.mxu1 %v6328_v13  ;;  %v6400_v13 = vld [vmem:[#allocation8 + $0x4bc] ss:$24 sps:$4 sm:$0xff]  }
 0x267   :  { %4318 = vmatpush1.bf16.msra.mxu0 %v6323_v14  ;;  %v6395_v14 = vld [vmem:[#allocation8 + $0x4f0] ss:$24 sps:$4 sm:$0xff]   ;;  %v6401_v18 = vld [vmem:[#allocation8 + $0x4c0] ss:$24 sps:$4 sm:$0xff]  }
 0x268   :  { %4319 = vmatprep.subr.bf16.mxu0 %v6331_v55  ;;  %v6398_v55 = vld [vmem:[#allocation8 + $0x4b8] ss:$24 sps:$4 sm:$0xff]  }
 0x269   :  { %4197 = vmatpush1.bf16.msra.mxu1 %v6326_v17  ;;  %v6406_v17 = vld [vmem:[#allocation8 + $0x48c] ss:$24 sps:$4 sm:$0xff]  }
 0x26a   :  { %4198 = vmatprep.subr.bf16.mxu1 %v6334_v19  ;;  %v6409_v19 = vld [vmem:[#allocation8 + $0x494] ss:$24 sps:$4 sm:$0xff]  }
 0x26b   :  { %4320 = vmatpush1.bf16.msra.mxu0 %v6329_v20  ;;  %v6404_v20 = vld [vmem:[#allocation8 + $0x488] ss:$24 sps:$4 sm:$0xff]  }
 0x26c   :  { %4321 = vmatprep.subr.bf16.mxu0 %v6337_v21  ;;  %v6913_v21 = vld [vmem:[#allocation10] sm:$0x3f] }
 0x26d   :  { %4199 = vmatpush1.bf16.msra.mxu1 %v6332_v59  ;;  %v6412_v59 = vld [vmem:[#allocation8 + $0x164] ss:$24 sps:$4 sm:$0xff]  }
 0x26e   :  { %4200 = vmatprep.subr.bf16.mxu1 %v6340_v22  ;;  %v6407_v22 = vld [vmem:[#allocation8 + $0x490] ss:$24 sps:$4 sm:$0xff]  }
 0x26f   :  { %4322 = vmatpush1.bf16.msra.mxu0 %v6335_v24  ;;  %v6491_v24 = vld [vmem:[#allocation11 + $0x78] sm:$0xff]  }
 0x270   :  { %4323 = vmatprep.subr.bf16.mxu0 %v6343_v23  ;;  %v2561_v23 = vrot.slane %v6913_v21, %v419_v32  ;;  %v6413_v32 = vld [vmem:[#allocation8 + $0x130] ss:$24 sps:$4 sm:$0xff]  }
 0x271   :  { %4201 = vmatpush1.bf16.msra.mxu1 %v6338_v25  ;;  %v6410_v25 = vld [vmem:[#allocation8 + $0x160] ss:$24 sps:$4 sm:$0xff]  }
 0x272   :  { %4202 = vmatprep.subr.bf16.mxu1 %v6346_v28  ;;  %v6415_v28 = vld [vmem:[#allocation8 + $0x134] ss:$24 sps:$4 sm:$0xff]  }
 0x273   :  { %4324 = vmatpush1.bf16.msra.mxu0 %v6341_v29  ;;  %v2565_v29 = vrot.slane %v6913_v21, %v423_v35 }
 0x274   :  { %4325 = vmatprep.subr.bf16.mxu0 %v6349_v31  ;;  %v6495_v31 = vld [vmem:[#allocation11 + $0x38] sm:$0xff]  }
 0x275   :  { %4203 = vmatpush1.bf16.msra.mxu1 %v6344_v34  ;;  %v6496_v34 = vld [vmem:[#allocation11 + $0x70] sm:$0xff]  }
 0x276   :  { %4204 = vmatprep.subr.bf16.mxu1 %v6352_v38  ;;  %v4063_v38 = vadd.f32 %v6905_v6, %v2561_v23  ;;  %v6416_v6 = vld [vmem:[#allocation8 + $0x100] ss:$24 sps:$4 sm:$0xff]   ;;  %v6455_v23 = vld [vmem:[#allocation8 + $0x190] ss:$24 sps:$4 sm:$0xff]  }
 0x277   :  { %4326 = vmatpush1.bf16.msra.mxu0 %v6347_v39 }
 0x278   :  { %4327 = vmatprep.subr.bf16.mxu0 %v6355_v52  ;;  %v6418_v52 = vld [vmem:[#allocation8 + $0x104] ss:$24 sps:$4 sm:$0xff]  }
 0x279   :  { %4205 = vmatpush1.bf16.msra.mxu1 %v6350_v42  ;;  %v4065_v42 = vadd.f32 %v6910_v12, %v2565_v29  ;;  %v6419_v12 = vld [vmem:[#allocation8 + $0xd0] ss:$24 sps:$4 sm:$0xff]   ;;  %v6463_v29 = vld [vmem:[#allocation8 + $0x734] ss:$24 sps:$4 sm:$0xff]  }
 0x27a   :  { %4206 = vmatprep.subr.bf16.mxu1 %v6358_v36  ;;  %v6500_v36 = vld [vmem:[#allocation11 + $0x30] sm:$0xff]  }
 0x27b   :  { %4328 = vmatpush1.bf16.msra.mxu0 %v6353_v43 }
 0x27c   :  { %4329 = vmatprep.subr.bf16.mxu0 %v6361_v44  ;;  %v6501_v44 = vld [vmem:[#allocation11 + $0x68] sm:$0xff]  }
 0x27d   :  { %4207 = vmatpush1.bf16.msra.mxu1 %v6356_v45 }
 0x27e   :  { %4208 = vmatprep.subr.bf16.mxu1 %v6364_v10  ;;  %v6421_v10 = vld [vmem:[#allocation8 + $0xd4] ss:$24 sps:$4 sm:$0xff]  }
 0x27f   :  { %4330 = vmatpush1.bf16.msra.mxu0 %v6359_v46 }
 0x280   :  { %4331 = vmatprep.subr.bf16.mxu0 %v6367_v47  ;;  %v6506_v47 = vld [vmem:[#allocation11 + $0x60] sm:$0xff]  }
 0x281   :  { %4209 = vmatpush2.bf16.msra.mxu1 %v6362_v49  ;;  %v6424_v49 = vld [vmem:[#allocation8 + $0xa4] ss:$24 sps:$4 sm:$0xff]  }
 0x282   :  { %4210 = vmatprep.subr.bf16.mxu1 %v6370_v50  ;;  %v6510_v50 = vld [vmem:[#allocation11 + $0x20] sm:$0xff]  }
 0x283   :  { %4332 = vmatpush2.bf16.msra.mxu0 %v6365_v51  ;;  %v6511_v51 = vld [vmem:[#allocation11 + $0x58] sm:$0xff]  }
 0x284   :  { %4333 = vmatprep.subr.bf16.mxu0 %v6373_v53  ;;  %v6422_v53 = vld [vmem:[#allocation8 + $0xa0] ss:$24 sps:$4 sm:$0xff]  }
 0x285   :  { %4211 = vmatpush2.bf16.msra.mxu1 %v6368_v54  ;;  %v6427_v54 = vld [vmem:[#allocation8 + $0x74] ss:$24 sps:$4 sm:$0xff]  }
 0x286   :  { %4212 = vmatprep.subr.bf16.mxu1 %v6376_v48  ;;  %v6515_v48 = vld [vmem:[#allocation11 + $0x18] sm:$0xff]  }
 0x287   :  { %4334 = vmatpush2.bf16.msra.mxu0 %v6371_v30  ;;  %v6516_v30 = vld [vmem:[#allocation11 + $0x50] sm:$0xff]  }
 0x288   :  { %4335 = vmatprep.subr.bf16.mxu0 %v6379_v56  ;;  %v6425_v56 = vld [vmem:[#allocation8 + $0x70] ss:$24 sps:$4 sm:$0xff]  }
 0x289   :  { %4213 = vmatpush2.bf16.msra.mxu1 %v6374_v58  ;;  %v6430_v58 = vld [vmem:[#allocation8 + $0x44] ss:$24 sps:$4 sm:$0xff]  }
 0x28a   :  { %4214 = vmatprep.subr.bf16.mxu1 %v6382_v37  ;;  %v6517_v37 = vld [vmem:[#allocation11 + $0x10] sm:$0xff]  }
 0x28b   :  { %4336 = vmatpush2.bf16.msra.mxu0 %v6377_v60  ;;  %v6518_v60 = vld [vmem:[#allocation11 + $0x48] sm:$0xff]  }
 0x28c   :  { %4337 = vmatprep.subr.bf16.mxu0 %v6385_v16  ;;  %v6428_v16 = vld [vmem:[#allocation8 + $0x40] ss:$24 sps:$4 sm:$0xff]  }
 0x28d   :  { %4215 = vmatpush2.bf16.msra.mxu1 %v6380_v61  ;;  %v6433_v61 = vld [vmem:[#allocation8 + $0x14] ss:$24 sps:$4 sm:$0xff]  }
 0x28e   :  { %4216 = vmatprep.subr.bf16.mxu1 %v6388_v62  ;;  %v6519_v62 = vld [vmem:[#allocation11 + $0x8] sm:$0xff]  }
 0x28f   :  { %4338 = vmatpush2.bf16.msra.mxu0 %v6383_v1  ;;  %v6520_v1 = vld [vmem:[#allocation11 + $0x40] sm:$0xff]  }
 0x290   :  { %4339 = vmatprep.subr.bf16.mxu0 %v6391_v0  ;;  %v6431_v0 = vld [vmem:[#allocation8 + $0x10] ss:$24 sps:$4 sm:$0xff]  }
 0x291   :  { %4217 = vmatpush2.bf16.msra.mxu1 %v6386_v3  ;;  %v6436_v3 = vld [vmem:[#allocation8 + $0x2e4] ss:$24 sps:$4 sm:$0xff]  }
 0x292   :  { %4218 = vmatprep.subr.bf16.mxu1 %v6394_v5  ;;  %v6521_v5 = vld [vmem:[#allocation11] sm:$0xff]  }
 0x293   :  { %4340 = vmatpush2.bf16.msra.mxu0 %v6389_v8  ;;  %v6434_v8 = vld [vmem:[#allocation8 + $0x2e0] ss:$24 sps:$4 sm:$0xff]  }
 0x294   :  { %4341 = vmatprep.subr.bf16.mxu0 %v6397_v9  ;;  %v6439_v9 = vld [vmem:[#allocation8 + $0x2b4] ss:$24 sps:$4 sm:$0xff]  }
 0x295   :  { %4219 = vmatpush2.bf16.msra.mxu1 %v6392_v11  ;;  %v6437_v11 = vld [vmem:[#allocation8 + $0x2b0] ss:$24 sps:$4 sm:$0xff]  }
 0x296   :  { %4220 = vmatprep.subr.bf16.mxu1 %v6400_v13  ;;  %v6442_v13 = vld [vmem:[#allocation8 + $0x284] ss:$24 sps:$4 sm:$0xff]  }
 0x297   :  { %4342 = vmatpush2.bf16.msra.mxu0 %v6395_v14  ;;  %v6440_v14 = vld [vmem:[#allocation8 + $0x280] ss:$24 sps:$4 sm:$0xff]  }
 0x298   :  { %4343 = vmatprep.subr.bf16.mxu0 %v6403_v15  ;;  %v6445_v15 = vld [vmem:[#allocation8 + $0x254] ss:$24 sps:$4 sm:$0xff]  }
 0x299   :  { %4221 = vmatpush2.bf16.msra.mxu1 %v6398_v55  ;;  %v6443_v55 = vld [vmem:[#allocation8 + $0x250] ss:$24 sps:$4 sm:$0xff]  }
 0x29a   :  { %4222 = vmatprep.subr.bf16.mxu1 %v6406_v17  ;;  %v6448_v17 = vld [vmem:[#allocation8 + $0x224] ss:$24 sps:$4 sm:$0xff]  }
 0x29b   :  { %4344 = vmatpush2.bf16.msra.mxu0 %v6401_v18  ;;  %v6446_v18 = vld [vmem:[#allocation8 + $0x220] ss:$24 sps:$4 sm:$0xff]  }
 0x29c   :  { %4345 = vmatprep.subr.bf16.mxu0 %v6409_v19  ;;  %v6451_v19 = vld [vmem:[#allocation8 + $0x1f4] ss:$24 sps:$4 sm:$0xff]  }
 0x29d   :  { %4223 = vmatpush2.bf16.msra.mxu1 %v6404_v20  ;;  %v6449_v20 = vld [vmem:[#allocation8 + $0x1f0] ss:$24 sps:$4 sm:$0xff]  }
 0x29e   :  { %4274 = vmatprep.subr.bf16.mxu1 %v6412_v59  ;;  %v6454_v59 = vld [vmem:[#allocation8 + $0x1c4] ss:$24 sps:$4 sm:$0xff]  }
 0x29f   :  { %4346 = vmatpush2.bf16.msra.mxu0 %v6407_v22  ;;  %v6452_v22 = vld [vmem:[#allocation8 + $0x1c0] ss:$24 sps:$4 sm:$0xff]  }
 0x2a0   :  { %4225 = vmatmul.mubr.bf16.vlgmr.msra.gmra.mxu1 %v6873_v27  ;;  %5564 = vmatprep.subr.bf16.mxu0 %v6491_v24  ;;  %v6457_v24 = vld [vmem:[#allocation8 + $0x194] ss:$24 sps:$4 sm:$0xff]  }
 0x2a1   :  { %4275 = vmatpush1.bf16.msra.mxu1 %v6410_v25  ;;  %4306 = vmatprep.mubr.bf16.mxu1 %v6855_v40  ;;  %v6460_v25 = vld [vmem:[#allocation8 + $0x764] ss:$24 sps:$4 sm:$0xff]  }
 0x2a2   :  { %4348 = vmatmul.mubr.bf16.vlgmr.msra.gmra.mxu0 %v6873_v27  ;;  %v4103_v39 = vpop.f32.mrf.mxu0  ;;  %4276 = vmatprep.subr.bf16.mxu1 %v6415_v28  ;;  %v6505_v27 = vld [vmem:[#allocation11 + $0x28] sm:$0xff]   ;;  %v6458_v28 = vld [vmem:[#allocation8 + $0x760] ss:$24 sps:$4 sm:$0xff]  }
 0x2a3   :  { %v6926_v35 = vadd.f32 %v4103_v39, %v4063_v38  ;;  %5565 = vmatpush3.bf16.msra.mxu0 %v6495_v31  ;;  %v6461_v31 = vld [vmem:[#allocation8 + $0x730] ss:$24 sps:$4 sm:$0xff]   ;;  %v6466_v38 = vld [vmem:[#allocation8 + $0x704] ss:$24 sps:$4 sm:$0xff]   ;;  %v6464_v39 = vld [vmem:[#allocation8 + $0x700] ss:$24 sps:$4 sm:$0xff]  }
 0x2a4   :  { %v4105_v43 = vpop.f32.mrf.mxu0  ;;  %5566 = vmatprep.subr.bf16.mxu0 %v6496_v34 }
 0x2a5   :  { %v6928_v45 = vadd.f32 %v4105_v43, %v4065_v42  ;;  %4277 = vmatpush1.bf16.msra.mxu1 %v6413_v32  ;;  %v6469_v42 = vld [vmem:[#allocation8 + $0x6d4] ss:$24 sps:$4 sm:$0xff]   ;;  %v6467_v43 = vld [vmem:[#allocation8 + $0x6d0] ss:$24 sps:$4 sm:$0xff]  }
 0x2a6   :  { %v4107_v40 = vpop.f32.mrf.mxu0  ;;  %4278 = vmatprep.subr.bf16.mxu1 %v6418_v52 }
 0x2a7   :  { %5567 = vmatpush3.bf16.msra.mxu0 %v6500_v36  ;;  %v6478_v40 = vld [vmem:[#allocation8 + $0x644] ss:$24 sps:$4 sm:$0xff]  }
 0x2a8   :  { %v4108_v46 = vpop.f32.mrf.mxu0  ;;  %5568 = vmatprep.subr.bf16.mxu0 %v6501_v44  ;;  %v6470_v44 = vld [vmem:[#allocation8 + $0x6a0] ss:$24 sps:$4 sm:$0xff]  }
 0x2a9   :  { %4279 = vmatpush1.bf16.msra.mxu1 %v6416_v6  ;;  %v6473_v6 = vld [vmem:[#allocation8 + $0x670] ss:$24 sps:$4 sm:$0xff]  }
 0x2aa   :  { %4280 = vmatprep.subr.bf16.mxu1 %v6421_v10  ;;  %v6476_v10 = vld [vmem:[#allocation8 + $0x640] ss:$24 sps:$4 sm:$0xff]   ;;  %v6479_v46 = vld [vmem:[#allocation8 + $0x610] ss:$24 sps:$4 sm:$0xff]  }
 0x2ab   :  { %5569 = vmatpush3.bf16.msra.mxu0 %v6505_v27  ;;  %v6481_v27 = vld [vmem:[#allocation8 + $0x614] ss:$24 sps:$4 sm:$0xff]  }
 0x2ac   :  { %5570 = vmatprep.subr.bf16.mxu0 %v6506_v47  ;;  %v6484_v47 = vld [vmem:[#allocation8 + $0x8e4] ss:$24 sps:$4 sm:$0xff]  }
 0x2ad   :  { %4281 = vmatpush1.bf16.msra.mxu1 %v6419_v12  ;;  %v6482_v12 = vld [vmem:[#allocation8 + $0x8e0] ss:$24 sps:$4 sm:$0xff]  }
 0x2ae   :  { %4282 = vmatprep.subr.bf16.mxu1 %v6424_v49  ;;  %v6487_v49 = vld [vmem:[#allocation8 + $0x8b4] ss:$24 sps:$4 sm:$0xff]  }
 0x2af   :  { %5571 = vmatpush3.bf16.msra.mxu0 %v6510_v50  ;;  %v6485_v50 = vld [vmem:[#allocation8 + $0x8b0] ss:$24 sps:$4 sm:$0xff]  }
 0x2b0   :  { %5572 = vmatprep.subr.bf16.mxu0 %v6511_v51  ;;  %v6490_v51 = vld [vmem:[#allocation8 + $0x884] ss:$24 sps:$4 sm:$0xff]  }
 0x2b1   :  { %4283 = vmatpush1.bf16.msra.mxu1 %v6422_v53  ;;  %v6488_v53 = vld [vmem:[#allocation8 + $0x880] ss:$24 sps:$4 sm:$0xff]  }
 0x2b2   :  { %4284 = vmatprep.subr.bf16.mxu1 %v6427_v54  ;;  %v6494_v54 = vld [vmem:[#allocation8 + $0x854] ss:$24 sps:$4 sm:$0xff]  }
 0x2b3   :  { %5573 = vmatpush3.bf16.msra.mxu0 %v6515_v48  ;;  %v6492_v48 = vld [vmem:[#allocation8 + $0x850] ss:$24 sps:$4 sm:$0xff]  }
 0x2b4   :  { %5574 = vmatprep.subr.bf16.mxu0 %v6516_v30  ;;  %v6499_v30 = vld [vmem:[#allocation8 + $0x824] ss:$24 sps:$4 sm:$0xff]  }
 0x2b5   :  { %4285 = vmatpush1.bf16.msra.mxu1 %v6425_v56  ;;  %v6497_v56 = vld [vmem:[#allocation8 + $0x820] ss:$24 sps:$4 sm:$0xff]  }
 0x2b6   :  { %4286 = vmatprep.subr.bf16.mxu1 %v6430_v58  ;;  %v6504_v58 = vld [vmem:[#allocation8 + $0x7f4] ss:$24 sps:$4 sm:$0xff]  }
 0x2b7   :  { %5575 = vmatpush3.bf16.msra.mxu0 %v6517_v37  ;;  %v6502_v37 = vld [vmem:[#allocation8 + $0x7f0] ss:$24 sps:$4 sm:$0xff]  }
 0x2b8   :  { %5576 = vmatprep.subr.bf16.mxu0 %v6518_v60  ;;  %v6509_v60 = vld [vmem:[#allocation8 + $0x7c4] ss:$24 sps:$4 sm:$0xff]  }
 0x2b9   :  { %4287 = vmatpush1.bf16.msra.mxu1 %v6428_v16  ;;  %v6507_v16 = vld [vmem:[#allocation8 + $0x7c0] ss:$24 sps:$4 sm:$0xff]  }
 0x2ba   :  { %4288 = vmatprep.subr.bf16.mxu1 %v6433_v61  ;;  %v6514_v61 = vld [vmem:[#allocation8 + $0x794] ss:$24 sps:$4 sm:$0xff]  }
 0x2bb   :  { %5577 = vmatpush3.bf16.msra.mxu0 %v6519_v62  ;;  %v6512_v62 = vld [vmem:[#allocation8 + $0x790] ss:$24 sps:$4 sm:$0xff]  }
 0x2bc   :  { %5578 = vmatprep.subr.bf16.mxu0 %v6520_v1  ;;  %v6522_v1 = vld [vmem:[#allocation11 + $0xf8] sm:$0xff]  }
 0x2bd   :  { %4289 = vmatpush1.bf16.msra.mxu1 %v6431_v0  ;;  %v6523_v0 = vld [vmem:[#allocation11 + $0xb8] sm:$0xff]  }
 0x2be   :  { %4290 = vmatprep.subr.bf16.mxu1 %v6436_v3  ;;  %v6524_v3 = vld [vmem:[#allocation11 + $0xf0] sm:$0xff]  }
 0x2bf   :  { %5579 = vmatpush3.bf16.msra.mxu0 %v6521_v5 }
 0x2c1   :  { %4291 = vmatpush2.bf16.msra.mxu1 %v6434_v8 }
 0x2c2   :  { %4292 = vmatprep.subr.bf16.mxu1 %v6439_v9  ;;  %v6525_v9 = vld [vmem:[#allocation11 + $0xb0] sm:$0xff]  }
 0x2c5   :  { %4293 = vmatpush2.bf16.msra.mxu1 %v6437_v11 }
 0x2c6   :  { %4294 = vmatprep.subr.bf16.mxu1 %v6442_v13 }
 0x2c9   :  { %4295 = vmatpush2.bf16.msra.mxu1 %v6440_v14  ;;  %v6526_v14 = vld [vmem:[#allocation11 + $0xe8] sm:$0xff]  }
 0x2ca   :  { %4296 = vmatprep.subr.bf16.mxu1 %v6445_v15 }
 0x2cd   :  { %4297 = vmatpush2.bf16.msra.mxu1 %v6443_v55 }
 0x2ce   :  { %4298 = vmatprep.subr.bf16.mxu1 %v6448_v17 }
 0x2d1   :  { %4299 = vmatpush2.bf16.msra.mxu1 %v6446_v18 }
 0x2d2   :  { %4300 = vmatprep.subr.bf16.mxu1 %v6451_v19 }
 0x2d5   :  { %4301 = vmatpush2.bf16.msra.mxu1 %v6449_v20  ;;  %v6527_v20 = vld [vmem:[#allocation11 + $0xa8] sm:$0xff]  }
 0x2d6   :  { %4302 = vmatprep.subr.bf16.mxu1 %v6454_v59 }
 0x2d9   :  { %4303 = vmatpush2.bf16.msra.mxu1 %v6452_v22  ;;  %v6538_v22 = vld [vmem:[#allocation11 + $0x178] sm:$0xff]  }
 0x2da   :  { %4304 = vmatprep.subr.bf16.mxu1 %v6457_v24  ;;  %5608 = vmatprep.subr.bf16.mxu0 %v6538_v22 }
 0x2dd   :  { %4305 = vmatpush2.bf16.msra.mxu1 %v6455_v23  ;;  %v6539_v23 = vld [vmem:[#allocation11 + $0x138] sm:$0xff]  }
 0x2de   :  { %4356 = vmatprep.subr.bf16.mxu1 %v6460_v25 }
 0x2e0   :  { %4307 = vmatmul.mubr.bf16.vlgmr.msra.gmra.mxu1 %v6857_v63  ;;  %v6472_v63 = vld [vmem:[#allocation8 + $0x6a4] ss:$24 sps:$4 sm:$0xff]  }
 0x2e1   :  { %4357 = vmatpush1.bf16.msra.mxu1 %v6458_v28  ;;  %4388 = vmatprep.mubr.bf16.mxu1 %v6899_v2  ;;  %v6475_v2 = vld [vmem:[#allocation8 + $0x674] ss:$24 sps:$4 sm:$0xff]  }
 0x2e2   :  { %v6932_v34 = vpop.f32.mrf.mxu0  ;;  %4358 = vmatprep.subr.bf16.mxu1 %v6463_v29  ;;  %v6540_v29 = vld [vmem:[#allocation11 + $0x170] sm:$0xff]  }
 0x2e4   :  { %v6934_v32 = vpop.f32.mrf.mxu0 }
 0x2e5   :  { %4359 = vmatpush1.bf16.msra.mxu1 %v6461_v31  ;;  %v6530_v31 = vld [vmem:[#allocation11 + $0xd8] sm:$0xff]  }
 0x2e6   :  { %v4189_v52 = vpop.f32.mrf.mxu0  ;;  %4360 = vmatprep.subr.bf16.mxu1 %v6466_v38  ;;  %v6541_v38 = vld [vmem:[#allocation11 + $0x130] sm:$0xff]  }
 0x2e7   :  { %v6531_v52 = vld [vmem:[#allocation11 + $0x98] sm:$0xff]  }
 0x2e8   :  { %v4190_v36 = vpop.f32.mrf.mxu0 }
 0x2e9   :  { %4361 = vmatpush1.bf16.msra.mxu1 %v6464_v39  ;;  %v6542_v39 = vld [vmem:[#allocation11 + $0x168] sm:$0xff]  }
 0x2ea   :  { %4362 = vmatprep.subr.bf16.mxu1 %v6469_v42  ;;  %v6532_v42 = vld [vmem:[#allocation11 + $0xd0] sm:$0xff]   ;;  %v6543_v36 = vld [vmem:[#allocation11 + $0x128] sm:$0xff]  }
 0x2ed   :  { %4363 = vmatpush1.bf16.msra.mxu1 %v6467_v43  ;;  %v6544_v43 = vld [vmem:[#allocation11 + $0x160] sm:$0xff]  }
 0x2ee   :  { %4364 = vmatprep.subr.bf16.mxu1 %v6472_v63  ;;  %v6533_v63 = vld [vmem:[#allocation11 + $0x90] sm:$0xff]  }
 0x2f1   :  { %4365 = vmatpush1.bf16.msra.mxu1 %v6470_v44  ;;  %v6534_v44 = vld [vmem:[#allocation11 + $0xc8] sm:$0xff]  }
 0x2f2   :  { %4366 = vmatprep.subr.bf16.mxu1 %v6475_v2  ;;  %v6545_v2 = vld [vmem:[#allocation11 + $0x120] sm:$0xff]  }
 0x2f5   :  { %4367 = vmatpush1.bf16.msra.mxu1 %v6473_v6  ;;  %v6546_v6 = vld [vmem:[#allocation11 + $0x158] sm:$0xff]  }
 0x2f6   :  { %4368 = vmatprep.subr.bf16.mxu1 %v6478_v40  ;;  %v6535_v40 = vld [vmem:[#allocation11 + $0x88] sm:$0xff]  }
 0x2f9   :  { %4369 = vmatpush1.bf16.msra.mxu1 %v6476_v10  ;;  %v6536_v10 = vld [vmem:[#allocation11 + $0xc0] sm:$0xff]  }
 0x2fa   :  { %4370 = vmatprep.subr.bf16.mxu1 %v6481_v27  ;;  %v6547_v27 = vld [vmem:[#allocation11 + $0x118] sm:$0xff]  }
 0x2fd   :  { %4371 = vmatpush1.bf16.msra.mxu1 %v6479_v46  ;;  %v6548_v46 = vld [vmem:[#allocation11 + $0x150] sm:$0xff]  }
 0x2fe   :  { %4372 = vmatprep.subr.bf16.mxu1 %v6484_v47  ;;  %v6537_v47 = vld [vmem:[#allocation11 + $0x80] sm:$0xff]  }
 0x301   :  { %4373 = vmatpush2.bf16.msra.mxu1 %v6482_v12  ;;  %v6549_v12 = vld [vmem:[#allocation11 + $0x110] sm:$0xff]  }
 0x302   :  { %4374 = vmatprep.subr.bf16.mxu1 %v6487_v49  ;;  %v2569_v49 = vrot.slane %v6913_v21, %v427_v33 }
 0x305   :  { %4375 = vmatpush2.bf16.msra.mxu1 %v6485_v50  ;;  %v2573_v50 = vrot.slane %v6913_v21, %v431_v57 }
 0x306   :  { %4376 = vmatprep.subr.bf16.mxu1 %v6490_v51  ;;  %v4186_v51 = vadd.f32 %v6932_v34, %v2569_v49 }
 0x309   :  { %4377 = vmatpush2.bf16.msra.mxu1 %v6488_v53 }
 0x30a   :  { %4378 = vmatprep.subr.bf16.mxu1 %v6494_v54  ;;  %v6550_v54 = vld [vmem:[#allocation11 + $0x148] sm:$0xff]  }
 0x30d   :  { %4379 = vmatpush2.bf16.msra.mxu1 %v6492_v48  ;;  %v4188_v48 = vadd.f32 %v6934_v32, %v2573_v50 }
 0x30e   :  { %4380 = vmatprep.subr.bf16.mxu1 %v6499_v30 }
 0x311   :  { %4381 = vmatpush2.bf16.msra.mxu1 %v6497_v56  ;;  %v6551_v56 = vld [vmem:[#allocation11 + $0x108] sm:$0xff]  }
 0x312   :  { %4382 = vmatprep.subr.bf16.mxu1 %v6504_v58 }
 0x315   :  { %4383 = vmatpush2.bf16.msra.mxu1 %v6502_v37 }
 0x316   :  { %4384 = vmatprep.subr.bf16.mxu1 %v6509_v60 }
 0x319   :  { %4385 = vmatpush2.bf16.msra.mxu1 %v6507_v16 }
 0x31a   :  { %4386 = vmatprep.subr.bf16.mxu1 %v6514_v61 }
 0x31d   :  { %4387 = vmatpush2.bf16.msra.mxu1 %v6512_v62  ;;  %v6552_v62 = vld [vmem:[#allocation11 + $0x140] sm:$0xff]  }
 0x31e   :  { %5586 = vmatprep.subr.bf16.mxu1 %v6522_v1  ;;  %v6553_v1 = vld [vmem:[#allocation11 + $0x100] sm:$0xff]  }
 0x320   :  { %4389 = vmatmul.mubr.bf16.vlgmr.msra.gmra.mxu1 %v6901_v4  ;;  %v4144_v5 = vpop.f32.mrf.mxu1 }
 0x321   :  { %v4145_v8 = vadd.f32 %v4144_v5, %v6926_v35  ;;  %5587 = vmatpush3.bf16.msra.mxu1 %v6523_v0  ;;  %v6528_v35 = vld [vmem:[#allocation11 + $0xe0] sm:$0xff]  }
 0x322   :  { %v6938_v11 = vpop.f32.mrf.mxu0  ;;  %v4146_v13 = vpop.f32.mrf.mxu1  ;;  %5588 = vmatprep.subr.bf16.mxu1 %v6524_v3 }
 0x323   :  { %v4147_v15 = vadd.f32 %v4146_v13, %v6928_v45  ;;  %v4397_v55 = vmax.f32 %v4145_v8, 0.0  ;;  %v6529_v45 = vld [vmem:[#allocation11 + $0xa0] sm:$0xff]  }
 0x324   :  { %v6941_v17 = vpop.f32.mrf.mxu0  ;;  %v4148_v18 = vpop.f32.mrf.mxu1 }
 0x325   :  { %v4398_v19 = vmax.f32 %v4147_v15, 0.0  ;;  %5589 = vmatpush3.bf16.msra.mxu1 %v6525_v9  ;;  %v4403_v25 = vpack.c.bf16 %v4397_v55, %v4397_v55  ;;  %v2577_v55 = vrot.slane %v6913_v21, %v435_v7 }
 0x326   :  { %v4271_v4 = vpop.f32.mrf.mxu0  ;;  %v4149_v59 = vpop.f32.mrf.mxu1  ;;  %5590 = vmatprep.subr.bf16.mxu1 %v6526_v14 }
 0x327   :  { %v4404_v24 = vpack.c.bf16 %v4398_v19, %v4398_v19 }
 0x328   :  { %v4272_v28 = vpop.f32.mrf.mxu0 }
 0x329   :  { %4832 = vmatprep.mubr.bf16.mxu0 %v4404_v24  ;;  %5591 = vmatpush3.bf16.msra.mxu1 %v6527_v20 }
 0x32a   :  { %4833 = vmatmul.mubr.bf16.vlgmr.msra.gmra.mxu0 %v4403_v25  ;;  %5592 = vmatprep.subr.bf16.mxu1 %v6528_v35 }
 0x32b   :  { %5609 = vmatpush3.bf16.msra.mxu0 %v6539_v23 }
 0x32c   :  { %5610 = vmatprep.subr.bf16.mxu0 %v6540_v29 }
 0x32d   :  { %5593 = vmatpush3.bf16.msra.mxu1 %v6529_v45 }
 0x32e   :  { %5594 = vmatprep.subr.bf16.mxu1 %v6530_v31 }
 0x32f   :  { %5611 = vmatpush3.bf16.msra.mxu0 %v6541_v38 }
 0x330   :  { %5612 = vmatprep.subr.bf16.mxu0 %v6542_v39  ;;  %v5515_v39 = vld [vmem:[#allocation13] ss:$0 sm:$0xff] }
 0x331   :  { %5595 = vmatpush3.bf16.msra.mxu1 %v6531_v52 }
 0x332   :  { %5596 = vmatprep.subr.bf16.mxu1 %v6532_v42 }
 0x333   :  { %5613 = vmatpush3.bf16.msra.mxu0 %v6543_v36 }
 0x334   :  { %5614 = vmatprep.subr.bf16.mxu0 %v6544_v43 }
 0x335   :  { %5597 = vmatpush3.bf16.msra.mxu1 %v6533_v63 }
 0x336   :  { %5598 = vmatprep.subr.bf16.mxu1 %v6534_v44 }
 0x337   :  { %5615 = vmatpush3.bf16.msra.mxu0 %v6545_v2 }
 0x338   :  { %5616 = vmatprep.subr.bf16.mxu0 %v6546_v6 }
 0x339   :  { %5599 = vmatpush3.bf16.msra.mxu1 %v6535_v40 }
 0x33a   :  { %5600 = vmatprep.subr.bf16.mxu1 %v6536_v10 }
 0x33b   :  { %5617 = vmatpush3.bf16.msra.mxu0 %v6547_v27 }
 0x33c   :  { %5618 = vmatprep.subr.bf16.mxu0 %v6548_v46 }
 0x33d   :  { %5601 = vmatpush3.bf16.msra.mxu1 %v6537_v47 }
 0x33f   :  { %5619 = vmatpush3.bf16.msra.mxu0 %v6549_v12 }
 0x340   :  { %5620 = vmatprep.subr.bf16.mxu0 %v6550_v54 }
 0x343   :  { %5621 = vmatpush3.bf16.msra.mxu0 %v6551_v56 }
 0x344   :  { %5622 = vmatprep.subr.bf16.mxu0 %v6552_v62 }
 0x347   :  { %5623 = vmatpush3.bf16.msra.mxu0 %v6553_v1 }
 0x360   :  { %v4226_v53 = vpop.f32.mrf.mxu1 }
 0x361   :  { %v4227_v30 = vadd.f32 %v4226_v53, %v4186_v51 }
 0x362   :  { %v4228_v58 = vpop.f32.mrf.mxu1  ;;  %v4349_v37 = vpop.f32.mrf.mxu0 }
 0x363   :  { %v4268_v60 = vadd.f32 %v6938_v11, %v4227_v30  ;;  %v4229_v16 = vadd.f32 %v4228_v58, %v4188_v48 }
 0x364   :  { %v4230_v33 = vpop.f32.mrf.mxu1  ;;  %v4351_v61 = vpop.f32.mrf.mxu0 }
 0x365   :  { %v4270_v57 = vadd.f32 %v6941_v17, %v4229_v16  ;;  %v4399_v34 = vmax.f32 %v4268_v60, 0.0  ;;  %v2581_v17 = vrot.slane %v6913_v21, %v439_v41 }
 0x366   :  { %v4231_v0 = vpop.f32.mrf.mxu1  ;;  %v4353_v3 = vpop.f32.mrf.mxu0 }
 0x367   :  { %v4400_v32 = vmax.f32 %v4270_v57, 0.0  ;;  %v4405_v9 = vpack.c.bf16 %v4399_v34, %v4399_v34 }
 0x368   :  { %v4354_v5 = vpop.f32.mrf.mxu0 }
 0x369   :  { %v4406_v8 = vpack.c.bf16 %v4400_v32, %v4400_v32 }
 0x36b   :  { %4872 = vmatprep.mubr.bf16.mxu1 %v4406_v8 }
 0x36c   :  { %4873 = vmatmul.mubr.bf16.vlgmr.msra.gmra.mxu1 %v4405_v9 }
 0x3a0   :  { %v4308_v11 = vpop.f32.mrf.mxu1 }
 0x3a1   :  { %v4309_v18 = vadd.f32 %v4308_v11, %v2577_v55 }
 0x3a2   :  { %v4310_v13 = vpop.f32.mrf.mxu1 }
 0x3a3   :  { %v4311_v19 = vadd.f32 %v4310_v13, %v2581_v17  ;;  %v4350_v20 = vadd.f32 %v4349_v37, %v4309_v18 }
 0x3a4   :  { %v4312_v14 = vpop.f32.mrf.mxu1 }
 0x3a5   :  { %v4352_v35 = vadd.f32 %v4351_v61, %v4311_v19 }
 0x3a6   :  { %v4313_v15 = vpop.f32.mrf.mxu1 }
 0x3e0   :  { %v4390_v4 = vpop.f32.mrf.mxu1 }
 0x3e1   :  { %v4391_v59 = vadd.f32 %v4390_v4, %v4350_v20 }
 0x3e2   :  { %v4392_v22 = vpop.f32.mrf.mxu1 }
 0x3e3   :  { %v4393_v24 = vadd.f32 %v4392_v22, %v4352_v35  ;;  %v4401_v23 = vmax.f32 %v4391_v59, 0.0 }
 0x3e4   :  { %v4394_v25 = vpop.f32.mrf.mxu1 }
 0x3e5   :  { %v4402_v28 = vmax.f32 %v4393_v24, 0.0  ;;  %v4407_v31 = vpack.c.bf16 %v4401_v23, %v4401_v23 }
 0x3e6   :  { %v4395_v29 = vpop.f32.mrf.mxu1 }
 0x3e7   :  { %v4408_v45 = vpack.c.bf16 %v4402_v28, %v4402_v28 }
 0x3e9   :  { %4912 = vmatprep.mubr.bf16.mxu0 %v4408_v45 }
 0x3ea   :  { %4913 = vmatmul.mubr.bf16.vlgmr.msra.gmra.mxu0 %v4407_v31  ;;  %v5580_v7 = vpop.f32.mrf.mxu0 }
 0x3ec   :  { %v5581_v26 = vpop.f32.mrf.mxu0 }
 0x3ed   :  { %v5582_v38 = vadd.f32 %v5581_v26, %v5580_v7 }
 0x3ee   :  { %v5583_v41 = vpop.f32.mrf.mxu0 }
 0x3ef   :  { %v4835_v36 = vadd.f32 %v5582_v38, %v5515_v39 }
 0x3f0   :  { %v5584_v21 = vpop.f32.mrf.mxu0 }
 0x42c   :  { %v5602_v52 = vpop.f32.mrf.mxu1 }
 0x42e   :  { %v5603_v42 = vpop.f32.mrf.mxu1 }
 0x42f   :  { %v5604_v43 = vadd.f32 %v5603_v42, %v5602_v52 }
 0x430   :  { %v5605_v63 = vpop.f32.mrf.mxu1 }
 0x431   :  { %v4875_v44 = vadd.f32 %v5604_v43, %v4835_v36 }
 0x432   :  { %v5606_v2 = vpop.f32.mrf.mxu1 }
 0x4aa   :  { %v5624_v6 = vpop.f32.mrf.mxu0 }
 0x4ac   :  { %v5625_v40 = vpop.f32.mrf.mxu0 }
 0x4ad   :  { %v5626_v10 = vadd.f32 %v5625_v40, %v5624_v6 }
 0x4ae   :  { %v5627_v27 = vpop.f32.mrf.mxu0 }
 0x4af   :  { %v4915_v46 = vadd.f32 %v5626_v10, %v4875_v44 }
 0x4b0   :  { %v5628_v47 = vpop.f32.mrf.mxu0 }
 0x4b1   :  { %4920 = vst [vmem:[#allocation14] sm:$0xff] %v4915_v46 }
 0x4b2   :  { %6705 = shalt.err (!%p6702_p11)
}
 0x4b3   :  { %4930 = dma.vmem_to_hbm [thread:$0]  %s4928_s6, 128, %s6969_s7, [#allocation4]  }
 0x4b4   :  { %6722 = dma.done.wait [#allocation4], 128  }
 0x4b5   :  { %6723 = vsyncadd [#allocation4], 4294967168 }
 0x4b6   :  { %4934 = vsyncpa [#allocation3], 1 }
 0x4b7   :  { %4935 = vsyncpa [#allocation6], 1 }
 0x4b8   :  { %4936 = vsyncpa [#allocation9], 1 }
 0x4b9   :  { %4937 = vsyncpa [#allocation12], 1 }
 0x4ba   :  { %4938 = vsyncpa [#allocation4], 1 }

</bundles_post_ra>
